<compile_context>
chip_gen: v7x
topology: tpu7x:2x2x1
jax: 0.10.0
libtpu: 0.0.40
codegen_flags: <defaults>
</compile_context>

<pallas_src>
import functools

import jax
import jax.numpy as jnp
from jax.experimental import pallas as pl
from jax.experimental.pallas import tpu as pltpu


def _round_up(x, m):
    return (x + m - 1) // m * m


def lstm_lm_kernel(x_ref, wih_ref, whh_ref, b_ref, wout_ref, bout_ref,
                   out_ref, gates_scr, hall_scr, *, seq_len, batch_pad):
    """Whole forward pass in one invocation (layer-by-layer, cuDNN-style LSTM)."""
    n_layers = wih_ref.shape[0]
    Hp = x_ref.shape[1]
    T, Bp = seq_len, batch_pad

    x = x_ref[...]                                    # (T*Bp, Hp) layer-0 input (embedded)
    for layer in range(n_layers):                     # static unroll, n_layers is small
        # (1) Batched, non-recurrent input projection for ALL timesteps at once:
        #     one (T*Bp, Hp) @ (Hp, 4*Hp) MXU matmul + pre-summed bias (b_ih + b_hh).
        gates_scr[...] = (
            jnp.dot(x, wih_ref[layer], preferred_element_type=jnp.float32)
            + b_ref[layer]                            # (1, 4*Hp) broadcasts over rows
        )

        # (2) Serial recurrence: only h @ W_hh stays inside the time loop.
        #     T is static and small, so this Python loop fully unrolls into
        #     straight-line code (same codegen as lax.fori_loop(..., unroll=True));
        #     every slice start is a static multiple of 8 sublanes / 128 lanes.
        #     TODO(synk): for long sequences switch to lax.fori_loop with partial
        #     unroll to bound code size.
        h = jnp.zeros((Bp, Hp), jnp.float32)
        c = jnp.zeros((Bp, Hp), jnp.float32)
        for t in range(T):
            g = gates_scr[t * Bp:(t + 1) * Bp, :] + jnp.dot(
                h, whh_ref[layer], preferred_element_type=jnp.float32)
            # PyTorch gate order i, f, g, o; each slice is a lane-aligned 128-wide block.
            i_g = jax.nn.sigmoid(g[:, 0 * Hp:1 * Hp])
            f_g = jax.nn.sigmoid(g[:, 1 * Hp:2 * Hp])
            g_g = jnp.tanh(g[:, 2 * Hp:3 * Hp])
            o_g = jax.nn.sigmoid(g[:, 3 * Hp:4 * Hp])
            c = f_g * c + i_g * g_g
            h = o_g * jnp.tanh(c)
            hall_scr[t * Bp:(t + 1) * Bp, :] = h      # collect h_t for the next layer / head
        x = hall_scr[...]       # next layer's input (inter-layer dropout = identity in eval)

    # (3) Batched output head over all T*Bp rows: one (T*Bp, Hp) @ (Hp, Vp) matmul,
    #     then a lane-dense log_softmax.  Padded class lanes carry a -1e30 bias and
    #     zero weight columns, so exp() underflows to 0 and they do not perturb the sum.
    logits = jnp.dot(x, wout_ref[...], preferred_element_type=jnp.float32) + bout_ref[...]
    m = jnp.max(logits, axis=1, keepdims=True)
    shifted = logits - m
    lse = jnp.log(jnp.sum(jnp.exp(shifted), axis=1, keepdims=True))
    out_ref[...] = shifted - lse                      # (T*Bp, Vp) log-probabilities


def _run_lstm_lm(x, wih, whh, b, wout, bout, *, seq_len, batch_pad):
    TB, Hp = x.shape
    L = wih.shape[0]
    Vp = wout.shape[1]
    kernel = functools.partial(lstm_lm_kernel, seq_len=seq_len, batch_pad=batch_pad)
    return pl.pallas_call(
        kernel,
        out_shape=jax.ShapeDtypeStruct((TB, Vp), jnp.float32),
        grid_spec=pltpu.PrefetchScalarGridSpec(
            num_scalar_prefetch=0,
            grid=(1,),                                # single step: in-kernel time loop
            in_specs=[
                pl.BlockSpec((TB, Hp), lambda i: (0, 0)),          # embedded activations
                pl.BlockSpec((L, Hp, 4 * Hp), lambda i: (0, 0, 0)),  # W_ih^T (padded)
                pl.BlockSpec((L, Hp, 4 * Hp), lambda i: (0, 0, 0)),  # W_hh^T (padded)
                pl.BlockSpec((L, 1, 4 * Hp), lambda i: (0, 0, 0)),   # b_ih + b_hh (padded)
                pl.BlockSpec((Hp, Vp), lambda i: (0, 0)),            # W_out^T (padded)
                pl.BlockSpec((1, Vp), lambda i: (0, 0)),             # b_out (padded, -1e30)
            ],
            out_specs=pl.BlockSpec((TB, Vp), lambda i: (0, 0)),
            scratch_shapes=[
                pltpu.VMEM((TB, 4 * Hp), jnp.float32),  # precomputed input-projection gates
                pltpu.VMEM((TB, Hp), jnp.float32),      # per-layer h_t for all timesteps
            ],
        ),
        compiler_params=pltpu.CompilerParams(dimension_semantics=("arbitrary",)),
    )(x, wih, whh, b, wout, bout)


@functools.partial(jax.jit, static_argnames=("n_class",))
def language_model_forward(inputs, padded, *, n_class):
    """Teacher-forcing forward pass of `LanguageModel` (eval mode).

    Returns a (T, B, n_class) array of per-step log-probabilities; this equals the
    PyTorch module's `outputs` list stacked along dim 0 (use `list(out)` to recover it).
    """
    B, T = inputs.shape
    Bp = _round_up(B, 8)                              # sublane-pad the batch
    Hp = padded["embedding"].shape[1]
    Vp = padded["w_out"].shape[1]
    # Embedding lookup directly in time-major order (no materialized transpose),
    # zero-padded to (T*Bp, Hp) so every kernel tile is (8,128)-aligned.
    emb = padded["embedding"][inputs.T]               # (T, B, Hp)
    x = jnp.zeros((T, Bp, Hp), jnp.float32).at[:, :B, :].set(emb)
    x = x.reshape(T * Bp, Hp)
    out = _run_lstm_lm(x, padded["w_ih"], padded["w_hh"], padded["b"],
                       padded["w_out"], padded["b_out"], seq_len=T, batch_pad=Bp)
    return out.reshape(T, Bp, Vp)[:, :B, :n_class]


def init_params(key, n_class, n_layers, hidden_size):
    """Deterministic PyTorch-style init (uniform(-1/sqrt(H), 1/sqrt(H)) for LSTM/Linear)."""
    ks = jax.random.split(key, 2 + 4 * n_layers + 2)
    k = 1.0 / jnp.sqrt(hidden_size)
    emb = jax.random.normal(ks[0], (n_class, hidden_size), jnp.float32)
    w_ih_t, w_hh_t, b_ih, b_hh = [], [], [], []
    for layer in range(n_layers):
        kk = ks[2 + 4 * layer: 2 + 4 * (layer + 1)]
        w_ih = jax.random.uniform(kk[0], (4 * hidden_size, hidden_size), jnp.float32, -k, k)
        w_hh = jax.random.uniform(kk[1], (4 * hidden_size, hidden_size), jnp.float32, -k, k)
        w_ih_t.append(w_ih.T)                          # (H, 4H), gate order i,f,g,o
        w_hh_t.append(w_hh.T)
        b_ih.append(jax.random.uniform(kk[2], (1, 4 * hidden_size), jnp.float32, -k, k))
        b_hh.append(jax.random.uniform(kk[3], (1, 4 * hidden_size), jnp.float32, -k, k))
    w_out = jax.random.uniform(ks[-2], (n_class, hidden_size), jnp.float32, -k, k)
    b_out = jax.random.uniform(ks[-1], (1, n_class), jnp.float32, -k, k)
    return {
        "embedding": emb,
        "w_ih_t": jnp.stack(w_ih_t),                   # (L, H, 4H)
        "w_hh_t": jnp.stack(w_hh_t),                   # (L, H, 4H)
        "b_ih": jnp.stack(b_ih),                       # (L, 1, 4H)
        "b_hh": jnp.stack(b_hh),                       # (L, 1, 4H)
        "w_out_t": w_out.T,                            # (H, V)
        "b_out": b_out,                                # (1, V)
    }


def pad_params(params):
    """Pad weights to TPU-friendly shapes.

    Hidden -> multiple of 128 lanes per gate, classes -> multiple of 128 lanes, and
    b_ih + b_hh pre-summed.  Padded gate weights/biases are zero so padded h/c lanes
    stay exactly 0; padded class lanes get a -1e30 bias so they vanish in log_softmax.
    """
    H = params["w_ih_t"].shape[1]
    V = params["w_out_t"].shape[1]
    L = params["w_ih_t"].shape[0]
    Hp = _round_up(H, 128)
    Vp = _round_up(V, 128)

    emb = jnp.zeros((params["embedding"].shape[0], Hp), jnp.float32)
    emb = emb.at[:, :H].set(params["embedding"])

    def pad_w(w_t):                                    # (H, 4H) -> (Hp, 4Hp), per-gate blocks
        out = jnp.zeros((Hp, 4 * Hp), jnp.float32)
        for g in range(4):
            out = out.at[:H, g * Hp:g * Hp + H].set(w_t[:, g * H:(g + 1) * H])
        return out

    def pad_b(bv):                                     # (1, 4H) -> (1, 4Hp)
        out = jnp.zeros((1, 4 * Hp), jnp.float32)
        for g in range(4):
            out = out.at[:, g * Hp:g * Hp + H].set(bv[:, g * H:(g + 1) * H])
        return out

    w_ih = jnp.stack([pad_w(params["w_ih_t"][l]) for l in range(L)])
    w_hh = jnp.stack([pad_w(params["w_hh_t"][l]) for l in range(L)])
    b = jnp.stack([pad_b(params["b_ih"][l] + params["b_hh"][l]) for l in range(L)])

    w_out = jnp.zeros((Hp, Vp), jnp.float32).at[:H, :V].set(params["w_out_t"])
    b_out = jnp.full((1, Vp), -1e30, jnp.float32).at[:, :V].set(params["b_out"])

    # TODO(synk): for realistic H/V on v6e/v7x, cast w_ih/w_hh/w_out to bfloat16 here
    # (bf16 MXU peak, half the weight VMEM/DMA bytes) while keeping f32 accumulation in
    # the kernel; kept f32 at these tiny shapes for exact parity with the f32 reference.
    return {"embedding": emb, "w_ih": w_ih, "w_hh": w_hh, "b": b,
            "w_out": w_out, "b_out": b_out}


def _reference_forward(inputs, params):
    """Pure-JAX reference (same math, unpadded) -> (T, B, n_class)."""
    emb = params["embedding"][inputs]                  # (B, T, H)
    B, T, H = emb.shape
    L = params["w_ih_t"].shape[0]
    h = jnp.zeros((L, B, H), jnp.float32)
    c = jnp.zeros((L, B, H), jnp.float32)
    outs = []
    for t in range(T):
        x = emb[:, t, :]
        for layer in range(L):
            g = (x @ params["w_ih_t"][layer] + h[layer] @ params["w_hh_t"][layer]
                 + params["b_ih"][layer] + params["b_hh"][layer])
            i_g = jax.nn.sigmoid(g[:, 0 * H:1 * H])
            f_g = jax.nn.sigmoid(g[:, 1 * H:2 * H])
            g_g = jnp.tanh(g[:, 2 * H:3 * H])
            o_g = jax.nn.sigmoid(g[:, 3 * H:4 * H])
            c_new = f_g * c[layer] + i_g * g_g
            h_new = o_g * jnp.tanh(c_new)
            c = c.at[layer].set(c_new)
            h = h.at[layer].set(h_new)
            x = h_new
        logits = x @ params["w_out_t"] + params["b_out"][0][None, :]
        outs.append(jax.nn.log_softmax(logits, axis=1))
    return jnp.stack(outs, axis=0)


if __name__ == "__main__":
    # Small shapes consistent with the module: B=2, seq=8, hidden=32, n_class=16, 2 LSTM layers.
    n_class, n_layers, hidden_size = 16, 2, 32
    sos_id, eos_id = 1, 2
    batch, seq = 2, 8

    key = jax.random.PRNGKey(0)
    pkey, ikey = jax.random.split(key)
    params = init_params(pkey, n_class, n_layers, hidden_size)
    padded = pad_params(params)

    # Token ids in [3, n_class) so no EOS is present (teacher-forcing EOS filter is identity).
    inputs = jax.random.randint(ikey, (batch, seq), 3, n_class, dtype=jnp.int32)
    inputs = inputs.at[:, 0].set(sos_id)

    out = language_model_forward(inputs, padded, n_class=n_class)   # (T, B, n_class)
    out = jax.block_until_ready(out)

    ref = _reference_forward(inputs, params)
    assert out.shape == (seq, batch, n_class)
    assert jnp.max(jnp.abs(out - ref)) < 1e-4

    print("KERNEL_OK")
</pallas_src>

<mosaic_0001>
module attributes {stable_mosaic.version = 11 : i64} {
  func.func @lstm_lm_kernel(%arg0: i32, %arg1: memref<64x128xf32, #tpu.memory_space<vmem>>, %arg2: memref<2x128x512xf32, #tpu.memory_space<vmem>>, %arg3: memref<2x128x512xf32, #tpu.memory_space<vmem>>, %arg4: memref<2x1x512xf32, #tpu.memory_space<vmem>>, %arg5: memref<128x128xf32, #tpu.memory_space<vmem>>, %arg6: memref<1x128xf32, #tpu.memory_space<vmem>>, %arg7: memref<64x128xf32, #tpu.memory_space<vmem>>, %arg8: memref<64x512xf32, #tpu.memory_space<vmem>>, %arg9: memref<64x128xf32, #tpu.memory_space<vmem>>) attributes {dimension_semantics = [#tpu.dimension_semantics<arbitrary>], iteration_bounds = array<i64: 1>, scalar_prefetch = 0 : i64, scratch_operands = 2 : i64, tpu.core_type = #tpu.core_type<tc>, window_params = [{pipeline_mode = #tpu.pipeline_mode<synchronous>, transform_indices = @transform_0, window_bounds = array<i64: 64, 128>}, {pipeline_mode = #tpu.pipeline_mode<synchronous>, transform_indices = @transform_1, window_bounds = array<i64: 2, 128, 512>}, {pipeline_mode = #tpu.pipeline_mode<synchronous>, transform_indices = @transform_2, window_bounds = array<i64: 2, 128, 512>}, {pipeline_mode = #tpu.pipeline_mode<synchronous>, transform_indices = @transform_3, window_bounds = array<i64: 2, 1, 512>}, {pipeline_mode = #tpu.pipeline_mode<synchronous>, transform_indices = @transform_4, window_bounds = array<i64: 128, 128>}, {pipeline_mode = #tpu.pipeline_mode<synchronous>, transform_indices = @transform_5, window_bounds = array<i64: 1, 128>}, {pipeline_mode = #tpu.pipeline_mode<synchronous>, transform_indices = @transform_6, window_bounds = array<i64: 64, 128>}]} {
    %c0 = arith.constant 0 : index
    %c0_0 = arith.constant 0 : index
    %0 = vector.load %arg1[%c0, %c0_0] : memref<64x128xf32, #tpu.memory_space<vmem>>, vector<64x128xf32>
    %c0_1 = arith.constant 0 : index
    %c0_2 = arith.constant 0 : index
    %c0_3 = arith.constant 0 : index
    %1 = vector.load %arg2[%c0_1, %c0_2, %c0_3] : memref<2x128x512xf32, #tpu.memory_space<vmem>>, vector<1x128x512xf32>
    %2 = vector.shape_cast %1 : vector<1x128x512xf32> to vector<128x512xf32>
    %cst = arith.constant dense<0.000000e+00> : vector<64x512xf32>
    %3 = tpu.matmul %0, %2, %cst {dimension_numbers = #tpu.dot_dimension_numbers<[1], [0], [0], [1], [0, 0, 1, 1], [], []>} : vector<64x128xf32>, vector<128x512xf32>, vector<64x512xf32> -> vector<64x512xf32>
    %c0_4 = arith.constant 0 : index
    %c0_5 = arith.constant 0 : index
    %c0_6 = arith.constant 0 : index
    %4 = vector.load %arg4[%c0_4, %c0_5, %c0_6] : memref<2x1x512xf32, #tpu.memory_space<vmem>>, vector<1x1x512xf32>
    %5 = vector.shape_cast %4 : vector<1x1x512xf32> to vector<1x512xf32>
    %6 = vector.broadcast %5 : vector<1x512xf32> to vector<64x512xf32>
    %7 = arith.addf %3, %6 : vector<64x512xf32>
    %c0_7 = arith.constant 0 : index
    %c0_8 = arith.constant 0 : index
    %8 = vector.load %arg8[%c0_7, %c0_8] : memref<64x512xf32, #tpu.memory_space<vmem>>, vector<64x512xf32>
    tpu.vector_store %arg8[%c0_7, %c0_8], %7 {strides = array<i32>} : memref<64x512xf32, #tpu.memory_space<vmem>>, vector<64x512xf32>,
    %cst_9 = arith.constant 0.000000e+00 : f32
    %9 = vector.broadcast %cst_9 : f32 to vector<8x128xf32>
    %cst_10 = arith.constant 0.000000e+00 : f32
    %10 = vector.broadcast %cst_10 : f32 to vector<8x128xf32>
    %c0_11 = arith.constant 0 : index
    %c0_12 = arith.constant 0 : index
    %11 = vector.load %arg8[%c0_11, %c0_12] : memref<64x512xf32, #tpu.memory_space<vmem>>, vector<8x512xf32>
    %c0_13 = arith.constant 0 : index
    %c0_14 = arith.constant 0 : index
    %c0_15 = arith.constant 0 : index
    %12 = vector.load %arg3[%c0_13, %c0_14, %c0_15] : memref<2x128x512xf32, #tpu.memory_space<vmem>>, vector<1x128x512xf32>
    %13 = vector.shape_cast %12 : vector<1x128x512xf32> to vector<128x512xf32>
    %cst_16 = arith.constant dense<0.000000e+00> : vector<8x512xf32>
    %14 = tpu.matmul %9, %13, %cst_16 {dimension_numbers = #tpu.dot_dimension_numbers<[1], [0], [0], [1], [0, 0, 1, 1], [], []>} : vector<8x128xf32>, vector<128x512xf32>, vector<8x512xf32> -> vector<8x512xf32>
    %15 = arith.addf %11, %14 : vector<8x512xf32>
    %16 = vector.extract_strided_slice %15 {offsets = [0, 0], sizes = [8, 128], strides = [1, 1]} : vector<8x512xf32> to vector<8x128xf32>
    %17 = arith.negf %16 : vector<8x128xf32>
    %18 = math.exp %17 : vector<8x128xf32>
    %cst_17 = arith.constant 1.000000e+00 : f32
    %19 = vector.broadcast %cst_17 : f32 to vector<8x128xf32>
    %20 = arith.addf %19, %18 : vector<8x128xf32>
    %21 = arith.divf %19, %20 : vector<8x128xf32>
    %22 = vector.extract_strided_slice %15 {offsets = [0, 128], sizes = [8, 128], strides = [1, 1]} : vector<8x512xf32> to vector<8x128xf32>
    %23 = arith.negf %22 : vector<8x128xf32>
    %24 = math.exp %23 : vector<8x128xf32>
    %cst_18 = arith.constant 1.000000e+00 : f32
    %25 = vector.broadcast %cst_18 : f32 to vector<8x128xf32>
    %26 = arith.addf %25, %24 : vector<8x128xf32>
    %27 = arith.divf %25, %26 : vector<8x128xf32>
    %28 = vector.extract_strided_slice %15 {offsets = [0, 256], sizes = [8, 128], strides = [1, 1]} : vector<8x512xf32> to vector<8x128xf32>
    %29 = math.tanh %28 : vector<8x128xf32>
    %30 = vector.extract_strided_slice %15 {offsets = [0, 384], sizes = [8, 128], strides = [1, 1]} : vector<8x512xf32> to vector<8x128xf32>
    %31 = arith.negf %30 : vector<8x128xf32>
    %32 = math.exp %31 : vector<8x128xf32>
    %cst_19 = arith.constant 1.000000e+00 : f32
    %33 = vector.broadcast %cst_19 : f32 to vector<8x128xf32>
    %34 = arith.addf %33, %32 : vector<8x128xf32>
    %35 = arith.divf %33, %34 : vector<8x128xf32>
    %36 = arith.mulf %27, %10 : vector<8x128xf32>
    %37 = arith.mulf %21, %29 : vector<8x128xf32>
    %38 = arith.addf %36, %37 : vector<8x128xf32>
    %39 = math.tanh %38 : vector<8x128xf32>
    %40 = arith.mulf %35, %39 : vector<8x128xf32>
    %c0_20 = arith.constant 0 : index
    %c0_21 = arith.constant 0 : index
    %41 = vector.load %arg9[%c0_20, %c0_21] : memref<64x128xf32, #tpu.memory_space<vmem>>, vector<8x128xf32>
    tpu.vector_store %arg9[%c0_20, %c0_21], %40 {strides = array<i32>} : memref<64x128xf32, #tpu.memory_space<vmem>>, vector<8x128xf32>,
    %c8 = arith.constant 8 : index
    %c0_22 = arith.constant 0 : index
    %42 = vector.load %arg8[%c8, %c0_22] : memref<64x512xf32, #tpu.memory_space<vmem>>, vector<8x512xf32>
    %c0_23 = arith.constant 0 : index
    %c0_24 = arith.constant 0 : index
    %c0_25 = arith.constant 0 : index
    %43 = vector.load %arg3[%c0_23, %c0_24, %c0_25] : memref<2x128x512xf32, #tpu.memory_space<vmem>>, vector<1x128x512xf32>
    %44 = vector.shape_cast %43 : vector<1x128x512xf32> to vector<128x512xf32>
    %cst_26 = arith.constant dense<0.000000e+00> : vector<8x512xf32>
    %45 = tpu.matmul %40, %44, %cst_26 {dimension_numbers = #tpu.dot_dimension_numbers<[1], [0], [0], [1], [0, 0, 1, 1], [], []>} : vector<8x128xf32>, vector<128x512xf32>, vector<8x512xf32> -> vector<8x512xf32>
    %46 = arith.addf %42, %45 : vector<8x512xf32>
    %47 = vector.extract_strided_slice %46 {offsets = [0, 0], sizes = [8, 128], strides = [1, 1]} : vector<8x512xf32> to vector<8x128xf32>
    %48 = arith.negf %47 : vector<8x128xf32>
    %49 = math.exp %48 : vector<8x128xf32>
    %cst_27 = arith.constant 1.000000e+00 : f32
    %50 = vector.broadcast %cst_27 : f32 to vector<8x128xf32>
    %51 = arith.addf %50, %49 : vector<8x128xf32>
    %52 = arith.divf %50, %51 : vector<8x128xf32>
    %53 = vector.extract_strided_slice %46 {offsets = [0, 128], sizes = [8, 128], strides = [1, 1]} : vector<8x512xf32> to vector<8x128xf32>
    %54 = arith.negf %53 : vector<8x128xf32>
    %55 = math.exp %54 : vector<8x128xf32>
    %cst_28 = arith.constant 1.000000e+00 : f32
    %56 = vector.broadcast %cst_28 : f32 to vector<8x128xf32>
    %57 = arith.addf %56, %55 : vector<8x128xf32>
    %58 = arith.divf %56, %57 : vector<8x128xf32>
    %59 = vector.extract_strided_slice %46 {offsets = [0, 256], sizes = [8, 128], strides = [1, 1]} : vector<8x512xf32> to vector<8x128xf32>
    %60 = math.tanh %59 : vector<8x128xf32>
    %61 = vector.extract_strided_slice %46 {offsets = [0, 384], sizes = [8, 128], strides = [1, 1]} : vector<8x512xf32> to vector<8x128xf32>
    %62 = arith.negf %61 : vector<8x128xf32>
    %63 = math.exp %62 : vector<8x128xf32>
    %cst_29 = arith.constant 1.000000e+00 : f32
    %64 = vector.broadcast %cst_29 : f32 to vector<8x128xf32>
    %65 = arith.addf %64, %63 : vector<8x128xf32>
    %66 = arith.divf %64, %65 : vector<8x128xf32>
    %67 = arith.mulf %58, %38 : vector<8x128xf32>
    %68 = arith.mulf %52, %60 : vector<8x128xf32>
    %69 = arith.addf %67, %68 : vector<8x128xf32>
    %70 = math.tanh %69 : vector<8x128xf32>
    %71 = arith.mulf %66, %70 : vector<8x128xf32>
    %c8_30 = arith.constant 8 : index
    %c0_31 = arith.constant 0 : index
    %72 = vector.load %arg9[%c8_30, %c0_31] : memref<64x128xf32, #tpu.memory_space<vmem>>, vector<8x128xf32>
    tpu.vector_store %arg9[%c8_30, %c0_31], %71 {strides = array<i32>} : memref<64x128xf32, #tpu.memory_space<vmem>>, vector<8x128xf32>,
    %c16 = arith.constant 16 : index
    %c0_32 = arith.constant 0 : index
    %73 = vector.load %arg8[%c16, %c0_32] : memref<64x512xf32, #tpu.memory_space<vmem>>, vector<8x512xf32>
    %c0_33 = arith.constant 0 : index
    %c0_34 = arith.constant 0 : index
    %c0_35 = arith.constant 0 : index
    %74 = vector.load %arg3[%c0_33, %c0_34, %c0_35] : memref<2x128x512xf32, #tpu.memory_space<vmem>>, vector<1x128x512xf32>
    %75 = vector.shape_cast %74 : vector<1x128x512xf32> to vector<128x512xf32>
    %cst_36 = arith.constant dense<0.000000e+00> : vector<8x512xf32>
    %76 = tpu.matmul %71, %75, %cst_36 {dimension_numbers = #tpu.dot_dimension_numbers<[1], [0], [0], [1], [0, 0, 1, 1], [], []>} : vector<8x128xf32>, vector<128x512xf32>, vector<8x512xf32> -> vector<8x512xf32>
    %77 = arith.addf %73, %76 : vector<8x512xf32>
    %78 = vector.extract_strided_slice %77 {offsets = [0, 0], sizes = [8, 128], strides = [1, 1]} : vector<8x512xf32> to vector<8x128xf32>
    %79 = arith.negf %78 : vector<8x128xf32>
    %80 = math.exp %79 : vector<8x128xf32>
    %cst_37 = arith.constant 1.000000e+00 : f32
    %81 = vector.broadcast %cst_37 : f32 to vector<8x128xf32>
    %82 = arith.addf %81, %80 : vector<8x128xf32>
    %83 = arith.divf %81, %82 : vector<8x128xf32>
    %84 = vector.extract_strided_slice %77 {offsets = [0, 128], sizes = [8, 128], strides = [1, 1]} : vector<8x512xf32> to vector<8x128xf32>
    %85 = arith.negf %84 : vector<8x128xf32>
    %86 = math.exp %85 : vector<8x128xf32>
    %cst_38 = arith.constant 1.000000e+00 : f32
    %87 = vector.broadcast %cst_38 : f32 to vector<8x128xf32>
    %88 = arith.addf %87, %86 : vector<8x128xf32>
    %89 = arith.divf %87, %88 : vector<8x128xf32>
    %90 = vector.extract_strided_slice %77 {offsets = [0, 256], sizes = [8, 128], strides = [1, 1]} : vector<8x512xf32> to vector<8x128xf32>
    %91 = math.tanh %90 : vector<8x128xf32>
    %92 = vector.extract_strided_slice %77 {offsets = [0, 384], sizes = [8, 128], strides = [1, 1]} : vector<8x512xf32> to vector<8x128xf32>
    %93 = arith.negf %92 : vector<8x128xf32>
    %94 = math.exp %93 : vector<8x128xf32>
    %cst_39 = arith.constant 1.000000e+00 : f32
    %95 = vector.broadcast %cst_39 : f32 to vector<8x128xf32>
    %96 = arith.addf %95, %94 : vector<8x128xf32>
    %97 = arith.divf %95, %96 : vector<8x128xf32>
    %98 = arith.mulf %89, %69 : vector<8x128xf32>
    %99 = arith.mulf %83, %91 : vector<8x128xf32>
    %100 = arith.addf %98, %99 : vector<8x128xf32>
    %101 = math.tanh %100 : vector<8x128xf32>
    %102 = arith.mulf %97, %101 : vector<8x128xf32>
    %c16_40 = arith.constant 16 : index
    %c0_41 = arith.constant 0 : index
    %103 = vector.load %arg9[%c16_40, %c0_41] : memref<64x128xf32, #tpu.memory_space<vmem>>, vector<8x128xf32>
    tpu.vector_store %arg9[%c16_40, %c0_41], %102 {strides = array<i32>} : memref<64x128xf32, #tpu.memory_space<vmem>>, vector<8x128xf32>,
    %c24 = arith.constant 24 : index
    %c0_42 = arith.constant 0 : index
    %104 = vector.load %arg8[%c24, %c0_42] : memref<64x512xf32, #tpu.memory_space<vmem>>, vector<8x512xf32>
    %c0_43 = arith.constant 0 : index
    %c0_44 = arith.constant 0 : index
    %c0_45 = arith.constant 0 : index
    %105 = vector.load %arg3[%c0_43, %c0_44, %c0_45] : memref<2x128x512xf32, #tpu.memory_space<vmem>>, vector<1x128x512xf32>
    %106 = vector.shape_cast %105 : vector<1x128x512xf32> to vector<128x512xf32>
    %cst_46 = arith.constant dense<0.000000e+00> : vector<8x512xf32>
    %107 = tpu.matmul %102, %106, %cst_46 {dimension_numbers = #tpu.dot_dimension_numbers<[1], [0], [0], [1], [0, 0, 1, 1], [], []>} : vector<8x128xf32>, vector<128x512xf32>, vector<8x512xf32> -> vector<8x512xf32>
    %108 = arith.addf %104, %107 : vector<8x512xf32>
    %109 = vector.extract_strided_slice %108 {offsets = [0, 0], sizes = [8, 128], strides = [1, 1]} : vector<8x512xf32> to vector<8x128xf32>
    %110 = arith.negf %109 : vector<8x128xf32>
    %111 = math.exp %110 : vector<8x128xf32>
    %cst_47 = arith.constant 1.000000e+00 : f32
    %112 = vector.broadcast %cst_47 : f32 to vector<8x128xf32>
    %113 = arith.addf %112, %111 : vector<8x128xf32>
    %114 = arith.divf %112, %113 : vector<8x128xf32>
    %115 = vector.extract_strided_slice %108 {offsets = [0, 128], sizes = [8, 128], strides = [1, 1]} : vector<8x512xf32> to vector<8x128xf32>
    %116 = arith.negf %115 : vector<8x128xf32>
    %117 = math.exp %116 : vector<8x128xf32>
    %cst_48 = arith.constant 1.000000e+00 : f32
    %118 = vector.broadcast %cst_48 : f32 to vector<8x128xf32>
    %119 = arith.addf %118, %117 : vector<8x128xf32>
    %120 = arith.divf %118, %119 : vector<8x128xf32>
    %121 = vector.extract_strided_slice %108 {offsets = [0, 256], sizes = [8, 128], strides = [1, 1]} : vector<8x512xf32> to vector<8x128xf32>
    %122 = math.tanh %121 : vector<8x128xf32>
    %123 = vector.extract_strided_slice %108 {offsets = [0, 384], sizes = [8, 128], strides = [1, 1]} : vector<8x512xf32> to vector<8x128xf32>
    %124 = arith.negf %123 : vector<8x128xf32>
    %125 = math.exp %124 : vector<8x128xf32>
    %cst_49 = arith.constant 1.000000e+00 : f32
    %126 = vector.broadcast %cst_49 : f32 to vector<8x128xf32>
    %127 = arith.addf %126, %125 : vector<8x128xf32>
    %128 = arith.divf %126, %127 : vector<8x128xf32>
    %129 = arith.mulf %120, %100 : vector<8x128xf32>
    %130 = arith.mulf %114, %122 : vector<8x128xf32>
    %131 = arith.addf %129, %130 : vector<8x128xf32>
    %132 = math.tanh %131 : vector<8x128xf32>
    %133 = arith.mulf %128, %132 : vector<8x128xf32>
    %c24_50 = arith.constant 24 : index
    %c0_51 = arith.constant 0 : index
    %134 = vector.load %arg9[%c24_50, %c0_51] : memref<64x128xf32, #tpu.memory_space<vmem>>, vector<8x128xf32>
    tpu.vector_store %arg9[%c24_50, %c0_51], %133 {strides = array<i32>} : memref<64x128xf32, #tpu.memory_space<vmem>>, vector<8x128xf32>,
    %c32 = arith.constant 32 : index
    %c0_52 = arith.constant 0 : index
    %135 = vector.load %arg8[%c32, %c0_52] : memref<64x512xf32, #tpu.memory_space<vmem>>, vector<8x512xf32>
    %c0_53 = arith.constant 0 : index
    %c0_54 = arith.constant 0 : index
    %c0_55 = arith.constant 0 : index
    %136 = vector.load %arg3[%c0_53, %c0_54, %c0_55] : memref<2x128x512xf32, #tpu.memory_space<vmem>>, vector<1x128x512xf32>
    %137 = vector.shape_cast %136 : vector<1x128x512xf32> to vector<128x512xf32>
    %cst_56 = arith.constant dense<0.000000e+00> : vector<8x512xf32>
    %138 = tpu.matmul %133, %137, %cst_56 {dimension_numbers = #tpu.dot_dimension_numbers<[1], [0], [0], [1], [0, 0, 1, 1], [], []>} : vector<8x128xf32>, vector<128x512xf32>, vector<8x512xf32> -> vector<8x512xf32>
    %139 = arith.addf %135, %138 : vector<8x512xf32>
    %140 = vector.extract_strided_slice %139 {offsets = [0, 0], sizes = [8, 128], strides = [1, 1]} : vector<8x512xf32> to vector<8x128xf32>
    %141 = arith.negf %140 : vector<8x128xf32>
    %142 = math.exp %141 : vector<8x128xf32>
    %cst_57 = arith.constant 1.000000e+00 : f32
    %143 = vector.broadcast %cst_57 : f32 to vector<8x128xf32>
    %144 = arith.addf %143, %142 : vector<8x128xf32>
    %145 = arith.divf %143, %144 : vector<8x128xf32>
    %146 = vector.extract_strided_slice %139 {offsets = [0, 128], sizes = [8, 128], strides = [1, 1]} : vector<8x512xf32> to vector<8x128xf32>
    %147 = arith.negf %146 : vector<8x128xf32>
    %148 = math.exp %147 : vector<8x128xf32>
    %cst_58 = arith.constant 1.000000e+00 : f32
    %149 = vector.broadcast %cst_58 : f32 to vector<8x128xf32>
    %150 = arith.addf %149, %148 : vector<8x128xf32>
    %151 = arith.divf %149, %150 : vector<8x128xf32>
    %152 = vector.extract_strided_slice %139 {offsets = [0, 256], sizes = [8, 128], strides = [1, 1]} : vector<8x512xf32> to vector<8x128xf32>
    %153 = math.tanh %152 : vector<8x128xf32>
    %154 = vector.extract_strided_slice %139 {offsets = [0, 384], sizes = [8, 128], strides = [1, 1]} : vector<8x512xf32> to vector<8x128xf32>
    %155 = arith.negf %154 : vector<8x128xf32>
    %156 = math.exp %155 : vector<8x128xf32>
    %cst_59 = arith.constant 1.000000e+00 : f32
    %157 = vector.broadcast %cst_59 : f32 to vector<8x128xf32>
    %158 = arith.addf %157, %156 : vector<8x128xf32>
    %159 = arith.divf %157, %158 : vector<8x128xf32>
    %160 = arith.mulf %151, %131 : vector<8x128xf32>
    %161 = arith.mulf %145, %153 : vector<8x128xf32>
    %162 = arith.addf %160, %161 : vector<8x128xf32>
    %163 = math.tanh %162 : vector<8x128xf32>
    %164 = arith.mulf %159, %163 : vector<8x128xf32>
    %c32_60 = arith.constant 32 : index
    %c0_61 = arith.constant 0 : index
    %165 = vector.load %arg9[%c32_60, %c0_61] : memref<64x128xf32, #tpu.memory_space<vmem>>, vector<8x128xf32>
    tpu.vector_store %arg9[%c32_60, %c0_61], %164 {strides = array<i32>} : memref<64x128xf32, #tpu.memory_space<vmem>>, vector<8x128xf32>,
    %c40 = arith.constant 40 : index
    %c0_62 = arith.constant 0 : index
    %166 = vector.load %arg8[%c40, %c0_62] : memref<64x512xf32, #tpu.memory_space<vmem>>, vector<8x512xf32>
    %c0_63 = arith.constant 0 : index
    %c0_64 = arith.constant 0 : index
    %c0_65 = arith.constant 0 : index
    %167 = vector.load %arg3[%c0_63, %c0_64, %c0_65] : memref<2x128x512xf32, #tpu.memory_space<vmem>>, vector<1x128x512xf32>
    %168 = vector.shape_cast %167 : vector<1x128x512xf32> to vector<128x512xf32>
    %cst_66 = arith.constant dense<0.000000e+00> : vector<8x512xf32>
    %169 = tpu.matmul %164, %168, %cst_66 {dimension_numbers = #tpu.dot_dimension_numbers<[1], [0], [0], [1], [0, 0, 1, 1], [], []>} : vector<8x128xf32>, vector<128x512xf32>, vector<8x512xf32> -> vector<8x512xf32>
    %170 = arith.addf %166, %169 : vector<8x512xf32>
    %171 = vector.extract_strided_slice %170 {offsets = [0, 0], sizes = [8, 128], strides = [1, 1]} : vector<8x512xf32> to vector<8x128xf32>
    %172 = arith.negf %171 : vector<8x128xf32>
    %173 = math.exp %172 : vector<8x128xf32>
    %cst_67 = arith.constant 1.000000e+00 : f32
    %174 = vector.broadcast %cst_67 : f32 to vector<8x128xf32>
    %175 = arith.addf %174, %173 : vector<8x128xf32>
    %176 = arith.divf %174, %175 : vector<8x128xf32>
    %177 = vector.extract_strided_slice %170 {offsets = [0, 128], sizes = [8, 128], strides = [1, 1]} : vector<8x512xf32> to vector<8x128xf32>
    %178 = arith.negf %177 : vector<8x128xf32>
    %179 = math.exp %178 : vector<8x128xf32>
    %cst_68 = arith.constant 1.000000e+00 : f32
    %180 = vector.broadcast %cst_68 : f32 to vector<8x128xf32>
    %181 = arith.addf %180, %179 : vector<8x128xf32>
    %182 = arith.divf %180, %181 : vector<8x128xf32>
    %183 = vector.extract_strided_slice %170 {offsets = [0, 256], sizes = [8, 128], strides = [1, 1]} : vector<8x512xf32> to vector<8x128xf32>
    %184 = math.tanh %183 : vector<8x128xf32>
    %185 = vector.extract_strided_slice %170 {offsets = [0, 384], sizes = [8, 128], strides = [1, 1]} : vector<8x512xf32> to vector<8x128xf32>
    %186 = arith.negf %185 : vector<8x128xf32>
    %187 = math.exp %186 : vector<8x128xf32>
    %cst_69 = arith.constant 1.000000e+00 : f32
    %188 = vector.broadcast %cst_69 : f32 to vector<8x128xf32>
    %189 = arith.addf %188, %187 : vector<8x128xf32>
    %190 = arith.divf %188, %189 : vector<8x128xf32>
    %191 = arith.mulf %182, %162 : vector<8x128xf32>
    %192 = arith.mulf %176, %184 : vector<8x128xf32>
    %193 = arith.addf %191, %192 : vector<8x128xf32>
    %194 = math.tanh %193 : vector<8x128xf32>
    %195 = arith.mulf %190, %194 : vector<8x128xf32>
    %c40_70 = arith.constant 40 : index
    %c0_71 = arith.constant 0 : index
    %196 = vector.load %arg9[%c40_70, %c0_71] : memref<64x128xf32, #tpu.memory_space<vmem>>, vector<8x128xf32>
    tpu.vector_store %arg9[%c40_70, %c0_71], %195 {strides = array<i32>} : memref<64x128xf32, #tpu.memory_space<vmem>>, vector<8x128xf32>,
    %c48 = arith.constant 48 : index
    %c0_72 = arith.constant 0 : index
    %197 = vector.load %arg8[%c48, %c0_72] : memref<64x512xf32, #tpu.memory_space<vmem>>, vector<8x512xf32>
    %c0_73 = arith.constant 0 : index
    %c0_74 = arith.constant 0 : index
    %c0_75 = arith.constant 0 : index
    %198 = vector.load %arg3[%c0_73, %c0_74, %c0_75] : memref<2x128x512xf32, #tpu.memory_space<vmem>>, vector<1x128x512xf32>
    %199 = vector.shape_cast %198 : vector<1x128x512xf32> to vector<128x512xf32>
    %cst_76 = arith.constant dense<0.000000e+00> : vector<8x512xf32>
    %200 = tpu.matmul %195, %199, %cst_76 {dimension_numbers = #tpu.dot_dimension_numbers<[1], [0], [0], [1], [0, 0, 1, 1], [], []>} : vector<8x128xf32>, vector<128x512xf32>, vector<8x512xf32> -> vector<8x512xf32>
    %201 = arith.addf %197, %200 : vector<8x512xf32>
    %202 = vector.extract_strided_slice %201 {offsets = [0, 0], sizes = [8, 128], strides = [1, 1]} : vector<8x512xf32> to vector<8x128xf32>
    %203 = arith.negf %202 : vector<8x128xf32>
    %204 = math.exp %203 : vector<8x128xf32>
    %cst_77 = arith.constant 1.000000e+00 : f32
    %205 = vector.broadcast %cst_77 : f32 to vector<8x128xf32>
    %206 = arith.addf %205, %204 : vector<8x128xf32>
    %207 = arith.divf %205, %206 : vector<8x128xf32>
    %208 = vector.extract_strided_slice %201 {offsets = [0, 128], sizes = [8, 128], strides = [1, 1]} : vector<8x512xf32> to vector<8x128xf32>
    %209 = arith.negf %208 : vector<8x128xf32>
    %210 = math.exp %209 : vector<8x128xf32>
    %cst_78 = arith.constant 1.000000e+00 : f32
    %211 = vector.broadcast %cst_78 : f32 to vector<8x128xf32>
    %212 = arith.addf %211, %210 : vector<8x128xf32>
    %213 = arith.divf %211, %212 : vector<8x128xf32>
    %214 = vector.extract_strided_slice %201 {offsets = [0, 256], sizes = [8, 128], strides = [1, 1]} : vector<8x512xf32> to vector<8x128xf32>
    %215 = math.tanh %214 : vector<8x128xf32>
    %216 = vector.extract_strided_slice %201 {offsets = [0, 384], sizes = [8, 128], strides = [1, 1]} : vector<8x512xf32> to vector<8x128xf32>
    %217 = arith.negf %216 : vector<8x128xf32>
    %218 = math.exp %217 : vector<8x128xf32>
    %cst_79 = arith.constant 1.000000e+00 : f32
    %219 = vector.broadcast %cst_79 : f32 to vector<8x128xf32>
    %220 = arith.addf %219, %218 : vector<8x128xf32>
    %221 = arith.divf %219, %220 : vector<8x128xf32>
    %222 = arith.mulf %213, %193 : vector<8x128xf32>
    %223 = arith.mulf %207, %215 : vector<8x128xf32>
    %224 = arith.addf %222, %223 : vector<8x128xf32>
    %225 = math.tanh %224 : vector<8x128xf32>
    %226 = arith.mulf %221, %225 : vector<8x128xf32>
    %c48_80 = arith.constant 48 : index
    %c0_81 = arith.constant 0 : index
    %227 = vector.load %arg9[%c48_80, %c0_81] : memref<64x128xf32, #tpu.memory_space<vmem>>, vector<8x128xf32>
    tpu.vector_store %arg9[%c48_80, %c0_81], %226 {strides = array<i32>} : memref<64x128xf32, #tpu.memory_space<vmem>>, vector<8x128xf32>,
    %c56 = arith.constant 56 : index
    %c0_82 = arith.constant 0 : index
    %228 = vector.load %arg8[%c56, %c0_82] : memref<64x512xf32, #tpu.memory_space<vmem>>, vector<8x512xf32>
    %c0_83 = arith.constant 0 : index
    %c0_84 = arith.constant 0 : index
    %c0_85 = arith.constant 0 : index
    %229 = vector.load %arg3[%c0_83, %c0_84, %c0_85] : memref<2x128x512xf32, #tpu.memory_space<vmem>>, vector<1x128x512xf32>
    %230 = vector.shape_cast %229 : vector<1x128x512xf32> to vector<128x512xf32>
    %cst_86 = arith.constant dense<0.000000e+00> : vector<8x512xf32>
    %231 = tpu.matmul %226, %230, %cst_86 {dimension_numbers = #tpu.dot_dimension_numbers<[1], [0], [0], [1], [0, 0, 1, 1], [], []>} : vector<8x128xf32>, vector<128x512xf32>, vector<8x512xf32> -> vector<8x512xf32>
    %232 = arith.addf %228, %231 : vector<8x512xf32>
    %233 = vector.extract_strided_slice %232 {offsets = [0, 0], sizes = [8, 128], strides = [1, 1]} : vector<8x512xf32> to vector<8x128xf32>
    %234 = arith.negf %233 : vector<8x128xf32>
    %235 = math.exp %234 : vector<8x128xf32>
    %cst_87 = arith.constant 1.000000e+00 : f32
    %236 = vector.broadcast %cst_87 : f32 to vector<8x128xf32>
    %237 = arith.addf %236, %235 : vector<8x128xf32>
    %238 = arith.divf %236, %237 : vector<8x128xf32>
    %239 = vector.extract_strided_slice %232 {offsets = [0, 128], sizes = [8, 128], strides = [1, 1]} : vector<8x512xf32> to vector<8x128xf32>
    %240 = arith.negf %239 : vector<8x128xf32>
    %241 = math.exp %240 : vector<8x128xf32>
    %cst_88 = arith.constant 1.000000e+00 : f32
    %242 = vector.broadcast %cst_88 : f32 to vector<8x128xf32>
    %243 = arith.addf %242, %241 : vector<8x128xf32>
    %244 = arith.divf %242, %243 : vector<8x128xf32>
    %245 = vector.extract_strided_slice %232 {offsets = [0, 256], sizes = [8, 128], strides = [1, 1]} : vector<8x512xf32> to vector<8x128xf32>
    %246 = math.tanh %245 : vector<8x128xf32>
    %247 = vector.extract_strided_slice %232 {offsets = [0, 384], sizes = [8, 128], strides = [1, 1]} : vector<8x512xf32> to vector<8x128xf32>
    %248 = arith.negf %247 : vector<8x128xf32>
    %249 = math.exp %248 : vector<8x128xf32>
    %cst_89 = arith.constant 1.000000e+00 : f32
    %250 = vector.broadcast %cst_89 : f32 to vector<8x128xf32>
    %251 = arith.addf %250, %249 : vector<8x128xf32>
    %252 = arith.divf %250, %251 : vector<8x128xf32>
    %253 = arith.mulf %244, %224 : vector<8x128xf32>
    %254 = arith.mulf %238, %246 : vector<8x128xf32>
    %255 = arith.addf %253, %254 : vector<8x128xf32>
    %256 = math.tanh %255 : vector<8x128xf32>
    %257 = arith.mulf %252, %256 : vector<8x128xf32>
    %c56_90 = arith.constant 56 : index
    %c0_91 = arith.constant 0 : index
    %258 = vector.load %arg9[%c56_90, %c0_91] : memref<64x128xf32, #tpu.memory_space<vmem>>, vector<8x128xf32>
    tpu.vector_store %arg9[%c56_90, %c0_91], %257 {strides = array<i32>} : memref<64x128xf32, #tpu.memory_space<vmem>>, vector<8x128xf32>,
    %c0_92 = arith.constant 0 : index
    %c0_93 = arith.constant 0 : index
    %259 = vector.load %arg9[%c0_92, %c0_93] : memref<64x128xf32, #tpu.memory_space<vmem>>, vector<64x128xf32>
    %c1 = arith.constant 1 : index
    %c0_94 = arith.constant 0 : index
    %c0_95 = arith.constant 0 : index
    %260 = vector.load %arg2[%c1, %c0_94, %c0_95] : memref<2x128x512xf32, #tpu.memory_space<vmem>>, vector<1x128x512xf32>
    %261 = vector.shape_cast %260 : vector<1x128x512xf32> to vector<128x512xf32>
    %cst_96 = arith.constant dense<0.000000e+00> : vector<64x512xf32>
    %262 = tpu.matmul %259, %261, %cst_96 {dimension_numbers = #tpu.dot_dimension_numbers<[1], [0], [0], [1], [0, 0, 1, 1], [], []>} : vector<64x128xf32>, vector<128x512xf32>, vector<64x512xf32> -> vector<64x512xf32>
    %c1_97 = arith.constant 1 : index
    %c0_98 = arith.constant 0 : index
    %c0_99 = arith.constant 0 : index
    %263 = vector.load %arg4[%c1_97, %c0_98, %c0_99] : memref<2x1x512xf32, #tpu.memory_space<vmem>>, vector<1x1x512xf32>
    %264 = vector.shape_cast %263 : vector<1x1x512xf32> to vector<1x512xf32>
    %265 = vector.broadcast %264 : vector<1x512xf32> to vector<64x512xf32>
    %266 = arith.addf %262, %265 : vector<64x512xf32>
    %c0_100 = arith.constant 0 : index
    %c0_101 = arith.constant 0 : index
    %267 = vector.load %arg8[%c0_100, %c0_101] : memref<64x512xf32, #tpu.memory_space<vmem>>, vector<64x512xf32>
    tpu.vector_store %arg8[%c0_100, %c0_101], %266 {strides = array<i32>} : memref<64x512xf32, #tpu.memory_space<vmem>>, vector<64x512xf32>,
    %cst_102 = arith.constant 0.000000e+00 : f32
    %268 = vector.broadcast %cst_102 : f32 to vector<8x128xf32>
    %cst_103 = arith.constant 0.000000e+00 : f32
    %269 = vector.broadcast %cst_103 : f32 to vector<8x128xf32>
    %c0_104 = arith.constant 0 : index
    %c0_105 = arith.constant 0 : index
    %270 = vector.load %arg8[%c0_104, %c0_105] : memref<64x512xf32, #tpu.memory_space<vmem>>, vector<8x512xf32>
    %c1_106 = arith.constant 1 : index
    %c0_107 = arith.constant 0 : index
    %c0_108 = arith.constant 0 : index
    %271 = vector.load %arg3[%c1_106, %c0_107, %c0_108] : memref<2x128x512xf32, #tpu.memory_space<vmem>>, vector<1x128x512xf32>
    %272 = vector.shape_cast %271 : vector<1x128x512xf32> to vector<128x512xf32>
    %cst_109 = arith.constant dense<0.000000e+00> : vector<8x512xf32>
    %273 = tpu.matmul %268, %272, %cst_109 {dimension_numbers = #tpu.dot_dimension_numbers<[1], [0], [0], [1], [0, 0, 1, 1], [], []>} : vector<8x128xf32>, vector<128x512xf32>, vector<8x512xf32> -> vector<8x512xf32>
    %274 = arith.addf %270, %273 : vector<8x512xf32>
    %275 = vector.extract_strided_slice %274 {offsets = [0, 0], sizes = [8, 128], strides = [1, 1]} : vector<8x512xf32> to vector<8x128xf32>
    %276 = arith.negf %275 : vector<8x128xf32>
    %277 = math.exp %276 : vector<8x128xf32>
    %cst_110 = arith.constant 1.000000e+00 : f32
    %278 = vector.broadcast %cst_110 : f32 to vector<8x128xf32>
    %279 = arith.addf %278, %277 : vector<8x128xf32>
    %280 = arith.divf %278, %279 : vector<8x128xf32>
    %281 = vector.extract_strided_slice %274 {offsets = [0, 128], sizes = [8, 128], strides = [1, 1]} : vector<8x512xf32> to vector<8x128xf32>
    %282 = arith.negf %281 : vector<8x128xf32>
    %283 = math.exp %282 : vector<8x128xf32>
    %cst_111 = arith.constant 1.000000e+00 : f32
    %284 = vector.broadcast %cst_111 : f32 to vector<8x128xf32>
    %285 = arith.addf %284, %283 : vector<8x128xf32>
    %286 = arith.divf %284, %285 : vector<8x128xf32>
    %287 = vector.extract_strided_slice %274 {offsets = [0, 256], sizes = [8, 128], strides = [1, 1]} : vector<8x512xf32> to vector<8x128xf32>
    %288 = math.tanh %287 : vector<8x128xf32>
    %289 = vector.extract_strided_slice %274 {offsets = [0, 384], sizes = [8, 128], strides = [1, 1]} : vector<8x512xf32> to vector<8x128xf32>
    %290 = arith.negf %289 : vector<8x128xf32>
    %291 = math.exp %290 : vector<8x128xf32>
    %cst_112 = arith.constant 1.000000e+00 : f32
    %292 = vector.broadcast %cst_112 : f32 to vector<8x128xf32>
    %293 = arith.addf %292, %291 : vector<8x128xf32>
    %294 = arith.divf %292, %293 : vector<8x128xf32>
    %295 = arith.mulf %286, %269 : vector<8x128xf32>
    %296 = arith.mulf %280, %288 : vector<8x128xf32>
    %297 = arith.addf %295, %296 : vector<8x128xf32>
    %298 = math.tanh %297 : vector<8x128xf32>
    %299 = arith.mulf %294, %298 : vector<8x128xf32>
    %c0_113 = arith.constant 0 : index
    %c0_114 = arith.constant 0 : index
    %300 = vector.load %arg9[%c0_113, %c0_114] : memref<64x128xf32, #tpu.memory_space<vmem>>, vector<8x128xf32>
    tpu.vector_store %arg9[%c0_113, %c0_114], %299 {strides = array<i32>} : memref<64x128xf32, #tpu.memory_space<vmem>>, vector<8x128xf32>,
    %c8_115 = arith.constant 8 : index
    %c0_116 = arith.constant 0 : index
    %301 = vector.load %arg8[%c8_115, %c0_116] : memref<64x512xf32, #tpu.memory_space<vmem>>, vector<8x512xf32>
    %c1_117 = arith.constant 1 : index
    %c0_118 = arith.constant 0 : index
    %c0_119 = arith.constant 0 : index
    %302 = vector.load %arg3[%c1_117, %c0_118, %c0_119] : memref<2x128x512xf32, #tpu.memory_space<vmem>>, vector<1x128x512xf32>
    %303 = vector.shape_cast %302 : vector<1x128x512xf32> to vector<128x512xf32>
    %cst_120 = arith.constant dense<0.000000e+00> : vector<8x512xf32>
    %304 = tpu.matmul %299, %303, %cst_120 {dimension_numbers = #tpu.dot_dimension_numbers<[1], [0], [0], [1], [0, 0, 1, 1], [], []>} : vector<8x128xf32>, vector<128x512xf32>, vector<8x512xf32> -> vector<8x512xf32>
    %305 = arith.addf %301, %304 : vector<8x512xf32>
    %306 = vector.extract_strided_slice %305 {offsets = [0, 0], sizes = [8, 128], strides = [1, 1]} : vector<8x512xf32> to vector<8x128xf32>
    %307 = arith.negf %306 : vector<8x128xf32>
    %308 = math.exp %307 : vector<8x128xf32>
    %cst_121 = arith.constant 1.000000e+00 : f32
    %309 = vector.broadcast %cst_121 : f32 to vector<8x128xf32>
    %310 = arith.addf %309, %308 : vector<8x128xf32>
    %311 = arith.divf %309, %310 : vector<8x128xf32>
    %312 = vector.extract_strided_slice %305 {offsets = [0, 128], sizes = [8, 128], strides = [1, 1]} : vector<8x512xf32> to vector<8x128xf32>
    %313 = arith.negf %312 : vector<8x128xf32>
    %314 = math.exp %313 : vector<8x128xf32>
    %cst_122 = arith.constant 1.000000e+00 : f32
    %315 = vector.broadcast %cst_122 : f32 to vector<8x128xf32>
    %316 = arith.addf %315, %314 : vector<8x128xf32>
    %317 = arith.divf %315, %316 : vector<8x128xf32>
    %318 = vector.extract_strided_slice %305 {offsets = [0, 256], sizes = [8, 128], strides = [1, 1]} : vector<8x512xf32> to vector<8x128xf32>
    %319 = math.tanh %318 : vector<8x128xf32>
    %320 = vector.extract_strided_slice %305 {offsets = [0, 384], sizes = [8, 128], strides = [1, 1]} : vector<8x512xf32> to vector<8x128xf32>
    %321 = arith.negf %320 : vector<8x128xf32>
    %322 = math.exp %321 : vector<8x128xf32>
    %cst_123 = arith.constant 1.000000e+00 : f32
    %323 = vector.broadcast %cst_123 : f32 to vector<8x128xf32>
    %324 = arith.addf %323, %322 : vector<8x128xf32>
    %325 = arith.divf %323, %324 : vector<8x128xf32>
    %326 = arith.mulf %317, %297 : vector<8x128xf32>
    %327 = arith.mulf %311, %319 : vector<8x128xf32>
    %328 = arith.addf %326, %327 : vector<8x128xf32>
    %329 = math.tanh %328 : vector<8x128xf32>
    %330 = arith.mulf %325, %329 : vector<8x128xf32>
    %c8_124 = arith.constant 8 : index
    %c0_125 = arith.constant 0 : index
    %331 = vector.load %arg9[%c8_124, %c0_125] : memref<64x128xf32, #tpu.memory_space<vmem>>, vector<8x128xf32>
    tpu.vector_store %arg9[%c8_124, %c0_125], %330 {strides = array<i32>} : memref<64x128xf32, #tpu.memory_space<vmem>>, vector<8x128xf32>,
    %c16_126 = arith.constant 16 : index
    %c0_127 = arith.constant 0 : index
    %332 = vector.load %arg8[%c16_126, %c0_127] : memref<64x512xf32, #tpu.memory_space<vmem>>, vector<8x512xf32>
    %c1_128 = arith.constant 1 : index
    %c0_129 = arith.constant 0 : index
    %c0_130 = arith.constant 0 : index
    %333 = vector.load %arg3[%c1_128, %c0_129, %c0_130] : memref<2x128x512xf32, #tpu.memory_space<vmem>>, vector<1x128x512xf32>
    %334 = vector.shape_cast %333 : vector<1x128x512xf32> to vector<128x512xf32>
    %cst_131 = arith.constant dense<0.000000e+00> : vector<8x512xf32>
    %335 = tpu.matmul %330, %334, %cst_131 {dimension_numbers = #tpu.dot_dimension_numbers<[1], [0], [0], [1], [0, 0, 1, 1], [], []>} : vector<8x128xf32>, vector<128x512xf32>, vector<8x512xf32> -> vector<8x512xf32>
    %336 = arith.addf %332, %335 : vector<8x512xf32>
    %337 = vector.extract_strided_slice %336 {offsets = [0, 0], sizes = [8, 128], strides = [1, 1]} : vector<8x512xf32> to vector<8x128xf32>
    %338 = arith.negf %337 : vector<8x128xf32>
    %339 = math.exp %338 : vector<8x128xf32>
    %cst_132 = arith.constant 1.000000e+00 : f32
    %340 = vector.broadcast %cst_132 : f32 to vector<8x128xf32>
    %341 = arith.addf %340, %339 : vector<8x128xf32>
    %342 = arith.divf %340, %341 : vector<8x128xf32>
    %343 = vector.extract_strided_slice %336 {offsets = [0, 128], sizes = [8, 128], strides = [1, 1]} : vector<8x512xf32> to vector<8x128xf32>
    %344 = arith.negf %343 : vector<8x128xf32>
    %345 = math.exp %344 : vector<8x128xf32>
    %cst_133 = arith.constant 1.000000e+00 : f32
    %346 = vector.broadcast %cst_133 : f32 to vector<8x128xf32>
    %347 = arith.addf %346, %345 : vector<8x128xf32>
    %348 = arith.divf %346, %347 : vector<8x128xf32>
    %349 = vector.extract_strided_slice %336 {offsets = [0, 256], sizes = [8, 128], strides = [1, 1]} : vector<8x512xf32> to vector<8x128xf32>
    %350 = math.tanh %349 : vector<8x128xf32>
    %351 = vector.extract_strided_slice %336 {offsets = [0, 384], sizes = [8, 128], strides = [1, 1]} : vector<8x512xf32> to vector<8x128xf32>
    %352 = arith.negf %351 : vector<8x128xf32>
    %353 = math.exp %352 : vector<8x128xf32>
    %cst_134 = arith.constant 1.000000e+00 : f32
    %354 = vector.broadcast %cst_134 : f32 to vector<8x128xf32>
    %355 = arith.addf %354, %353 : vector<8x128xf32>
    %356 = arith.divf %354, %355 : vector<8x128xf32>
    %357 = arith.mulf %348, %328 : vector<8x128xf32>
    %358 = arith.mulf %342, %350 : vector<8x128xf32>
    %359 = arith.addf %357, %358 : vector<8x128xf32>
    %360 = math.tanh %359 : vector<8x128xf32>
    %361 = arith.mulf %356, %360 : vector<8x128xf32>
    %c16_135 = arith.constant 16 : index
    %c0_136 = arith.constant 0 : index
    %362 = vector.load %arg9[%c16_135, %c0_136] : memref<64x128xf32, #tpu.memory_space<vmem>>, vector<8x128xf32>
    tpu.vector_store %arg9[%c16_135, %c0_136], %361 {strides = array<i32>} : memref<64x128xf32, #tpu.memory_space<vmem>>, vector<8x128xf32>,
    %c24_137 = arith.constant 24 : index
    %c0_138 = arith.constant 0 : index
    %363 = vector.load %arg8[%c24_137, %c0_138] : memref<64x512xf32, #tpu.memory_space<vmem>>, vector<8x512xf32>
    %c1_139 = arith.constant 1 : index
    %c0_140 = arith.constant 0 : index
    %c0_141 = arith.constant 0 : index
    %364 = vector.load %arg3[%c1_139, %c0_140, %c0_141] : memref<2x128x512xf32, #tpu.memory_space<vmem>>, vector<1x128x512xf32>
    %365 = vector.shape_cast %364 : vector<1x128x512xf32> to vector<128x512xf32>
    %cst_142 = arith.constant dense<0.000000e+00> : vector<8x512xf32>
    %366 = tpu.matmul %361, %365, %cst_142 {dimension_numbers = #tpu.dot_dimension_numbers<[1], [0], [0], [1], [0, 0, 1, 1], [], []>} : vector<8x128xf32>, vector<128x512xf32>, vector<8x512xf32> -> vector<8x512xf32>
    %367 = arith.addf %363, %366 : vector<8x512xf32>
    %368 = vector.extract_strided_slice %367 {offsets = [0, 0], sizes = [8, 128], strides = [1, 1]} : vector<8x512xf32> to vector<8x128xf32>
    %369 = arith.negf %368 : vector<8x128xf32>
    %370 = math.exp %369 : vector<8x128xf32>
    %cst_143 = arith.constant 1.000000e+00 : f32
    %371 = vector.broadcast %cst_143 : f32 to vector<8x128xf32>
    %372 = arith.addf %371, %370 : vector<8x128xf32>
    %373 = arith.divf %371, %372 : vector<8x128xf32>
    %374 = vector.extract_strided_slice %367 {offsets = [0, 128], sizes = [8, 128], strides = [1, 1]} : vector<8x512xf32> to vector<8x128xf32>
    %375 = arith.negf %374 : vector<8x128xf32>
    %376 = math.exp %375 : vector<8x128xf32>
    %cst_144 = arith.constant 1.000000e+00 : f32
    %377 = vector.broadcast %cst_144 : f32 to vector<8x128xf32>
    %378 = arith.addf %377, %376 : vector<8x128xf32>
    %379 = arith.divf %377, %378 : vector<8x128xf32>
    %380 = vector.extract_strided_slice %367 {offsets = [0, 256], sizes = [8, 128], strides = [1, 1]} : vector<8x512xf32> to vector<8x128xf32>
    %381 = math.tanh %380 : vector<8x128xf32>
    %382 = vector.extract_strided_slice %367 {offsets = [0, 384], sizes = [8, 128], strides = [1, 1]} : vector<8x512xf32> to vector<8x128xf32>
    %383 = arith.negf %382 : vector<8x128xf32>
    %384 = math.exp %383 : vector<8x128xf32>
    %cst_145 = arith.constant 1.000000e+00 : f32
    %385 = vector.broadcast %cst_145 : f32 to vector<8x128xf32>
    %386 = arith.addf %385, %384 : vector<8x128xf32>
    %387 = arith.divf %385, %386 : vector<8x128xf32>
    %388 = arith.mulf %379, %359 : vector<8x128xf32>
    %389 = arith.mulf %373, %381 : vector<8x128xf32>
    %390 = arith.addf %388, %389 : vector<8x128xf32>
    %391 = math.tanh %390 : vector<8x128xf32>
    %392 = arith.mulf %387, %391 : vector<8x128xf32>
    %c24_146 = arith.constant 24 : index
    %c0_147 = arith.constant 0 : index
    %393 = vector.load %arg9[%c24_146, %c0_147] : memref<64x128xf32, #tpu.memory_space<vmem>>, vector<8x128xf32>
    tpu.vector_store %arg9[%c24_146, %c0_147], %392 {strides = array<i32>} : memref<64x128xf32, #tpu.memory_space<vmem>>, vector<8x128xf32>,
    %c32_148 = arith.constant 32 : index
    %c0_149 = arith.constant 0 : index
    %394 = vector.load %arg8[%c32_148, %c0_149] : memref<64x512xf32, #tpu.memory_space<vmem>>, vector<8x512xf32>
    %c1_150 = arith.constant 1 : index
    %c0_151 = arith.constant 0 : index
    %c0_152 = arith.constant 0 : index
    %395 = vector.load %arg3[%c1_150, %c0_151, %c0_152] : memref<2x128x512xf32, #tpu.memory_space<vmem>>, vector<1x128x512xf32>
    %396 = vector.shape_cast %395 : vector<1x128x512xf32> to vector<128x512xf32>
    %cst_153 = arith.constant dense<0.000000e+00> : vector<8x512xf32>
    %397 = tpu.matmul %392, %396, %cst_153 {dimension_numbers = #tpu.dot_dimension_numbers<[1], [0], [0], [1], [0, 0, 1, 1], [], []>} : vector<8x128xf32>, vector<128x512xf32>, vector<8x512xf32> -> vector<8x512xf32>
    %398 = arith.addf %394, %397 : vector<8x512xf32>
    %399 = vector.extract_strided_slice %398 {offsets = [0, 0], sizes = [8, 128], strides = [1, 1]} : vector<8x512xf32> to vector<8x128xf32>
    %400 = arith.negf %399 : vector<8x128xf32>
    %401 = math.exp %400 : vector<8x128xf32>
    %cst_154 = arith.constant 1.000000e+00 : f32
    %402 = vector.broadcast %cst_154 : f32 to vector<8x128xf32>
    %403 = arith.addf %402, %401 : vector<8x128xf32>
    %404 = arith.divf %402, %403 : vector<8x128xf32>
    %405 = vector.extract_strided_slice %398 {offsets = [0, 128], sizes = [8, 128], strides = [1, 1]} : vector<8x512xf32> to vector<8x128xf32>
    %406 = arith.negf %405 : vector<8x128xf32>
    %407 = math.exp %406 : vector<8x128xf32>
    %cst_155 = arith.constant 1.000000e+00 : f32
    %408 = vector.broadcast %cst_155 : f32 to vector<8x128xf32>
    %409 = arith.addf %408, %407 : vector<8x128xf32>
    %410 = arith.divf %408, %409 : vector<8x128xf32>
    %411 = vector.extract_strided_slice %398 {offsets = [0, 256], sizes = [8, 128], strides = [1, 1]} : vector<8x512xf32> to vector<8x128xf32>
    %412 = math.tanh %411 : vector<8x128xf32>
    %413 = vector.extract_strided_slice %398 {offsets = [0, 384], sizes = [8, 128], strides = [1, 1]} : vector<8x512xf32> to vector<8x128xf32>
    %414 = arith.negf %413 : vector<8x128xf32>
    %415 = math.exp %414 : vector<8x128xf32>
    %cst_156 = arith.constant 1.000000e+00 : f32
    %416 = vector.broadcast %cst_156 : f32 to vector<8x128xf32>
    %417 = arith.addf %416, %415 : vector<8x128xf32>
    %418 = arith.divf %416, %417 : vector<8x128xf32>
    %419 = arith.mulf %410, %390 : vector<8x128xf32>
    %420 = arith.mulf %404, %412 : vector<8x128xf32>
    %421 = arith.addf %419, %420 : vector<8x128xf32>
    %422 = math.tanh %421 : vector<8x128xf32>
    %423 = arith.mulf %418, %422 : vector<8x128xf32>
    %c32_157 = arith.constant 32 : index
    %c0_158 = arith.constant 0 : index
    %424 = vector.load %arg9[%c32_157, %c0_158] : memref<64x128xf32, #tpu.memory_space<vmem>>, vector<8x128xf32>
    tpu.vector_store %arg9[%c32_157, %c0_158], %423 {strides = array<i32>} : memref<64x128xf32, #tpu.memory_space<vmem>>, vector<8x128xf32>,
    %c40_159 = arith.constant 40 : index
    %c0_160 = arith.constant 0 : index
    %425 = vector.load %arg8[%c40_159, %c0_160] : memref<64x512xf32, #tpu.memory_space<vmem>>, vector<8x512xf32>
    %c1_161 = arith.constant 1 : index
    %c0_162 = arith.constant 0 : index
    %c0_163 = arith.constant 0 : index
    %426 = vector.load %arg3[%c1_161, %c0_162, %c0_163] : memref<2x128x512xf32, #tpu.memory_space<vmem>>, vector<1x128x512xf32>
    %427 = vector.shape_cast %426 : vector<1x128x512xf32> to vector<128x512xf32>
    %cst_164 = arith.constant dense<0.000000e+00> : vector<8x512xf32>
    %428 = tpu.matmul %423, %427, %cst_164 {dimension_numbers = #tpu.dot_dimension_numbers<[1], [0], [0], [1], [0, 0, 1, 1], [], []>} : vector<8x128xf32>, vector<128x512xf32>, vector<8x512xf32> -> vector<8x512xf32>
    %429 = arith.addf %425, %428 : vector<8x512xf32>
    %430 = vector.extract_strided_slice %429 {offsets = [0, 0], sizes = [8, 128], strides = [1, 1]} : vector<8x512xf32> to vector<8x128xf32>
    %431 = arith.negf %430 : vector<8x128xf32>
    %432 = math.exp %431 : vector<8x128xf32>
    %cst_165 = arith.constant 1.000000e+00 : f32
    %433 = vector.broadcast %cst_165 : f32 to vector<8x128xf32>
    %434 = arith.addf %433, %432 : vector<8x128xf32>
    %435 = arith.divf %433, %434 : vector<8x128xf32>
    %436 = vector.extract_strided_slice %429 {offsets = [0, 128], sizes = [8, 128], strides = [1, 1]} : vector<8x512xf32> to vector<8x128xf32>
    %437 = arith.negf %436 : vector<8x128xf32>
    %438 = math.exp %437 : vector<8x128xf32>
    %cst_166 = arith.constant 1.000000e+00 : f32
    %439 = vector.broadcast %cst_166 : f32 to vector<8x128xf32>
    %440 = arith.addf %439, %438 : vector<8x128xf32>
    %441 = arith.divf %439, %440 : vector<8x128xf32>
    %442 = vector.extract_strided_slice %429 {offsets = [0, 256], sizes = [8, 128], strides = [1, 1]} : vector<8x512xf32> to vector<8x128xf32>
    %443 = math.tanh %442 : vector<8x128xf32>
    %444 = vector.extract_strided_slice %429 {offsets = [0, 384], sizes = [8, 128], strides = [1, 1]} : vector<8x512xf32> to vector<8x128xf32>
    %445 = arith.negf %444 : vector<8x128xf32>
    %446 = math.exp %445 : vector<8x128xf32>
    %cst_167 = arith.constant 1.000000e+00 : f32
    %447 = vector.broadcast %cst_167 : f32 to vector<8x128xf32>
    %448 = arith.addf %447, %446 : vector<8x128xf32>
    %449 = arith.divf %447, %448 : vector<8x128xf32>
    %450 = arith.mulf %441, %421 : vector<8x128xf32>
    %451 = arith.mulf %435, %443 : vector<8x128xf32>
    %452 = arith.addf %450, %451 : vector<8x128xf32>
    %453 = math.tanh %452 : vector<8x128xf32>
    %454 = arith.mulf %449, %453 : vector<8x128xf32>
    %c40_168 = arith.constant 40 : index
    %c0_169 = arith.constant 0 : index
    %455 = vector.load %arg9[%c40_168, %c0_169] : memref<64x128xf32, #tpu.memory_space<vmem>>, vector<8x128xf32>
    tpu.vector_store %arg9[%c40_168, %c0_169], %454 {strides = array<i32>} : memref<64x128xf32, #tpu.memory_space<vmem>>, vector<8x128xf32>,
    %c48_170 = arith.constant 48 : index
    %c0_171 = arith.constant 0 : index
    %456 = vector.load %arg8[%c48_170, %c0_171] : memref<64x512xf32, #tpu.memory_space<vmem>>, vector<8x512xf32>
    %c1_172 = arith.constant 1 : index
    %c0_173 = arith.constant 0 : index
    %c0_174 = arith.constant 0 : index
    %457 = vector.load %arg3[%c1_172, %c0_173, %c0_174] : memref<2x128x512xf32, #tpu.memory_space<vmem>>, vector<1x128x512xf32>
    %458 = vector.shape_cast %457 : vector<1x128x512xf32> to vector<128x512xf32>
    %cst_175 = arith.constant dense<0.000000e+00> : vector<8x512xf32>
    %459 = tpu.matmul %454, %458, %cst_175 {dimension_numbers = #tpu.dot_dimension_numbers<[1], [0], [0], [1], [0, 0, 1, 1], [], []>} : vector<8x128xf32>, vector<128x512xf32>, vector<8x512xf32> -> vector<8x512xf32>
    %460 = arith.addf %456, %459 : vector<8x512xf32>
    %461 = vector.extract_strided_slice %460 {offsets = [0, 0], sizes = [8, 128], strides = [1, 1]} : vector<8x512xf32> to vector<8x128xf32>
    %462 = arith.negf %461 : vector<8x128xf32>
    %463 = math.exp %462 : vector<8x128xf32>
    %cst_176 = arith.constant 1.000000e+00 : f32
    %464 = vector.broadcast %cst_176 : f32 to vector<8x128xf32>
    %465 = arith.addf %464, %463 : vector<8x128xf32>
    %466 = arith.divf %464, %465 : vector<8x128xf32>
    %467 = vector.extract_strided_slice %460 {offsets = [0, 128], sizes = [8, 128], strides = [1, 1]} : vector<8x512xf32> to vector<8x128xf32>
    %468 = arith.negf %467 : vector<8x128xf32>
    %469 = math.exp %468 : vector<8x128xf32>
    %cst_177 = arith.constant 1.000000e+00 : f32
    %470 = vector.broadcast %cst_177 : f32 to vector<8x128xf32>
    %471 = arith.addf %470, %469 : vector<8x128xf32>
    %472 = arith.divf %470, %471 : vector<8x128xf32>
    %473 = vector.extract_strided_slice %460 {offsets = [0, 256], sizes = [8, 128], strides = [1, 1]} : vector<8x512xf32> to vector<8x128xf32>
    %474 = math.tanh %473 : vector<8x128xf32>
    %475 = vector.extract_strided_slice %460 {offsets = [0, 384], sizes = [8, 128], strides = [1, 1]} : vector<8x512xf32> to vector<8x128xf32>
    %476 = arith.negf %475 : vector<8x128xf32>
    %477 = math.exp %476 : vector<8x128xf32>
    %cst_178 = arith.constant 1.000000e+00 : f32
    %478 = vector.broadcast %cst_178 : f32 to vector<8x128xf32>
    %479 = arith.addf %478, %477 : vector<8x128xf32>
    %480 = arith.divf %478, %479 : vector<8x128xf32>
    %481 = arith.mulf %472, %452 : vector<8x128xf32>
    %482 = arith.mulf %466, %474 : vector<8x128xf32>
    %483 = arith.addf %481, %482 : vector<8x128xf32>
    %484 = math.tanh %483 : vector<8x128xf32>
    %485 = arith.mulf %480, %484 : vector<8x128xf32>
    %c48_179 = arith.constant 48 : index
    %c0_180 = arith.constant 0 : index
    %486 = vector.load %arg9[%c48_179, %c0_180] : memref<64x128xf32, #tpu.memory_space<vmem>>, vector<8x128xf32>
    tpu.vector_store %arg9[%c48_179, %c0_180], %485 {strides = array<i32>} : memref<64x128xf32, #tpu.memory_space<vmem>>, vector<8x128xf32>,
    %c56_181 = arith.constant 56 : index
    %c0_182 = arith.constant 0 : index
    %487 = vector.load %arg8[%c56_181, %c0_182] : memref<64x512xf32, #tpu.memory_space<vmem>>, vector<8x512xf32>
    %c1_183 = arith.constant 1 : index
    %c0_184 = arith.constant 0 : index
    %c0_185 = arith.constant 0 : index
    %488 = vector.load %arg3[%c1_183, %c0_184, %c0_185] : memref<2x128x512xf32, #tpu.memory_space<vmem>>, vector<1x128x512xf32>
    %489 = vector.shape_cast %488 : vector<1x128x512xf32> to vector<128x512xf32>
    %cst_186 = arith.constant dense<0.000000e+00> : vector<8x512xf32>
    %490 = tpu.matmul %485, %489, %cst_186 {dimension_numbers = #tpu.dot_dimension_numbers<[1], [0], [0], [1], [0, 0, 1, 1], [], []>} : vector<8x128xf32>, vector<128x512xf32>, vector<8x512xf32> -> vector<8x512xf32>
    %491 = arith.addf %487, %490 : vector<8x512xf32>
    %492 = vector.extract_strided_slice %491 {offsets = [0, 0], sizes = [8, 128], strides = [1, 1]} : vector<8x512xf32> to vector<8x128xf32>
    %493 = arith.negf %492 : vector<8x128xf32>
    %494 = math.exp %493 : vector<8x128xf32>
    %cst_187 = arith.constant 1.000000e+00 : f32
    %495 = vector.broadcast %cst_187 : f32 to vector<8x128xf32>
    %496 = arith.addf %495, %494 : vector<8x128xf32>
    %497 = arith.divf %495, %496 : vector<8x128xf32>
    %498 = vector.extract_strided_slice %491 {offsets = [0, 128], sizes = [8, 128], strides = [1, 1]} : vector<8x512xf32> to vector<8x128xf32>
    %499 = arith.negf %498 : vector<8x128xf32>
    %500 = math.exp %499 : vector<8x128xf32>
    %cst_188 = arith.constant 1.000000e+00 : f32
    %501 = vector.broadcast %cst_188 : f32 to vector<8x128xf32>
    %502 = arith.addf %501, %500 : vector<8x128xf32>
    %503 = arith.divf %501, %502 : vector<8x128xf32>
    %504 = vector.extract_strided_slice %491 {offsets = [0, 256], sizes = [8, 128], strides = [1, 1]} : vector<8x512xf32> to vector<8x128xf32>
    %505 = math.tanh %504 : vector<8x128xf32>
    %506 = vector.extract_strided_slice %491 {offsets = [0, 384], sizes = [8, 128], strides = [1, 1]} : vector<8x512xf32> to vector<8x128xf32>
    %507 = arith.negf %506 : vector<8x128xf32>
    %508 = math.exp %507 : vector<8x128xf32>
    %cst_189 = arith.constant 1.000000e+00 : f32
    %509 = vector.broadcast %cst_189 : f32 to vector<8x128xf32>
    %510 = arith.addf %509, %508 : vector<8x128xf32>
    %511 = arith.divf %509, %510 : vector<8x128xf32>
    %512 = arith.mulf %503, %483 : vector<8x128xf32>
    %513 = arith.mulf %497, %505 : vector<8x128xf32>
    %514 = arith.addf %512, %513 : vector<8x128xf32>
    %515 = math.tanh %514 : vector<8x128xf32>
    %516 = arith.mulf %511, %515 : vector<8x128xf32>
    %c56_190 = arith.constant 56 : index
    %c0_191 = arith.constant 0 : index
    %517 = vector.load %arg9[%c56_190, %c0_191] : memref<64x128xf32, #tpu.memory_space<vmem>>, vector<8x128xf32>
    tpu.vector_store %arg9[%c56_190, %c0_191], %516 {strides = array<i32>} : memref<64x128xf32, #tpu.memory_space<vmem>>, vector<8x128xf32>,
    %c0_192 = arith.constant 0 : index
    %c0_193 = arith.constant 0 : index
    %518 = vector.load %arg9[%c0_192, %c0_193] : memref<64x128xf32, #tpu.memory_space<vmem>>, vector<64x128xf32>
    %c0_194 = arith.constant 0 : index
    %c0_195 = arith.constant 0 : index
    %519 = vector.load %arg5[%c0_194, %c0_195] : memref<128x128xf32, #tpu.memory_space<vmem>>, vector<128x128xf32>
    %cst_196 = arith.constant dense<0.000000e+00> : vector<64x128xf32>
    %520 = tpu.matmul %518, %519, %cst_196 {dimension_numbers = #tpu.dot_dimension_numbers<[1], [0], [0], [1], [0, 0, 1, 1], [], []>} : vector<64x128xf32>, vector<128x128xf32>, vector<64x128xf32> -> vector<64x128xf32>
    %c0_197 = arith.constant 0 : index
    %c0_198 = arith.constant 0 : index
    %521 = vector.load %arg6[%c0_197, %c0_198] : memref<1x128xf32, #tpu.memory_space<vmem>>, vector<1x128xf32>
    %522 = vector.broadcast %521 : vector<1x128xf32> to vector<64x128xf32>
    %523 = arith.addf %520, %522 : vector<64x128xf32>
    %cst_199 = arith.constant dense<0xFF800000> : vector<64xf32>
    %524 = vector.multi_reduction <maximumf>, %523, %cst_199 [1] : vector<64x128xf32> to vector<64xf32>
    %525 = vector.shape_cast %524 : vector<64xf32> to vector<64x1xf32>
    %526 = vector.broadcast %525 : vector<64x1xf32> to vector<64x128xf32>
    %527 = arith.subf %523, %526 : vector<64x128xf32>
    %528 = math.exp %527 : vector<64x128xf32>
    %cst_200 = arith.constant dense<0.000000e+00> : vector<64xf32>
    %529 = vector.multi_reduction <add>, %528, %cst_200 [1] : vector<64x128xf32> to vector<64xf32>
    %530 = vector.shape_cast %529 : vector<64xf32> to vector<64x1xf32>
    %531 = math.log %530 : vector<64x1xf32>
    %532 = vector.broadcast %531 : vector<64x1xf32> to vector<64x128xf32>
    %533 = arith.subf %527, %532 : vector<64x128xf32>
    %c0_201 = arith.constant 0 : index
    %c0_202 = arith.constant 0 : index
    %534 = vector.load %arg7[%c0_201, %c0_202] : memref<64x128xf32, #tpu.memory_space<vmem>>, vector<64x128xf32>
    tpu.vector_store %arg7[%c0_201, %c0_202], %533 {strides = array<i32>} : memref<64x128xf32, #tpu.memory_space<vmem>>, vector<64x128xf32>,
    return
  }
  func.func @transform_0(%arg0: i32) -> (i32, i32) {
    %c0_i32 = arith.constant 0 : i32
    %c0_i32_0 = arith.constant 0 : i32
    %c0_i32_1 = arith.constant 0 : i32
    return %c0_i32, %c0_i32_0 : i32, i32
  }
  func.func @transform_1(%arg0: i32) -> (i32, i32, i32) {
    %c0_i32 = arith.constant 0 : i32
    %c0_i32_0 = arith.constant 0 : i32
    %c0_i32_1 = arith.constant 0 : i32
    %c0_i32_2 = arith.constant 0 : i32
    return %c0_i32, %c0_i32_0, %c0_i32_1 : i32, i32, i32
  }
  func.func @transform_2(%arg0: i32) -> (i32, i32, i32) {
    %c0_i32 = arith.constant 0 : i32
    %c0_i32_0 = arith.constant 0 : i32
    %c0_i32_1 = arith.constant 0 : i32
    %c0_i32_2 = arith.constant 0 : i32
    return %c0_i32, %c0_i32_0, %c0_i32_1 : i32, i32, i32
  }
  func.func @transform_3(%arg0: i32) -> (i32, i32, i32) {
    %c0_i32 = arith.constant 0 : i32
    %c0_i32_0 = arith.constant 0 : i32
    %c0_i32_1 = arith.constant 0 : i32
    %c0_i32_2 = arith.constant 0 : i32
    return %c0_i32, %c0_i32_0, %c0_i32_1 : i32, i32, i32
  }
  func.func @transform_4(%arg0: i32) -> (i32, i32) {
    %c0_i32 = arith.constant 0 : i32
    %c0_i32_0 = arith.constant 0 : i32
    %c0_i32_1 = arith.constant 0 : i32
    return %c0_i32, %c0_i32_0 : i32, i32
  }
  func.func @transform_5(%arg0: i32) -> (i32, i32) {
    %c0_i32 = arith.constant 0 : i32
    %c0_i32_0 = arith.constant 0 : i32
    %c0_i32_1 = arith.constant 0 : i32
    return %c0_i32, %c0_i32_0 : i32, i32
  }
  func.func @transform_6(%arg0: i32) -> (i32, i32) {
    %c0_i32 = arith.constant 0 : i32
    %c0_i32_0 = arith.constant 0 : i32
    %c0_i32_1 = arith.constant 0 : i32
    return %c0_i32, %c0_i32_0 : i32, i32
  }
}

</mosaic_0001>

<bundles_post_ra>
// kernel: language_model_forward.1
= control target key start
LH: loop header
LB: loop body
LE: loop exit
PB: predicated region body
PF: predicated region fallthrough
CT: control target
= control target key end

     0   :  { %11 = vsyncpa [#allocation5], 0  ;;  %s7923_s0 = inlined_call_operand.vmem [shape: f32[64,128], index: 0, kind: input, shape index: {}]   ;;  %s7924_s1 = inlined_call_operand.hbm [shape: f32[2,128,512], index: 1, kind: input, shape index: {}]   ;;  %s7925_s2 = inlined_call_operand.hbm [shape: f32[2,128,512], index: 2, kind: input, shape index: {}]   ;;  %s7926_s3 = inlined_call_operand.vmem [shape: f32[2,1,512], index: 3, kind: input, shape index: {}]   ;;  %s7927_s4 = inlined_call_operand.vmem [shape: f32[128,128], index: 4, kind: input, shape index: {}]   ;;  %s7928_s5 = inlined_call_operand.vmem [shape: f32[1,128], index: 5, kind: input, shape index: {}]   ;;  %s7929_s6 = inlined_call_operand.vmem [shape: f32[64,128], index: 6, kind: output, shape index: {}]  }
   0x1   :  { %12 = vsyncpa [#allocation7], 0  ;;  %s6583_s21 = smov [#allocation4]   ;;  %s6535_s25 = scalar_lea.hbm %s7924_s1, 16384 }
   0x2   :  { %s20_s22 = sshll.u32 %s6583_s21, 4  ;;  %p6536_p0 = scmp.ne.s32.totalorder %s7924_s1, %s6535_s25  ;;  %s21_s22 = int_to_ptr.vmem [resolvable:$true] %s20_s22 }
   0x3   :  { %p6539_p1 = scmp.lt.u32.totalorder %s6535_s25, %s7924_s1 }
   0x5   :  { %p6541_p2 = pnand %p6539_p1, %p6536_p0 }
   0x7   :  { %6544 = shalt.err (!%p6541_p2)
}
   0x8   :  { %s6545_s30 = scalar_lea.vmem %s21_s22, 16384  ;;  %p6550_p4 = scmp.lt.s32.totalorder %s21_s22, %s21_s22 }
   0x9   :  { %p6546_p3 = scmp.ne.s32.totalorder %s21_s22, %s6545_s30  ;;  %p6551_p5 = scmp.lt.s32.totalorder %s6545_s30, %s6545_s30 }
   0xb   :  { %p6552_p6 = por %p6551_p5, %p6550_p4 }
   0xd   :  { %p6553_p7 = pnand %p6552_p6, %p6546_p3 }
   0xf   :  { %6556 = shalt.err (!%p6553_p7)
}
  0x10   :  { %s6584_s7 = smov 512   ;;  %s6585_s8 = smov 32  }
  0x11   :  { %26 = dma.hbm_to_vmem [thread:$0]  %s7924_s1, 16384, %s21_s22, [#allocation5], %s6584_s7, %s6584_s7, %s6585_s8  }
  0x12   :  { %s6586_s11 = smov [#allocation6]   ;;  %s6557_s15 = scalar_lea.hbm %s7925_s2, 16384 }
  0x13   :  { %s32_s12 = sshll.u32 %s6586_s11, 4  ;;  %p6558_p8 = scmp.ne.s32.totalorder %s7925_s2, %s6557_s15  ;;  %s33_s12 = int_to_ptr.vmem [resolvable:$true] %s32_s12 }
  0x14   :  { %p6561_p9 = scmp.lt.u32.totalorder %s6557_s15, %s7925_s2 }
  0x16   :  { %p6563_p10 = pnand %p6561_p9, %p6558_p8 }
  0x18   :  { %6566 = shalt.err (!%p6563_p10)
}
  0x19   :  { %s6567_s20 = scalar_lea.vmem %s33_s12, 16384  ;;  %p6572_p12 = scmp.lt.s32.totalorder %s33_s12, %s33_s12 }
  0x1a   :  { %p6568_p11 = scmp.ne.s32.totalorder %s33_s12, %s6567_s20  ;;  %p6573_p13 = scmp.lt.s32.totalorder %s6567_s20, %s6567_s20 }
  0x1c   :  { %p6574_p0 = por %p6573_p13, %p6572_p12 }
  0x1e   :  { %p6575_p1 = pnand %p6574_p0, %p6568_p11 }
  0x20   :  { %6578 = shalt.err (!%p6575_p1)
}
  0x21   :  { %38 = dma.hbm_to_vmem [thread:$0]  %s7925_s2, 16384, %s33_s12, [#allocation7], %s6584_s7, %s6584_s7, %s6585_s8  }
  0x22   :  { %6579 = dma.done.wait [#allocation5], 16384  }
  0x23   :  { %6580 = vsyncadd [#allocation5], 4294950912 }
  0x24   :  { %6581 = dma.done.wait [#allocation7], 16384  }
  0x25   :  { %6582 = vsyncadd [#allocation7], 4294950912  ;;  %v7934_v0 = vmov 0.0   ;;  %v60_v1 = vld [vmem:[#allocation4 + $0x8] sm:$0xff]  ;;  %v59_v3 = vld [vmem:[#allocation4] sm:$0xff] }
  0x26   :  { %209 = vmatprep.mubr.f32.mxu1 %v7934_v0  ;;  %535 = vmatprep.mubr.f32.mxu0 %v7934_v0  ;;  %v64_v2 = vld [vmem:[#allocation4 + $0x28] sm:$0xff]  ;;  %v63_v5 = vld [vmem:[#allocation4 + $0x20] sm:$0xff] }
  0x27   :  { %v4930_v4 = vpack.c.bf16 %v64_v2, %v60_v1  ;;  %v408_v6 = vld [vmem:[#allocation6 + $0x8] sm:$0xff]  ;;  %v4932_v8 = vpack.c.bf16 %v63_v5, %v59_v3  ;;  %v407_v10 = vld [vmem:[#allocation6] sm:$0xff] }
  0x28   :  { %v412_v7 = vld [vmem:[#allocation6 + $0x28] sm:$0xff]  ;;  %v411_v11 = vld [vmem:[#allocation6 + $0x20] sm:$0xff] }
  0x29   :  { %v6649_v9 = vpack.c.bf16 %v412_v7, %v408_v6  ;;  %v68_v12 = vld [vmem:[#allocation4 + $0x48] sm:$0xff]  ;;  %4931 = vmatprep.subr.bf16.mxu1 %v4930_v4  ;;  %v6651_v13 = vpack.c.bf16 %v411_v11, %v407_v10  ;;  %v67_v15 = vld [vmem:[#allocation4 + $0x40] sm:$0xff] }
  0x2a   :  { %v72_v14 = vld [vmem:[#allocation4 + $0x68] sm:$0xff]  ;;  %v71_v16 = vld [vmem:[#allocation4 + $0x60] sm:$0xff]  ;;  %4933 = vmatpush1.bf16.msra.mxu1 %v4932_v8 }
  0x2b   :  { %4995 = vmatprep.subr.bf16.mxu0 %v6649_v9  ;;  %v4934_v17 = vpack.c.bf16 %v72_v14, %v68_v12  ;;  %v4936_v18 = vpack.c.bf16 %v71_v16, %v67_v15  ;;  %v416_v19 = vld [vmem:[#allocation6 + $0x48] sm:$0xff]  ;;  %v415_v21 = vld [vmem:[#allocation6 + $0x40] sm:$0xff] }
  0x2c   :  { %v420_v20 = vld [vmem:[#allocation6 + $0x68] sm:$0xff]  ;;  %4997 = vmatpush1.bf16.msra.mxu0 %v6651_v13  ;;  %v419_v23 = vld [vmem:[#allocation6 + $0x60] sm:$0xff] }
  0x2d   :  { %v6655_v22 = vpack.c.bf16 %v420_v20, %v416_v19  ;;  %v76_v24 = vld [vmem:[#allocation4 + $0x88] sm:$0xff]  ;;  %4935 = vmatprep.subr.bf16.mxu1 %v4934_v17  ;;  %v6657_v26 = vpack.c.bf16 %v419_v23, %v415_v21  ;;  %v75_v28 = vld [vmem:[#allocation4 + $0x80] sm:$0xff] }
  0x2e   :  { %v80_v25 = vld [vmem:[#allocation4 + $0xa8] sm:$0xff]  ;;  %v79_v29 = vld [vmem:[#allocation4 + $0xa0] sm:$0xff]  ;;  %4937 = vmatpush1.bf16.msra.mxu1 %v4936_v18 }
  0x2f   :  { %v4938_v27 = vpack.c.bf16 %v80_v25, %v76_v24  ;;  %v424_v30 = vld [vmem:[#allocation6 + $0x88] sm:$0xff]  ;;  %4999 = vmatprep.subr.bf16.mxu0 %v6655_v22  ;;  %v423_v32 = vld [vmem:[#allocation6 + $0x80] sm:$0xff]  ;;  %v4940_v34 = vpack.c.bf16 %v79_v29, %v75_v28 }
  0x30   :  { %v428_v31 = vld [vmem:[#allocation6 + $0xa8] sm:$0xff]  ;;  %v427_v33 = vld [vmem:[#allocation6 + $0xa0] sm:$0xff]  ;;  %5001 = vmatpush1.bf16.msra.mxu0 %v6657_v26 }
  0x31   :  { %v6660_v35 = vpack.c.bf16 %v428_v31, %v424_v30  ;;  %v84_v36 = vld [vmem:[#allocation4 + $0xc8] sm:$0xff]  ;;  %v83_v38 = vld [vmem:[#allocation4 + $0xc0] sm:$0xff]  ;;  %4939 = vmatprep.subr.bf16.mxu1 %v4938_v27  ;;  %v6663_v39 = vpack.c.bf16 %v427_v33, %v423_v32 }
  0x32   :  { %v88_v37 = vld [vmem:[#allocation4 + $0xe8] sm:$0xff]  ;;  %v87_v41 = vld [vmem:[#allocation4 + $0xe0] sm:$0xff]  ;;  %4941 = vmatpush1.bf16.msra.mxu1 %v4940_v34 }
  0x33   :  { %v4942_v40 = vpack.c.bf16 %v88_v37, %v84_v36  ;;  %v432_v42 = vld [vmem:[#allocation6 + $0xc8] sm:$0xff]  ;;  %5003 = vmatprep.subr.bf16.mxu0 %v6660_v35  ;;  %v431_v45 = vld [vmem:[#allocation6 + $0xc0] sm:$0xff]  ;;  %v4944_v49 = vpack.c.bf16 %v87_v41, %v83_v38  ;;  %v62_v37 = vld [vmem:[#allocation4 + $0x18] sm:$0xff] }
  0x34   :  { %v436_v43 = vld [vmem:[#allocation6 + $0xe8] sm:$0xff]  ;;  %v435_v46 = vld [vmem:[#allocation6 + $0xe0] sm:$0xff]  ;;  %5005 = vmatpush1.bf16.msra.mxu0 %v6663_v39  ;;  %v66_v38 = vld [vmem:[#allocation4 + $0x38] sm:$0xff] }
  0x35   :  { %v6666_v44 = vpack.c.bf16 %v436_v43, %v432_v42  ;;  %v92_v47 = vld [vmem:[#allocation4 + $0x108] sm:$0xff]  ;;  %4943 = vmatprep.subr.bf16.mxu1 %v4942_v40  ;;  %v6669_v52 = vpack.c.bf16 %v435_v46, %v431_v45  ;;  %v91_v54 = vld [vmem:[#allocation4 + $0x100] sm:$0xff]  ;;  %v4962_v42 = vpack.c.bf16 %v66_v38, %v62_v37  ;;  %v61_v43 = vld [vmem:[#allocation4 + $0x10] sm:$0xff] }
  0x36   :  { %v96_v48 = vld [vmem:[#allocation4 + $0x128] sm:$0xff]  ;;  %v95_v55 = vld [vmem:[#allocation4 + $0x120] sm:$0xff]  ;;  %4945 = vmatpush1.bf16.msra.mxu1 %v4944_v49  ;;  %v65_v45 = vld [vmem:[#allocation4 + $0x30] sm:$0xff] }
  0x37   :  { %v440_v50 = vld [vmem:[#allocation6 + $0x108] sm:$0xff]  ;;  %v4946_v53 = vpack.c.bf16 %v96_v48, %v92_v47  ;;  %v439_v56 = vld [vmem:[#allocation6 + $0x100] sm:$0xff]  ;;  %5007 = vmatprep.subr.bf16.mxu0 %v6666_v44  ;;  %v4948_v63 = vpack.c.bf16 %v95_v55, %v91_v54  ;;  %v70_v46 = vld [vmem:[#allocation4 + $0x58] sm:$0xff]  ;;  %v4964_v49 = vpack.c.bf16 %v65_v45, %v61_v43 }
  0x38   :  { %v444_v51 = vld [vmem:[#allocation6 + $0x128] sm:$0xff]  ;;  %v443_v58 = vld [vmem:[#allocation6 + $0x120] sm:$0xff]  ;;  %5009 = vmatpush1.bf16.msra.mxu0 %v6669_v52  ;;  %v74_v47 = vld [vmem:[#allocation4 + $0x78] sm:$0xff] }
  0x39   :  { %v6672_v57 = vpack.c.bf16 %v444_v51, %v440_v50  ;;  %v100_v59 = vld [vmem:[#allocation4 + $0x148] sm:$0xff]  ;;  %4947 = vmatprep.subr.bf16.mxu1 %v4946_v53  ;;  %v6675_v1 = vpack.c.bf16 %v443_v58, %v439_v56  ;;  %v99_v3 = vld [vmem:[#allocation4 + $0x140] sm:$0xff]  ;;  %v6699_v48 = vld [vmem:[%s7923_s0] sm:$0xff]  ;;  %v4966_v50 = vpack.c.bf16 %v74_v47, %v70_v46 }
  0x3a   :  { %v104_v60 = vld [vmem:[#allocation4 + $0x168] sm:$0xff]  ;;  %v103_v4 = vld [vmem:[#allocation4 + $0x160] sm:$0xff]  ;;  %4949 = vmatpush1.bf16.msra.mxu1 %v4948_v63  ;;  %v69_v51 = vld [vmem:[#allocation4 + $0x50] sm:$0xff] }
  0x3b   :  { %v448_v61 = vld [vmem:[#allocation6 + $0x148] sm:$0xff]  ;;  %v4950_v2 = vpack.c.bf16 %v104_v60, %v100_v59  ;;  %v447_v5 = vld [vmem:[#allocation6 + $0x140] sm:$0xff]  ;;  %5011 = vmatprep.subr.bf16.mxu0 %v6672_v57  ;;  %v4952_v14 = vpack.c.bf16 %v103_v4, %v99_v3  ;;  %v73_v53 = vld [vmem:[#allocation4 + $0x70] sm:$0xff] }
  0x3c   :  { %v452_v62 = vld [vmem:[#allocation6 + $0x168] sm:$0xff]  ;;  %v451_v7 = vld [vmem:[#allocation6 + $0x160] sm:$0xff]  ;;  %5013 = vmatpush1.bf16.msra.mxu0 %v6675_v1  ;;  %v78_v54 = vld [vmem:[#allocation4 + $0x98] sm:$0xff]  ;;  %v4968_v58 = vpack.c.bf16 %v73_v53, %v69_v51 }
  0x3d   :  { %v6678_v6 = vpack.c.bf16 %v452_v62, %v448_v61  ;;  %v108_v8 = vld [vmem:[#allocation4 + $0x188] sm:$0xff]  ;;  %4951 = vmatprep.subr.bf16.mxu1 %v4950_v2  ;;  %v6681_v15 = vpack.c.bf16 %v451_v7, %v447_v5  ;;  %v107_v17 = vld [vmem:[#allocation4 + $0x180] sm:$0xff]  ;;  %v82_v55 = vld [vmem:[#allocation4 + $0xb8] sm:$0xff] }
  0x3e   :  { %v112_v10 = vld [vmem:[#allocation4 + $0x1a8] sm:$0xff]  ;;  %v111_v18 = vld [vmem:[#allocation4 + $0x1a0] sm:$0xff]  ;;  %4953 = vmatpush1.bf16.msra.mxu1 %v4952_v14  ;;  %v6708_v56 = vld [vmem:[%s7923_s0 + $0x8] sm:$0xff]  ;;  %v4970_v59 = vpack.c.bf16 %v82_v55, %v78_v54 }
  0x3f   :  { %v456_v11 = vld [vmem:[#allocation6 + $0x188] sm:$0xff]  ;;  %v4954_v16 = vpack.c.bf16 %v112_v10, %v108_v8  ;;  %v455_v19 = vld [vmem:[#allocation6 + $0x180] sm:$0xff]  ;;  %5015 = vmatprep.subr.bf16.mxu0 %v6678_v6  ;;  %v4956_v28 = vpack.c.bf16 %v111_v18, %v107_v17  ;;  %v77_v60 = vld [vmem:[#allocation4 + $0x90] sm:$0xff] }
  0x40   :  { %v460_v12 = vld [vmem:[#allocation6 + $0x1a8] sm:$0xff]  ;;  %v459_v21 = vld [vmem:[#allocation6 + $0x1a0] sm:$0xff]  ;;  %5017 = vmatpush1.bf16.msra.mxu0 %v6681_v15  ;;  %v81_v61 = vld [vmem:[#allocation4 + $0xb0] sm:$0xff] }
  0x41   :  { %v6684_v20 = vpack.c.bf16 %v460_v12, %v456_v11  ;;  %v116_v23 = vld [vmem:[#allocation4 + $0x1c8] sm:$0xff]  ;;  %4955 = vmatprep.subr.bf16.mxu1 %v4954_v16  ;;  %v6687_v29 = vpack.c.bf16 %v459_v21, %v455_v19  ;;  %v115_v31 = vld [vmem:[#allocation4 + $0x1c0] sm:$0xff]  ;;  %v86_v62 = vld [vmem:[#allocation4 + $0xd8] sm:$0xff]  ;;  %v4972_v2 = vpack.c.bf16 %v81_v61, %v77_v60 }
  0x42   :  { %v120_v24 = vld [vmem:[#allocation4 + $0x1e8] sm:$0xff]  ;;  %v119_v32 = vld [vmem:[#allocation4 + $0x1e0] sm:$0xff]  ;;  %4957 = vmatpush1.bf16.msra.mxu1 %v4956_v28  ;;  %v90_v63 = vld [vmem:[#allocation4 + $0xf8] sm:$0xff] }
  0x43   :  { %v464_v25 = vld [vmem:[#allocation6 + $0x1c8] sm:$0xff]  ;;  %v4958_v30 = vpack.c.bf16 %v120_v24, %v116_v23  ;;  %v463_v33 = vld [vmem:[#allocation6 + $0x1c0] sm:$0xff]  ;;  %5019 = vmatprep.subr.bf16.mxu0 %v6684_v20  ;;  %v4960_v40 = vpack.c.bf16 %v119_v32, %v115_v31  ;;  %v4974_v3 = vpack.c.bf16 %v90_v63, %v86_v62  ;;  %v85_v4 = vld [vmem:[#allocation4 + $0xd0] sm:$0xff] }
  0x44   :  { %v468_v27 = vld [vmem:[#allocation6 + $0x1e8] sm:$0xff]  ;;  %v467_v36 = vld [vmem:[#allocation6 + $0x1e0] sm:$0xff]  ;;  %5021 = vmatpush1.bf16.msra.mxu0 %v6687_v29  ;;  %v89_v5 = vld [vmem:[#allocation4 + $0xf0] sm:$0xff] }
  0x45   :  { %v6690_v34 = vpack.c.bf16 %v468_v27, %v464_v25  ;;  %4959 = vmatprep.subr.bf16.mxu1 %v4958_v30  ;;  %v6693_v41 = vpack.c.bf16 %v467_v36, %v463_v33  ;;  %v98_v7 = vld [vmem:[#allocation4 + $0x138] sm:$0xff]  ;;  %v4976_v8 = vpack.c.bf16 %v89_v5, %v85_v4  ;;  %v93_v11 = vld [vmem:[#allocation4 + $0x110] sm:$0xff] }
  0x46   :  { %4961 = vmatpush1.bf16.msra.mxu1 %v4960_v40  ;;  %v97_v12 = vld [vmem:[#allocation4 + $0x130] sm:$0xff]  ;;  %v102_v14 = vld [vmem:[#allocation4 + $0x158] sm:$0xff] }
  0x47   :  { %5023 = vmatprep.subr.bf16.mxu0 %v6690_v34  ;;  %4963 = vmatprep.subr.bf16.mxu1 %v4962_v42  ;;  %v106_v16 = vld [vmem:[#allocation4 + $0x178] sm:$0xff]  ;;  %v101_v18 = vld [vmem:[#allocation4 + $0x150] sm:$0xff] }
  0x48   :  { %5025 = vmatpush1.bf16.msra.mxu0 %v6693_v41  ;;  %v4982_v17 = vpack.c.bf16 %v106_v16, %v102_v14  ;;  %v105_v19 = vld [vmem:[#allocation4 + $0x170] sm:$0xff]  ;;  %v110_v21 = vld [vmem:[#allocation4 + $0x198] sm:$0xff] }
  0x49   :  { %5059 = vmatprep.subr.bf16.mxu0 %v6649_v9  ;;  %210 = vmatmul.mubr.f32.vlgmr.msra.gmra.mrb[0].mxu1 %v6699_v48  ;;  %v6719_v9 = vld [vmem:[%s7923_s0 + $0x10] sm:$0xff]  ;;  %v114_v23 = vld [vmem:[#allocation4 + $0x1b8] sm:$0xff]  ;;  %v109_v25 = vld [vmem:[#allocation4 + $0x190] sm:$0xff] }
  0x4a   :  { %4965 = vmatpush1.bf16.msra.mxu1 %v4964_v49  ;;  %215 = vmatprep.mubr.f32.mxu1 %v7934_v0  ;;  %v4986_v24 = vpack.c.bf16 %v114_v23, %v110_v21  ;;  %v113_v27 = vld [vmem:[#allocation4 + $0x1b0] sm:$0xff]  ;;  %v118_v28 = vld [vmem:[#allocation4 + $0x1d8] sm:$0xff]  ;;  %v125_v23 = vlaneseq }
  0x4b   :  { %536 = vmatmul.mubr.f32.vlgmr.msra.gmra.mrb[0].mxu0 %v7934_v0  ;;  %4967 = vmatprep.subr.bf16.mxu1 %v4966_v50  ;;  %v122_v30 = vld [vmem:[#allocation4 + $0x1f8] sm:$0xff]  ;;  %v117_v32 = vld [vmem:[#allocation4 + $0x1d0] sm:$0xff] }
  0x4c   :  { %5061 = vmatpush1.bf16.msra.mxu0 %v6651_v13  ;;  %774 = vmatprep.mubr.f32.mxu0 %v7934_v0  ;;  %v94_v13 = vld [vmem:[#allocation4 + $0x118] sm:$0xff]  ;;  %v4990_v31 = vpack.c.bf16 %v122_v30, %v118_v28  ;;  %v121_v33 = vld [vmem:[#allocation4 + $0x1f0] sm:$0xff] }
  0x4d   :  { %216 = vmatmul.mubr.f32.gmra.mrb[2].mxu1 %v6708_v56  ;;  %5063 = vmatprep.subr.bf16.mxu0 %v6655_v22  ;;  %v6728_v22 = vld [vmem:[%s7923_s0 + $0x18] sm:$0xff]  ;;  %v4978_v10 = vpack.c.bf16 %v98_v7, %v94_v13  ;;  %v410_v36 = vld [vmem:[#allocation6 + $0x18] sm:$0xff]  ;;  %v409_v40 = vld [vmem:[#allocation6 + $0x10] sm:$0xff] }
  0x4e   :  { %4969 = vmatpush1.bf16.msra.mxu1 %v4968_v58  ;;  %221 = vmatprep.mubr.f32.mxu1 %v7934_v0  ;;  %v414_v37 = vld [vmem:[#allocation6 + $0x38] sm:$0xff]  ;;  %v413_v42 = vld [vmem:[#allocation6 + $0x30] sm:$0xff] }
  0x4f   :  { %4971 = vmatprep.subr.bf16.mxu1 %v4970_v59  ;;  %v6766_v38 = vpack.c.bf16 %v414_v37, %v410_v36  ;;  %v418_v43 = vld [vmem:[#allocation6 + $0x58] sm:$0xff]  ;;  %v417_v46 = vld [vmem:[#allocation6 + $0x50] sm:$0xff] }
  0x50   :  { %5065 = vmatpush1.bf16.msra.mxu0 %v6657_v26  ;;  %v6737_v26 = vld [vmem:[%s7923_s0 + $0x20] sm:$0xff]  ;;  %v426_v49 = vld [vmem:[#allocation6 + $0x98] sm:$0xff] }
  0x51   :  { %222 = vmatmul.mubr.f32.gmra.mrb[4].mxu1 %v6719_v9  ;;  %5067 = vmatprep.subr.bf16.mxu0 %v6660_v35  ;;  %v4980_v35 = vpack.c.bf16 %v97_v12, %v93_v11  ;;  %v421_v47 = vld [vmem:[#allocation6 + $0x70] sm:$0xff]  ;;  %v430_v50 = vld [vmem:[#allocation6 + $0xb8] sm:$0xff] }
  0x52   :  { %4973 = vmatpush1.bf16.msra.mxu1 %v4972_v2  ;;  %227 = vmatprep.mubr.f32.mxu1 %v7934_v0  ;;  %v425_v51 = vld [vmem:[#allocation6 + $0x90] sm:$0xff]  ;;  %v434_v54 = vld [vmem:[#allocation6 + $0xd8] sm:$0xff] }
  0x53   :  { %4975 = vmatprep.subr.bf16.mxu1 %v4974_v3  ;;  %v429_v53 = vld [vmem:[#allocation6 + $0xb0] sm:$0xff]  ;;  %v438_v55 = vld [vmem:[#allocation6 + $0xf8] sm:$0xff] }
  0x54   :  { %5069 = vmatpush1.bf16.msra.mxu0 %v6663_v39  ;;  %v6746_v39 = vld [vmem:[%s7923_s0 + $0x28] sm:$0xff]  ;;  %v433_v58 = vld [vmem:[#allocation6 + $0xd0] sm:$0xff] }
  0x55   :  { %228 = vmatmul.mubr.f32.gmra.mrb[6].mxu1 %v6728_v22  ;;  %5071 = vmatprep.subr.bf16.mxu0 %v6666_v44  ;;  %v4984_v44 = vpack.c.bf16 %v105_v19, %v101_v18  ;;  %v437_v59 = vld [vmem:[#allocation6 + $0xf0] sm:$0xff]  ;;  %v442_v60 = vld [vmem:[#allocation6 + $0x118] sm:$0xff] }
  0x56   :  { %4977 = vmatpush1.bf16.msra.mxu1 %v4976_v8  ;;  %233 = vmatprep.mubr.f32.mxu1 %v7934_v0  ;;  %v446_v61 = vld [vmem:[#allocation6 + $0x138] sm:$0xff]  ;;  %v441_v63 = vld [vmem:[#allocation6 + $0x110] sm:$0xff] }
  0x57   :  { %4979 = vmatprep.subr.bf16.mxu1 %v4978_v10  ;;  %v6800_v62 = vpack.c.bf16 %v446_v61, %v442_v60  ;;  %v445_v2 = vld [vmem:[#allocation6 + $0x130] sm:$0xff]  ;;  %v450_v3 = vld [vmem:[#allocation6 + $0x158] sm:$0xff] }
  0x58   :  { %5073 = vmatpush1.bf16.msra.mxu0 %v6669_v52  ;;  %v6755_v52 = vld [vmem:[%s7923_s0 + $0x30] sm:$0xff]  ;;  %v454_v4 = vld [vmem:[#allocation6 + $0x178] sm:$0xff]  ;;  %v449_v13 = vld [vmem:[#allocation6 + $0x150] sm:$0xff] }
  0x59   :  { %234 = vmatmul.mubr.f32.gmra.mrb[8].mxu1 %v6737_v26  ;;  %5075 = vmatprep.subr.bf16.mxu0 %v6672_v57  ;;  %v4988_v57 = vpack.c.bf16 %v113_v27, %v109_v25  ;;  %v6808_v5 = vpack.c.bf16 %v454_v4, %v450_v3  ;;  %v453_v7 = vld [vmem:[#allocation6 + $0x170] sm:$0xff]  ;;  %v458_v8 = vld [vmem:[#allocation6 + $0x198] sm:$0xff] }
  0x5a   :  { %4981 = vmatpush1.bf16.msra.mxu1 %v4980_v35  ;;  %239 = vmatprep.mubr.f32.mxu1 %v7934_v0  ;;  %v462_v10 = vld [vmem:[#allocation6 + $0x1b8] sm:$0xff]  ;;  %v457_v12 = vld [vmem:[#allocation6 + $0x190] sm:$0xff] }
  0x5b   :  { %4983 = vmatprep.subr.bf16.mxu1 %v4982_v17  ;;  %v6816_v11 = vpack.c.bf16 %v462_v10, %v458_v8  ;;  %v461_v14 = vld [vmem:[#allocation6 + $0x1b0] sm:$0xff]  ;;  %v466_v16 = vld [vmem:[#allocation6 + $0x1d8] sm:$0xff] }
  0x5c   :  { %5077 = vmatpush1.bf16.msra.mxu0 %v6675_v1  ;;  %v6764_v1 = vld [vmem:[%s7923_s0 + $0x38] sm:$0xff]  ;;  %v470_v35 = vld [vmem:[#allocation6 + $0x1f8] sm:$0xff]  ;;  %v465_v18 = vld [vmem:[#allocation6 + $0x1d0] sm:$0xff] }
  0x5d   :  { %240 = vmatmul.mubr.f32.gmra.mrb[10].mxu1 %v6746_v39  ;;  %5079 = vmatprep.subr.bf16.mxu0 %v6678_v6  ;;  %v4992_v6 = vpack.c.bf16 %v121_v33, %v117_v32  ;;  %v6824_v17 = vpack.c.bf16 %v470_v35, %v466_v16  ;;  %v469_v19 = vld [vmem:[#allocation6 + $0x1f0] sm:$0xff] }
  0x5e   :  { %4985 = vmatpush1.bf16.msra.mxu1 %v4984_v44  ;;  %245 = vmatprep.mubr.f32.mxu1 %v7934_v0  ;;  %v6829_v21 = vpack.c.bf16 %v469_v19, %v465_v18 }
  0x5f   :  { %4987 = vmatprep.subr.bf16.mxu1 %v4986_v24  ;;  %v123_v24 = vld [vmem:[%s7926_s3] sm:$0xf] }
  0x60   :  { %5081 = vmatpush1.bf16.msra.mxu0 %v6681_v15  ;;  %v422_v15 = vld [vmem:[#allocation6 + $0x78] sm:$0xff] }
  0x61   :  { %246 = vmatmul.mubr.f32.gmra.mrb[12].mxu1 %v6755_v52  ;;  %5083 = vmatprep.subr.bf16.mxu0 %v6684_v20  ;;  %v6772_v20 = vpack.c.bf16 %v413_v42, %v409_v40  ;;  %v6775_v45 = vpack.c.bf16 %v422_v15, %v418_v43 }
  0x62   :  { %4989 = vmatpush1.bf16.msra.mxu1 %v4988_v57  ;;  %251 = vmatprep.mubr.f32.mxu1 %v7934_v0 }
  0x63   :  { %4991 = vmatprep.subr.bf16.mxu1 %v4990_v31 }
  0x64   :  { %5085 = vmatpush1.bf16.msra.mxu0 %v6687_v29  ;;  %v6781_v29 = vpack.c.bf16 %v421_v47, %v417_v46 }
  0x65   :  { %252 = vmatmul.mubr.f32.gmra.mrb[14].mxu1 %v6764_v1  ;;  %5087 = vmatprep.subr.bf16.mxu0 %v6690_v34  ;;  %v6784_v34 = vpack.c.bf16 %v430_v50, %v426_v49 }
  0x66   :  { %4993 = vmatpush1.bf16.msra.mxu1 %v4992_v6  ;;  %322 = vmatprep.mubr.f32.mxu1 %v7934_v0 }
  0x67   :  { %5027 = vmatprep.subr.bf16.mxu1 %v6766_v38 }
  0x68   :  { %5089 = vmatpush1.bf16.msra.mxu0 %v6693_v41  ;;  %v6789_v41 = vpack.c.bf16 %v429_v53, %v425_v51 }
  0x69   :  { %323 = vmatmul.mubr.f32.vlgmr.msra.gmra.mrb[16].mxu1 %v6699_v48  ;;  %v6792_v48 = vpack.c.bf16 %v438_v55, %v434_v54 }
  0x6a   :  { %5029 = vmatpush1.bf16.msra.mxu1 %v6772_v20  ;;  %328 = vmatprep.mubr.f32.mxu1 %v7934_v0 }
  0x6b   :  { %5031 = vmatprep.subr.bf16.mxu1 %v6775_v45 }
  0x6d   :  { %329 = vmatmul.mubr.f32.gmra.mrb[18].mxu1 %v6708_v56  ;;  %v6797_v56 = vpack.c.bf16 %v437_v59, %v433_v58 }
  0x6e   :  { %5033 = vmatpush1.bf16.msra.mxu1 %v6781_v29  ;;  %334 = vmatprep.mubr.f32.mxu1 %v7934_v0 }
  0x6f   :  { %5035 = vmatprep.subr.bf16.mxu1 %v6784_v34 }
  0x71   :  { %335 = vmatmul.mubr.f32.gmra.mrb[20].mxu1 %v6719_v9  ;;  %v6805_v9 = vpack.c.bf16 %v445_v2, %v441_v63 }
  0x72   :  { %5037 = vmatpush1.bf16.msra.mxu1 %v6789_v41  ;;  %340 = vmatprep.mubr.f32.mxu1 %v7934_v0 }
  0x73   :  { %5039 = vmatprep.subr.bf16.mxu1 %v6792_v48 }
  0x75   :  { %341 = vmatmul.mubr.f32.gmra.mrb[22].mxu1 %v6728_v22  ;;  %v6813_v22 = vpack.c.bf16 %v453_v7, %v449_v13 }
  0x76   :  { %5041 = vmatpush1.bf16.msra.mxu1 %v6797_v56  ;;  %346 = vmatprep.mubr.f32.mxu1 %v7934_v0 }
  0x77   :  { %5043 = vmatprep.subr.bf16.mxu1 %v6800_v62 }
  0x79   :  { %347 = vmatmul.mubr.f32.gmra.mrb[24].mxu1 %v6737_v26  ;;  %v6821_v26 = vpack.c.bf16 %v461_v14, %v457_v12 }
  0x7a   :  { %5045 = vmatpush1.bf16.msra.mxu1 %v6805_v9  ;;  %352 = vmatprep.mubr.f32.mxu1 %v7934_v0 }
  0x7b   :  { %5047 = vmatprep.subr.bf16.mxu1 %v6808_v5 }
  0x7d   :  { %353 = vmatmul.mubr.f32.gmra.mrb[26].mxu1 %v6746_v39  ;;  %v6854_v39 = vshrl.u32 %v125_v23, 7 }
  0x7e   :  { %5049 = vmatpush1.bf16.msra.mxu1 %v6813_v22  ;;  %358 = vmatprep.mubr.f32.mxu1 %v7934_v0 }
  0x7f   :  { %5051 = vmatprep.subr.bf16.mxu1 %v6816_v11  ;;  %v7933_v44 = vsub.s32 0, %v6854_v39  ;;  %v7932_v25 = vsub.s32 1, %v6854_v39  ;;  %v7930_v18 = vsub.s32 2, %v6854_v39  ;;  %v7931_v23 = vsub.s32 3, %v6854_v39 }
  0x81   :  { %359 = vmatmul.mubr.f32.gmra.mrb[28].mxu1 %v6755_v52  ;;  %v128_v27 = vrot.slane %v123_v24, %v7933_v44  ;;  %v132_v28 = vrot.slane %v123_v24, %v7932_v25 }
  0x82   :  { %5053 = vmatpush1.bf16.msra.mxu1 %v6821_v26  ;;  %364 = vmatprep.mubr.f32.mxu1 %v7934_v0 }
  0x83   :  { %5055 = vmatprep.subr.bf16.mxu1 %v6824_v17 }
  0x85   :  { %365 = vmatmul.mubr.f32.gmra.mrb[30].mxu1 %v6764_v1 }
  0x86   :  { %5057 = vmatpush1.bf16.msra.mxu1 %v6829_v21  ;;  %606 = vmatprep.mubr.f32.mxu1 %v7934_v0 }
  0x87   :  { %5091 = vmatprep.subr.bf16.mxu1 %v6766_v38 }
  0x89   :  { %607 = vmatmul.mubr.f32.vlgmr.msra.gmra.mrb[16].mxu1 %v7934_v0 }
  0x8a   :  { %5093 = vmatpush1.bf16.msra.mxu1 %v6772_v20  ;;  %845 = vmatprep.mubr.f32.mxu1 %v7934_v0 }
  0x8b   :  { %5095 = vmatprep.subr.bf16.mxu1 %v6775_v45 }
  0x8e   :  { %5097 = vmatpush1.bf16.msra.mxu1 %v6781_v29 }
  0x8f   :  { %5099 = vmatprep.subr.bf16.mxu1 %v6784_v34 }
  0x92   :  { %5101 = vmatpush1.bf16.msra.mxu1 %v6789_v41 }
  0x93   :  { %5103 = vmatprep.subr.bf16.mxu1 %v6792_v48 }
  0x96   :  { %5105 = vmatpush1.bf16.msra.mxu1 %v6797_v56 }
  0x97   :  { %5107 = vmatprep.subr.bf16.mxu1 %v6800_v62 }
  0x9a   :  { %5109 = vmatpush1.bf16.msra.mxu1 %v6805_v9 }
  0x9b   :  { %5111 = vmatprep.subr.bf16.mxu1 %v6808_v5 }
  0x9e   :  { %5113 = vmatpush1.bf16.msra.mxu1 %v6813_v22 }
  0x9f   :  { %5115 = vmatprep.subr.bf16.mxu1 %v6816_v11 }
  0xa2   :  { %5117 = vmatpush1.bf16.msra.mxu1 %v6821_v26 }
  0xa3   :  { %5119 = vmatprep.subr.bf16.mxu1 %v6824_v17 }
  0xa6   :  { %5121 = vmatpush1.bf16.msra.mxu1 %v6829_v21 }
  0xa7   :  { %5155 = vmatprep.subr.bf16.mxu1 %v6766_v38 }
 0x11c   :  { %v211_v30 = vpop.f32.mrb[0].mxu1 }
 0x11d   :  { %v212_v52 = vadd.f32 %v211_v30, %v128_v27  ;;  %v213_v57 = vpop.f32.mrb[1].mxu1 }
 0x11e   :  { %v537_v31 = vpop.f32.mrb[0].mxu0  ;;  %v214_v32 = vadd.f32 %v213_v57, %v132_v28  ;;  %v6897_v57 = vrot.slane %v123_v24, %v7930_v18 }
 0x11f   :  { %v539_v33 = vpop.f32.mrb[1].mxu0  ;;  %v613_v36 = vadd.f32 %v537_v31, %v212_v52 }
 0x120   :  { %v614_v37 = vadd.f32 %v539_v33, %v214_v32  ;;  %v217_v1 = vpop.f32.mrb[2].mxu1 }
 0x121   :  { %v6865_v6 = vadd.f32 %v217_v1, %v128_v27  ;;  %v219_v40 = vpop.f32.mrb[3].mxu1  ;;  %v4812_v35 = vmul.f32 -1.442695, %v613_v36 }
 0x122   :  { %v6867_v42 = vadd.f32 %v219_v40, %v132_v28  ;;  %v4813_v16 = vmul.f32 -1.442695, %v614_v37 }
 0x124   :  { %v223_v43 = vpop.f32.mrb[4].mxu1  ;;  %6247 = vpow2.f32 %v4813_v16  ;;  %v889_v16 = vld [vmem:[#allocation6 + $0x20] sm:$0xff] }
 0x125   :  { %v6869_v15 = vadd.f32 %v223_v43, %v128_v27  ;;  %v225_v46 = vpop.f32.mrb[5].mxu1  ;;  %6249 = vpow2.f32 %v4812_v35 }
 0x126   :  { %v6871_v47 = vadd.f32 %v225_v46, %v132_v28 }
 0x128   :  { %v229_v49 = vpop.f32.mrb[6].mxu1 }
 0x129   :  { %v6873_v50 = vadd.f32 %v229_v49, %v128_v27  ;;  %v231_v51 = vpop.f32.mrb[7].mxu1 }
 0x12a   :  { %v6875_v53 = vadd.f32 %v231_v51, %v132_v28 }
 0x12c   :  { %v235_v54 = vpop.f32.mrb[8].mxu1 }
 0x12d   :  { %v6877_v55 = vadd.f32 %v235_v54, %v128_v27  ;;  %v237_v58 = vpop.f32.mrb[9].mxu1 }
 0x12e   :  { %v6879_v59 = vadd.f32 %v237_v58, %v132_v28  ;;  %v6248_v19 = vpop.eup %6247 }
 0x12f   :  { %v6250_v30 = vpop.eup %6249  ;;  %v626_v52 = vadd.f32 1.0, %v6248_v19  ;;  %v894_v19 = vld [vmem:[#allocation6 + $0x48] sm:$0xff] }
 0x130   :  { %v241_v60 = vpop.f32.mrb[10].mxu1 }
 0x131   :  { %v6881_v61 = vadd.f32 %v241_v60, %v128_v27  ;;  %v243_v63 = vpop.f32.mrb[11].mxu1  ;;  %6251 = vrcp.f32 %v626_v52 }
 0x132   :  { %v6883_v2 = vadd.f32 %v243_v63, %v132_v28 }
 0x134   :  { %v247_v3 = vpop.f32.mrb[12].mxu1 }
 0x135   :  { %v6885_v4 = vadd.f32 %v247_v3, %v128_v27  ;;  %v249_v13 = vpop.f32.mrb[13].mxu1  ;;  %v886_v3 = vld [vmem:[#allocation6 + $0x8] sm:$0xff] }
 0x136   :  { %v6887_v7 = vadd.f32 %v249_v13, %v132_v28  ;;  %v890_v13 = vld [vmem:[#allocation6 + $0x28] sm:$0xff] }
 0x138   :  { %v253_v8 = vpop.f32.mrb[14].mxu1 }
 0x139   :  { %v6889_v10 = vadd.f32 %v253_v8, %v128_v27  ;;  %v255_v12 = vpop.f32.mrb[15].mxu1  ;;  %v620_v27 = vadd.f32 1.0, %v6250_v30  ;;  %v6930_v8 = vpack.c.bf16 %v890_v13, %v886_v3  ;;  %v898_v30 = vld [vmem:[#allocation6 + $0x68] sm:$0xff]  ;;  %v917_v13 = vld [vmem:[#allocation6 + $0x100] sm:$0xff] }
 0x13a   :  { %v6891_v14 = vadd.f32 %v255_v12, %v132_v28  ;;  %v6901_v28 = vrot.slane %v123_v24, %v7931_v23  ;;  %v885_v12 = vld [vmem:[#allocation6] sm:$0xff]  ;;  %v6936_v52 = vpack.c.bf16 %v898_v30, %v894_v19  ;;  %v926_v19 = vld [vmem:[#allocation6 + $0x148] sm:$0xff] }
 0x13b   :  { %6253 = vrcp.f32 %v620_v27  ;;  %v6252_v1 = vpop.eup %6251  ;;  %v6932_v35 = vpack.c.bf16 %v889_v16, %v885_v12  ;;  %5123 = vmatprep.subr.bf16.mxu0 %v6930_v8  ;;  %v893_v27 = vld [vmem:[#allocation6 + $0x40] sm:$0xff]  ;;  %v930_v30 = vld [vmem:[#allocation6 + $0x168] sm:$0xff] }
 0x13c   :  { %v636_v46 = vmul.f32 0.0, %v6252_v1  ;;  %v921_v12 = vld [vmem:[#allocation6 + $0x120] sm:$0xff] }
 0x13d   :  { %v6956_v16 = vpack.c.bf16 %v921_v12, %v917_v13  ;;  %v941_v12 = vld [vmem:[#allocation6 + $0x1c0] sm:$0xff] }
 0x145   :  { %v6254_v40 = vpop.eup %6253 }
 0x15c   :  { %v608_v31 = vpop.f32.mrb[16].mxu1 }
 0x15d   :  { %v6146_v32 = vadd.f32 %v608_v31, %v6897_v57  ;;  %v610_v33 = vpop.f32.mrb[17].mxu1 }
 0x15e   :  { %v6147_v36 = vadd.f32 %v610_v33, %v6901_v28 }
 0x15f   :  { %6255 = vtanh.f32 %v6146_v32  ;;  %v906_v32 = vld [vmem:[#allocation6 + $0xa8] sm:$0xff] }
 0x160   :  { %v4814_v37 = vmul.f32 -1.442695, %v6147_v36  ;;  %v901_v36 = vld [vmem:[#allocation6 + $0x80] sm:$0xff] }
 0x162   :  { %6257 = vpow2.f32 %v4814_v37  ;;  %v905_v37 = vld [vmem:[#allocation6 + $0xa0] sm:$0xff] }
 0x163   :  { %v6944_v1 = vpack.c.bf16 %v905_v37, %v901_v36  ;;  %v938_v36 = vld [vmem:[#allocation6 + $0x1a8] sm:$0xff] }
 0x169   :  { %v6256_v43 = vpop.eup %6255 }
 0x16a   :  { %v637_v49 = vmul.f32 %v6256_v43, %v6254_v40  ;;  %v910_v40 = vld [vmem:[#allocation6 + $0xc8] sm:$0xff] }
 0x16b   :  { %v914_v43 = vld [vmem:[#allocation6 + $0xe8] sm:$0xff] }
 0x16c   :  { %v6258_v51 = vpop.eup %6257  ;;  %v6905_v54 = vadd.f32 %v637_v49, %v636_v46  ;;  %v6948_v46 = vpack.c.bf16 %v914_v43, %v910_v40  ;;  %v909_v49 = vld [vmem:[#allocation6 + $0xc0] sm:$0xff] }
 0x16d   :  { %v633_v24 = vadd.f32 1.0, %v6258_v51  ;;  %v913_v51 = vld [vmem:[#allocation6 + $0xe0] sm:$0xff] }
 0x16e   :  { %6259 = vtanh.f32 %v6905_v54  ;;  %v933_v43 = vld [vmem:[#allocation6 + $0x180] sm:$0xff] }
 0x16f   :  { %6261 = vrcp.f32 %v633_v24  ;;  %v6950_v24 = vpack.c.bf16 %v913_v51, %v909_v49  ;;  %v937_v49 = vld [vmem:[#allocation6 + $0x1a0] sm:$0xff]  ;;  %v942_v51 = vld [vmem:[#allocation6 + $0x1c8] sm:$0xff] }
 0x178   :  { %v6260_v58 = vpop.eup %6259 }
 0x179   :  { %v6262_v60 = vpop.eup %6261 }
 0x17a   :  { %v6908_v63 = vmul.f32 %v6262_v60, %v6260_v58  ;;  %v918_v58 = vld [vmem:[#allocation6 + $0x108] sm:$0xff] }
 0x17b   :  { %v922_v60 = vld [vmem:[#allocation6 + $0x128] sm:$0xff] }
 0x17c   :  { %775 = vmatmul.mubr.f32.vlgmr.msra.gmra.mrb[2].mxu0 %v6908_v63  ;;  %846 = vmatmul.mubr.f32.vlgmr.msra.gmra.mrb[18].mxu1 %v6908_v63  ;;  %v6954_v3 = vpack.c.bf16 %v922_v60, %v918_v58  ;;  %v946_v58 = vld [vmem:[#allocation6 + $0x1e8] sm:$0xff]  ;;  %v6968_v60 = vpack.c.bf16 %v937_v49, %v933_v43 }
 0x17d   :  { %5157 = vmatpush1.bf16.msra.mxu1 %v6772_v20  ;;  %1013 = vmatprep.mubr.f32.mxu0 %v7934_v0  ;;  %v6971_v13 = vpack.c.bf16 %v946_v58, %v942_v51 }
 0x17e   :  { %5159 = vmatprep.subr.bf16.mxu1 %v6775_v45  ;;  %1084 = vmatprep.mubr.f32.mxu1 %v7934_v0 }
 0x17f   :  { %5125 = vmatpush1.bf16.msra.mxu0 %v6932_v35 }
 0x180   :  { %5127 = vmatprep.subr.bf16.mxu0 %v6936_v52 }
 0x181   :  { %5161 = vmatpush1.bf16.msra.mxu1 %v6781_v29 }
 0x182   :  { %5163 = vmatprep.subr.bf16.mxu1 %v6784_v34 }
 0x185   :  { %5165 = vmatpush1.bf16.msra.mxu1 %v6789_v41 }
 0x186   :  { %5167 = vmatprep.subr.bf16.mxu1 %v6792_v48 }
 0x189   :  { %5169 = vmatpush1.bf16.msra.mxu1 %v6797_v56 }
 0x18a   :  { %5171 = vmatprep.subr.bf16.mxu1 %v6800_v62 }
 0x18d   :  { %5173 = vmatpush1.bf16.msra.mxu1 %v6805_v9 }
 0x18e   :  { %5175 = vmatprep.subr.bf16.mxu1 %v6808_v5 }
 0x191   :  { %5177 = vmatpush1.bf16.msra.mxu1 %v6813_v22 }
 0x192   :  { %5179 = vmatprep.subr.bf16.mxu1 %v6816_v11 }
 0x195   :  { %5181 = vmatpush1.bf16.msra.mxu1 %v6821_v26 }
 0x196   :  { %5183 = vmatprep.subr.bf16.mxu1 %v6824_v17 }
 0x199   :  { %5185 = vmatpush1.bf16.msra.mxu1 %v6829_v21  ;;  %v897_v21 = vld [vmem:[#allocation6 + $0x60] sm:$0xff] }
 0x19a   :  { %5219 = vmatprep.subr.bf16.mxu1 %v6766_v38  ;;  %v6938_v31 = vpack.c.bf16 %v897_v21, %v893_v27  ;;  %v902_v38 = vld [vmem:[#allocation6 + $0x88] sm:$0xff]  ;;  %v925_v27 = vld [vmem:[#allocation6 + $0x140] sm:$0xff]  ;;  %v6960_v21 = vpack.c.bf16 %v930_v30, %v926_v19 }
 0x19b   :  { %v6942_v33 = vpack.c.bf16 %v906_v32, %v902_v38  ;;  %v929_v38 = vld [vmem:[#allocation6 + $0x160] sm:$0xff]  ;;  %v934_v32 = vld [vmem:[#allocation6 + $0x188] sm:$0xff] }
 0x19c   :  { %5129 = vmatpush1.bf16.msra.mxu0 %v6938_v31  ;;  %v6962_v37 = vpack.c.bf16 %v929_v38, %v925_v27  ;;  %v6964_v40 = vpack.c.bf16 %v938_v36, %v934_v32  ;;  %v945_v19 = vld [vmem:[#allocation6 + $0x1e0] sm:$0xff] }
 0x19d   :  { %5131 = vmatprep.subr.bf16.mxu0 %v6942_v33  ;;  %v6974_v30 = vpack.c.bf16 %v945_v19, %v941_v12 }
 0x1a0   :  { %5133 = vmatpush1.bf16.msra.mxu0 %v6944_v1 }
 0x1a1   :  { %5135 = vmatprep.subr.bf16.mxu0 %v6948_v46 }
 0x1a4   :  { %5137 = vmatpush1.bf16.msra.mxu0 %v6950_v24 }
 0x1a5   :  { %5139 = vmatprep.subr.bf16.mxu0 %v6954_v3 }
 0x1a8   :  { %5141 = vmatpush1.bf16.msra.mxu0 %v6956_v16 }
 0x1a9   :  { %5143 = vmatprep.subr.bf16.mxu0 %v6960_v21 }
 0x1ac   :  { %5145 = vmatpush1.bf16.msra.mxu0 %v6962_v37 }
 0x1ad   :  { %5147 = vmatprep.subr.bf16.mxu0 %v6964_v40 }
 0x1b0   :  { %5149 = vmatpush1.bf16.msra.mxu0 %v6968_v60 }
 0x1b1   :  { %5151 = vmatprep.subr.bf16.mxu0 %v6971_v13 }
 0x1b4   :  { %5153 = vmatpush1.bf16.msra.mxu0 %v6974_v30 }
 0x1b5   :  { %5187 = vmatprep.subr.bf16.mxu0 %v6930_v8 }
 0x24f   :  { %v776_v27 = vpop.f32.mrb[2].mxu0  ;;  %v847_v38 = vpop.f32.mrb[18].mxu1 }
 0x250   :  { %v852_v32 = vadd.f32 %v776_v27, %v6865_v6  ;;  %v778_v36 = vpop.f32.mrb[3].mxu0  ;;  %v849_v43 = vpop.f32.mrb[19].mxu1  ;;  %v6148_v18 = vadd.f32 %v847_v38, %v6897_v57 }
 0x251   :  { %v853_v49 = vadd.f32 %v778_v36, %v6867_v42  ;;  %v6149_v12 = vadd.f32 %v849_v43, %v6901_v28 }
 0x252   :  { %v4815_v51 = vmul.f32 -1.442695, %v852_v32 }
 0x253   :  { %v4816_v58 = vmul.f32 -1.442695, %v853_v49  ;;  %v4817_v19 = vmul.f32 -1.442695, %v6149_v12 }
 0x254   :  { %6263 = vpow2.f32 %v4815_v51 }
 0x255   :  { %6265 = vpow2.f32 %v4816_v58 }
 0x256   :  { %6267 = vpow2.f32 %v4817_v19 }
 0x257   :  { %6269 = vtanh.f32 %v6148_v18 }
 0x25e   :  { %v6264_v23 = vpop.eup %6263 }
 0x25f   :  { %v6266_v25 = vpop.eup %6265  ;;  %v859_v44 = vadd.f32 1.0, %v6264_v23 }
 0x260   :  { %v865_v0 = vadd.f32 1.0, %v6266_v25  ;;  %v6268_v6 = vpop.eup %6267 }
 0x261   :  { %6271 = vrcp.f32 %v859_v44  ;;  %v6270_v27 = vpop.eup %6269  ;;  %v872_v49 = vadd.f32 1.0, %v6268_v6 }
 0x262   :  { %6273 = vrcp.f32 %v865_v0  ;;  %v7936_v0 = vmov 0.0  }
 0x263   :  { %6275 = vrcp.f32 %v872_v49 }
 0x26b   :  { %v6272_v42 = vpop.eup %6271 }
 0x26c   :  { %v6274_v32 = vpop.eup %6273  ;;  %v876_v36 = vmul.f32 %v6272_v42, %v6270_v27 }
 0x26d   :  { %v875_v51 = vmul.f32 %v6274_v32, %v6905_v54  ;;  %v6276_v38 = vpop.eup %6275 }
 0x26f   :  { %v6984_v43 = vadd.f32 %v876_v36, %v875_v51 }
 0x271   :  { %6277 = vtanh.f32 %v6984_v43 }
 0x27b   :  { %v6278_v23 = vpop.eup %6277 }
 0x27c   :  { %v6987_v58 = vmul.f32 %v6278_v23, %v6276_v38  ;;  %v1370_v38 = vld [vmem:[#allocation6 + $0x38] sm:$0xff] }
 0x27e   :  { %1014 = vmatmul.mubr.f32.vlgmr.msra.gmra.mrb[4].mxu0 %v6987_v58  ;;  %1085 = vmatmul.mubr.f32.vlgmr.msra.gmra.mrb[20].mxu1 %v6987_v58 }
 0x27f   :  { %5189 = vmatpush1.bf16.msra.mxu0 %v6932_v35  ;;  %5221 = vmatpush1.bf16.msra.mxu1 %v6772_v20  ;;  %v1182_v20 = vld [vmem:[#allocation6 + $0x1d0] sm:$0xff] }
 0x280   :  { %5191 = vmatprep.subr.bf16.mxu0 %v6936_v52  ;;  %5223 = vmatprep.subr.bf16.mxu1 %v6775_v45  ;;  %v1186_v45 = vld [vmem:[#allocation6 + $0x1f0] sm:$0xff] }
 0x281   :  { %1252 = vmatprep.mubr.f32.mxu0 %v7936_v0  ;;  %1323 = vmatprep.mubr.f32.mxu1 %v7936_v0 }
 0x283   :  { %5193 = vmatpush1.bf16.msra.mxu0 %v6938_v31  ;;  %5225 = vmatpush1.bf16.msra.mxu1 %v6781_v29  ;;  %v7023_v29 = vpack.c.bf16 %v1186_v45, %v1182_v20  ;;  %v1365_v20 = vld [vmem:[#allocation6 + $0x10] sm:$0xff] }
 0x284   :  { %5195 = vmatprep.subr.bf16.mxu0 %v6942_v33  ;;  %5227 = vmatprep.subr.bf16.mxu1 %v6784_v34  ;;  %v1369_v45 = vld [vmem:[#allocation6 + $0x30] sm:$0xff] }
 0x287   :  { %5197 = vmatpush1.bf16.msra.mxu0 %v6944_v1  ;;  %5229 = vmatpush1.bf16.msra.mxu1 %v6789_v41 }
 0x288   :  { %5199 = vmatprep.subr.bf16.mxu0 %v6948_v46  ;;  %5231 = vmatprep.subr.bf16.mxu1 %v6792_v48 }
 0x28b   :  { %5201 = vmatpush1.bf16.msra.mxu0 %v6950_v24  ;;  %5233 = vmatpush1.bf16.msra.mxu1 %v6797_v56 }
 0x28c   :  { %5203 = vmatprep.subr.bf16.mxu0 %v6954_v3  ;;  %5235 = vmatprep.subr.bf16.mxu1 %v6800_v62 }
 0x28f   :  { %5205 = vmatpush1.bf16.msra.mxu0 %v6956_v16  ;;  %5237 = vmatpush1.bf16.msra.mxu1 %v6805_v9 }
 0x290   :  { %5207 = vmatprep.subr.bf16.mxu0 %v6960_v21  ;;  %5239 = vmatprep.subr.bf16.mxu1 %v6808_v5 }
 0x293   :  { %5209 = vmatpush1.bf16.msra.mxu0 %v6962_v37  ;;  %5241 = vmatpush1.bf16.msra.mxu1 %v6813_v22 }
 0x294   :  { %5211 = vmatprep.subr.bf16.mxu0 %v6964_v40  ;;  %5243 = vmatprep.subr.bf16.mxu1 %v6816_v11 }
 0x297   :  { %5213 = vmatpush1.bf16.msra.mxu0 %v6968_v60  ;;  %5245 = vmatpush1.bf16.msra.mxu1 %v6821_v26 }
 0x298   :  { %5215 = vmatprep.subr.bf16.mxu0 %v6971_v13  ;;  %5247 = vmatprep.subr.bf16.mxu1 %v6824_v17 }
 0x29b   :  { %5217 = vmatpush1.bf16.msra.mxu0 %v6974_v30  ;;  %5249 = vmatpush1.bf16.msra.mxu1 %v7023_v29 }
 0x29c   :  { %5251 = vmatprep.subr.bf16.mxu0 %v6930_v8 }
 0x351   :  { %v1015_v34 = vpop.f32.mrb[4].mxu0  ;;  %v1086_v41 = vpop.f32.mrb[20].mxu1 }
 0x352   :  { %v1091_v48 = vadd.f32 %v1015_v34, %v6869_v15  ;;  %v1017_v56 = vpop.f32.mrb[5].mxu0  ;;  %v1088_v62 = vpop.f32.mrb[21].mxu1  ;;  %v6150_v17 = vadd.f32 %v1086_v41, %v6897_v57  ;;  %v7058_v34 = vpack.c.bf16 %v1369_v45, %v1365_v20  ;;  %v1374_v41 = vld [vmem:[#allocation6 + $0x58] sm:$0xff]  ;;  %v1405_v20 = vld [vmem:[#allocation6 + $0x150] sm:$0xff] }
 0x353   :  { %v1092_v9 = vadd.f32 %v1017_v56, %v6871_v47  ;;  %v6151_v11 = vadd.f32 %v1088_v62, %v6901_v28  ;;  %v1373_v62 = vld [vmem:[#allocation6 + $0x50] sm:$0xff] }
 0x354   :  { %v4818_v5 = vmul.f32 -1.442695, %v1091_v48  ;;  %v1378_v48 = vld [vmem:[#allocation6 + $0x78] sm:$0xff] }
 0x355   :  { %v4819_v22 = vmul.f32 -1.442695, %v1092_v9  ;;  %v4820_v26 = vmul.f32 -1.442695, %v6151_v11  ;;  %v7062_v56 = vpack.c.bf16 %v1378_v48, %v1374_v41  ;;  %v1377_v9 = vld [vmem:[#allocation6 + $0x70] sm:$0xff]  ;;  %v1414_v48 = vld [vmem:[#allocation6 + $0x198] sm:$0xff] }
 0x356   :  { %6279 = vpow2.f32 %v4818_v5  ;;  %v7064_v5 = vpack.c.bf16 %v1377_v9, %v1373_v62  ;;  %v1409_v41 = vld [vmem:[#allocation6 + $0x170] sm:$0xff]  ;;  %v1418_v62 = vld [vmem:[#allocation6 + $0x1b8] sm:$0xff] }
 0x357   :  { %6281 = vpow2.f32 %v4819_v22  ;;  %v1386_v22 = vld [vmem:[#allocation6 + $0xb8] sm:$0xff]  ;;  %v7088_v9 = vpack.c.bf16 %v1409_v41, %v1405_v20 }
 0x358   :  { %6283 = vpow2.f32 %v4820_v26  ;;  %v1381_v26 = vld [vmem:[#allocation6 + $0x90] sm:$0xff] }
 0x359   :  { %6285 = vtanh.f32 %v6150_v17  ;;  %v1385_v17 = vld [vmem:[#allocation6 + $0xb0] sm:$0xff] }
 0x360   :  { %v6280_v44 = vpop.eup %6279 }
 0x361   :  { %v6282_v25 = vpop.eup %6281  ;;  %v1098_v18 = vadd.f32 1.0, %v6280_v44  ;;  %v7070_v44 = vpack.c.bf16 %v1385_v17, %v1381_v26  ;;  %v1417_v26 = vld [vmem:[#allocation6 + $0x1b0] sm:$0xff]  ;;  %v1422_v17 = vld [vmem:[#allocation6 + $0x1d8] sm:$0xff] }
 0x362   :  { %v1104_v54 = vadd.f32 1.0, %v6282_v25  ;;  %v6284_v15 = vpop.eup %6283  ;;  %v1390_v25 = vld [vmem:[#allocation6 + $0xd8] sm:$0xff] }
 0x363   :  { %6287 = vrcp.f32 %v1098_v18  ;;  %v6286_v12 = vpop.eup %6285  ;;  %v1111_v27 = vadd.f32 1.0, %v6284_v15  ;;  %v1394_v18 = vld [vmem:[#allocation6 + $0xf8] sm:$0xff]  ;;  %v1389_v15 = vld [vmem:[#allocation6 + $0xd0] sm:$0xff] }
 0x364   :  { %6289 = vrcp.f32 %v1104_v54  ;;  %v7074_v54 = vpack.c.bf16 %v1394_v18, %v1390_v25  ;;  %v1426_v25 = vld [vmem:[#allocation6 + $0x1f8] sm:$0xff] }
 0x365   :  { %6291 = vrcp.f32 %v1111_v27 }
 0x36d   :  { %v6288_v47 = vpop.eup %6287 }
 0x36e   :  { %v6290_v19 = vpop.eup %6289  ;;  %v1115_v6 = vmul.f32 %v6288_v47, %v6286_v12  ;;  %v1393_v12 = vld [vmem:[#allocation6 + $0xf0] sm:$0xff] }
 0x36f   :  { %v1114_v42 = vmul.f32 %v6290_v19, %v6984_v43  ;;  %v6292_v36 = vpop.eup %6291  ;;  %v1366_v43 = vld [vmem:[#allocation6 + $0x18] sm:$0xff]  ;;  %v7076_v47 = vpack.c.bf16 %v1393_v12, %v1389_v15  ;;  %v7097_v15 = vpack.c.bf16 %v1426_v25, %v1422_v17 }
 0x370   :  { %v7056_v23 = vpack.c.bf16 %v1370_v38, %v1366_v43  ;;  %v1398_v19 = vld [vmem:[#allocation6 + $0x118] sm:$0xff] }
 0x371   :  { %v7031_v32 = vadd.f32 %v1115_v6, %v1114_v42  ;;  %v1402_v6 = vld [vmem:[#allocation6 + $0x138] sm:$0xff]  ;;  %v1397_v42 = vld [vmem:[#allocation6 + $0x110] sm:$0xff] }
 0x372   :  { %5283 = vmatprep.subr.bf16.mxu1 %v7056_v23  ;;  %v7080_v27 = vpack.c.bf16 %v1402_v6, %v1398_v19  ;;  %v1406_v43 = vld [vmem:[#allocation6 + $0x158] sm:$0xff] }
 0x373   :  { %6293 = vtanh.f32 %v7031_v32  ;;  %v1410_v38 = vld [vmem:[#allocation6 + $0x178] sm:$0xff] }
 0x374   :  { %v7086_v45 = vpack.c.bf16 %v1410_v38, %v1406_v43 }
 0x37d   :  { %v6294_v49 = vpop.eup %6293 }
 0x37e   :  { %v7034_v51 = vmul.f32 %v6294_v49, %v6292_v36  ;;  %v1401_v36 = vld [vmem:[#allocation6 + $0x130] sm:$0xff] }
 0x37f   :  { %v7082_v49 = vpack.c.bf16 %v1401_v36, %v1397_v42 }
 0x380   :  { %1253 = vmatmul.mubr.f32.vlgmr.msra.gmra.mrb[6].mxu0 %v7034_v51  ;;  %1324 = vmatmul.mubr.f32.vlgmr.msra.gmra.mrb[22].mxu1 %v7034_v51 }
 0x381   :  { %5253 = vmatpush1.bf16.msra.mxu0 %v6932_v35  ;;  %1491 = vmatprep.mubr.f32.mxu0 %v7936_v0 }
 0x382   :  { %5255 = vmatprep.subr.bf16.mxu0 %v6936_v52  ;;  %1562 = vmatprep.mubr.f32.mxu1 %v7936_v0 }
 0x383   :  { %5285 = vmatpush1.bf16.msra.mxu1 %v7058_v34 }
 0x384   :  { %5287 = vmatprep.subr.bf16.mxu1 %v7062_v56 }
 0x385   :  { %5257 = vmatpush1.bf16.msra.mxu0 %v6938_v31 }
 0x386   :  { %5259 = vmatprep.subr.bf16.mxu0 %v6942_v33 }
 0x387   :  { %5289 = vmatpush1.bf16.msra.mxu1 %v7064_v5 }
 0x389   :  { %5261 = vmatpush1.bf16.msra.mxu0 %v6944_v1 }
 0x38a   :  { %5263 = vmatprep.subr.bf16.mxu0 %v6948_v46 }
 0x38d   :  { %5265 = vmatpush1.bf16.msra.mxu0 %v6950_v24 }
 0x38e   :  { %5267 = vmatprep.subr.bf16.mxu0 %v6954_v3 }
 0x391   :  { %5269 = vmatpush1.bf16.msra.mxu0 %v6956_v16 }
 0x392   :  { %5271 = vmatprep.subr.bf16.mxu0 %v6960_v21 }
 0x395   :  { %5273 = vmatpush1.bf16.msra.mxu0 %v6962_v37 }
 0x396   :  { %5275 = vmatprep.subr.bf16.mxu0 %v6964_v40 }
 0x399   :  { %5277 = vmatpush1.bf16.msra.mxu0 %v6968_v60 }
 0x39a   :  { %5279 = vmatprep.subr.bf16.mxu0 %v6971_v13 }
 0x39d   :  { %5281 = vmatpush1.bf16.msra.mxu0 %v6974_v30 }
 0x39e   :  { %5315 = vmatprep.subr.bf16.mxu0 %v6930_v8  ;;  %v1382_v8 = vld [vmem:[#allocation6 + $0x98] sm:$0xff] }
 0x39f   :  { %v7068_v11 = vpack.c.bf16 %v1386_v22, %v1382_v8  ;;  %v7090_v8 = vpack.c.bf16 %v1418_v62, %v1414_v48  ;;  %v1413_v22 = vld [vmem:[#allocation6 + $0x190] sm:$0xff] }
 0x3a0   :  { %v7094_v18 = vpack.c.bf16 %v1417_v26, %v1413_v22 }
 0x3a1   :  { %5291 = vmatprep.subr.bf16.mxu1 %v7068_v11 }
 0x3a2   :  { %5293 = vmatpush1.bf16.msra.mxu1 %v7070_v44 }
 0x3a3   :  { %5295 = vmatprep.subr.bf16.mxu1 %v7074_v54 }
 0x3a6   :  { %5297 = vmatpush1.bf16.msra.mxu1 %v7076_v47 }
 0x3a7   :  { %5299 = vmatprep.subr.bf16.mxu1 %v7080_v27 }
 0x3aa   :  { %5301 = vmatpush1.bf16.msra.mxu1 %v7082_v49 }
 0x3ab   :  { %5303 = vmatprep.subr.bf16.mxu1 %v7086_v45 }
 0x3ae   :  { %5305 = vmatpush1.bf16.msra.mxu1 %v7088_v9 }
 0x3af   :  { %5307 = vmatprep.subr.bf16.mxu1 %v7090_v8 }
 0x3b2   :  { %5309 = vmatpush1.bf16.msra.mxu1 %v7094_v18 }
 0x3b3   :  { %5311 = vmatprep.subr.bf16.mxu1 %v7097_v15 }
 0x3b6   :  { %5313 = vmatpush1.bf16.msra.mxu1 %v7023_v29 }
 0x3b7   :  { %5347 = vmatprep.subr.bf16.mxu1 %v7056_v23 }
 0x453   :  { %v1254_v12 = vpop.f32.mrb[6].mxu0  ;;  %v1325_v19 = vpop.f32.mrb[22].mxu1 }
 0x454   :  { %v1330_v6 = vadd.f32 %v1254_v12, %v6873_v50  ;;  %v1256_v42 = vpop.f32.mrb[7].mxu0  ;;  %v1327_v36 = vpop.f32.mrb[23].mxu1  ;;  %v6152_v62 = vadd.f32 %v1325_v19, %v6897_v57 }
 0x455   :  { %v1331_v43 = vadd.f32 %v1256_v42, %v6875_v53  ;;  %v6153_v41 = vadd.f32 %v1327_v36, %v6901_v28 }
 0x456   :  { %v4821_v38 = vmul.f32 -1.442695, %v1330_v6 }
 0x457   :  { %v4822_v20 = vmul.f32 -1.442695, %v1331_v43  ;;  %v4823_v48 = vmul.f32 -1.442695, %v6153_v41 }
 0x458   :  { %6295 = vpow2.f32 %v4821_v38 }
 0x459   :  { %6297 = vpow2.f32 %v4822_v20 }
 0x45a   :  { %6299 = vpow2.f32 %v4823_v48 }
 0x45b   :  { %6301 = vtanh.f32 %v6152_v62 }
 0x462   :  { %v6296_v22 = vpop.eup %6295 }
 0x463   :  { %v6298_v26 = vpop.eup %6297  ;;  %v1337_v17 = vadd.f32 1.0, %v6296_v22 }
 0x464   :  { %v1343_v25 = vadd.f32 1.0, %v6298_v26  ;;  %v6300_v50 = vpop.eup %6299 }
 0x465   :  { %6303 = vrcp.f32 %v1337_v17  ;;  %v6302_v12 = vpop.eup %6301  ;;  %v1350_v43 = vadd.f32 1.0, %v6300_v50 }
 0x466   :  { %6305 = vrcp.f32 %v1343_v25 }
 0x467   :  { %6307 = vrcp.f32 %v1350_v43  ;;  %v1841_v43 = vld [vmem:[#allocation6] sm:$0xff] }
 0x46f   :  { %v6304_v53 = vpop.eup %6303 }
 0x470   :  { %v6306_v6 = vpop.eup %6305  ;;  %v1354_v42 = vmul.f32 %v6304_v53, %v6302_v12  ;;  %v1842_v53 = vld [vmem:[#allocation6 + $0x8] sm:$0xff] }
 0x471   :  { %v1353_v38 = vmul.f32 %v6306_v6, %v7031_v32  ;;  %v6308_v19 = vpop.eup %6307  ;;  %v1846_v6 = vld [vmem:[#allocation6 + $0x28] sm:$0xff] }
 0x473   :  { %v7108_v36 = vadd.f32 %v1354_v42, %v1353_v38  ;;  %v5378_v42 = vpack.c.bf16 %v1846_v6, %v1842_v53  ;;  %v1845_v38 = vld [vmem:[#allocation6 + $0x20] sm:$0xff]  ;;  %v1890_v6 = vld [vmem:[#allocation6 + $0x188] sm:$0xff] }
 0x474   :  { %v1885_v53 = vld [vmem:[#allocation6 + $0x160] sm:$0xff] }
 0x475   :  { %6309 = vtanh.f32 %v7108_v36 }
 0x47f   :  { %v6310_v20 = vpop.eup %6309 }
 0x480   :  { %v7111_v41 = vmul.f32 %v6310_v20, %v6308_v19  ;;  %v1850_v19 = vld [vmem:[#allocation6 + $0x48] sm:$0xff] }
 0x481   :  { %v1854_v20 = vld [vmem:[#allocation6 + $0x68] sm:$0xff] }
 0x482   :  { %1492 = vmatmul.mubr.f32.vlgmr.msra.gmra.mrb[8].mxu0 %v7111_v41  ;;  %1563 = vmatmul.mubr.f32.vlgmr.msra.gmra.mrb[24].mxu1 %v7111_v41 }
 0x483   :  { %5317 = vmatpush1.bf16.msra.mxu0 %v6932_v35  ;;  %5349 = vmatpush1.bf16.msra.mxu1 %v7058_v34 }
 0x484   :  { %5319 = vmatprep.subr.bf16.mxu0 %v6936_v52  ;;  %5351 = vmatprep.subr.bf16.mxu1 %v7062_v56 }
 0x485   :  { %1730 = vmatprep.mubr.f32.mxu0 %v7936_v0  ;;  %1801 = vmatprep.mubr.f32.mxu1 %v7936_v0 }
 0x487   :  { %5321 = vmatpush1.bf16.msra.mxu0 %v6938_v31  ;;  %5353 = vmatpush1.bf16.msra.mxu1 %v7064_v5 }
 0x488   :  { %5323 = vmatprep.subr.bf16.mxu0 %v6942_v33  ;;  %5355 = vmatprep.subr.bf16.mxu1 %v7068_v11 }
 0x48b   :  { %5325 = vmatpush1.bf16.msra.mxu0 %v6944_v1  ;;  %5357 = vmatpush1.bf16.msra.mxu1 %v7070_v44 }
 0x48c   :  { %5327 = vmatprep.subr.bf16.mxu0 %v6948_v46  ;;  %5359 = vmatprep.subr.bf16.mxu1 %v7074_v54 }
 0x48f   :  { %5329 = vmatpush1.bf16.msra.mxu0 %v6950_v24  ;;  %5361 = vmatpush1.bf16.msra.mxu1 %v7076_v47 }
 0x490   :  { %5331 = vmatprep.subr.bf16.mxu0 %v6954_v3  ;;  %5363 = vmatprep.subr.bf16.mxu1 %v7080_v27 }
 0x493   :  { %5333 = vmatpush1.bf16.msra.mxu0 %v6956_v16  ;;  %5365 = vmatpush1.bf16.msra.mxu1 %v7082_v49 }
 0x494   :  { %5335 = vmatprep.subr.bf16.mxu0 %v6960_v21  ;;  %5367 = vmatprep.subr.bf16.mxu1 %v7086_v45 }
 0x497   :  { %5337 = vmatpush1.bf16.msra.mxu0 %v6962_v37  ;;  %5369 = vmatpush1.bf16.msra.mxu1 %v7088_v9 }
 0x498   :  { %5339 = vmatprep.subr.bf16.mxu0 %v6964_v40  ;;  %5371 = vmatprep.subr.bf16.mxu1 %v7090_v8 }
 0x49b   :  { %5341 = vmatpush1.bf16.msra.mxu0 %v6968_v60  ;;  %5373 = vmatpush1.bf16.msra.mxu1 %v7094_v18 }
 0x49c   :  { %5343 = vmatprep.subr.bf16.mxu0 %v6971_v13  ;;  %5375 = vmatprep.subr.bf16.mxu1 %v7097_v15 }
 0x49f   :  { %5345 = vmatpush1.bf16.msra.mxu0 %v6974_v30  ;;  %5377 = vmatpush1.bf16.msra.mxu1 %v7023_v29 }
 0x4a0   :  { %5411 = vmatprep.subr.bf16.mxu1 %v7056_v23  ;;  %5379 = vmatprep.subr.bf16.mxu0 %v5378_v42 }
 0x555   :  { %v1493_v35 = vpop.f32.mrb[8].mxu0  ;;  %v1564_v52 = vpop.f32.mrb[24].mxu1 }
 0x556   :  { %v1569_v31 = vadd.f32 %v1493_v35, %v6877_v55  ;;  %v1495_v33 = vpop.f32.mrb[9].mxu0  ;;  %v1566_v1 = vpop.f32.mrb[25].mxu1  ;;  %v6154_v37 = vadd.f32 %v1564_v52, %v6897_v57  ;;  %v7181_v35 = vpack.c.bf16 %v1854_v20, %v1850_v19  ;;  %v1849_v52 = vld [vmem:[#allocation6 + $0x40] sm:$0xff] }
 0x557   :  { %v1570_v46 = vadd.f32 %v1495_v33, %v6879_v59  ;;  %v6155_v16 = vadd.f32 %v1566_v1, %v6901_v28  ;;  %v1889_v20 = vld [vmem:[#allocation6 + $0x180] sm:$0xff] }
 0x558   :  { %v4824_v24 = vmul.f32 -1.442695, %v1569_v31  ;;  %v1853_v31 = vld [vmem:[#allocation6 + $0x60] sm:$0xff] }
 0x559   :  { %v4825_v3 = vmul.f32 -1.442695, %v1570_v46  ;;  %v4826_v21 = vmul.f32 -1.442695, %v6155_v16  ;;  %v7183_v33 = vpack.c.bf16 %v1853_v31, %v1849_v52  ;;  %v1857_v46 = vld [vmem:[#allocation6 + $0x80] sm:$0xff]  ;;  %v1866_v16 = vld [vmem:[#allocation6 + $0xc8] sm:$0xff] }
 0x55a   :  { %6311 = vpow2.f32 %v4824_v24  ;;  %v1861_v24 = vld [vmem:[#allocation6 + $0xa0] sm:$0xff]  ;;  %v1898_v31 = vld [vmem:[#allocation6 + $0x1c8] sm:$0xff] }
 0x55b   :  { %6313 = vpow2.f32 %v4825_v3  ;;  %v7189_v3 = vpack.c.bf16 %v1861_v24, %v1857_v46  ;;  %v1893_v52 = vld [vmem:[#allocation6 + $0x1a0] sm:$0xff] }
 0x55c   :  { %6315 = vpow2.f32 %v4826_v21  ;;  %v1870_v21 = vld [vmem:[#allocation6 + $0xe8] sm:$0xff]  ;;  %v1897_v24 = vld [vmem:[#allocation6 + $0x1c0] sm:$0xff] }
 0x55d   :  { %6317 = vtanh.f32 %v6154_v37  ;;  %v7193_v37 = vpack.c.bf16 %v1870_v21, %v1866_v16  ;;  %v1901_v16 = vld [vmem:[#allocation6 + $0x1e0] sm:$0xff] }
 0x55e   :  { %v7219_v21 = vpack.c.bf16 %v1901_v16, %v1897_v24 }
 0x564   :  { %v6312_v40 = vpop.eup %6311 }
 0x565   :  { %v6314_v60 = vpop.eup %6313  ;;  %v1576_v13 = vadd.f32 1.0, %v6312_v40  ;;  %v1865_v40 = vld [vmem:[#allocation6 + $0xc0] sm:$0xff] }
 0x566   :  { %v1582_v30 = vadd.f32 1.0, %v6314_v60  ;;  %v6316_v55 = vpop.eup %6315  ;;  %v1869_v60 = vld [vmem:[#allocation6 + $0xe0] sm:$0xff] }
 0x567   :  { %6319 = vrcp.f32 %v1576_v13  ;;  %v6318_v32 = vpop.eup %6317  ;;  %v1589_v22 = vadd.f32 1.0, %v6316_v55  ;;  %v7195_v13 = vpack.c.bf16 %v1869_v60, %v1865_v40  ;;  %v1878_v55 = vld [vmem:[#allocation6 + $0x128] sm:$0xff] }
 0x568   :  { %6321 = vrcp.f32 %v1582_v30  ;;  %v1874_v30 = vld [vmem:[#allocation6 + $0x108] sm:$0xff] }
 0x569   :  { %6323 = vrcp.f32 %v1589_v22  ;;  %v1882_v22 = vld [vmem:[#allocation6 + $0x148] sm:$0xff] }
 0x571   :  { %v6320_v59 = vpop.eup %6319 }
 0x572   :  { %v6322_v48 = vpop.eup %6321  ;;  %v1593_v62 = vmul.f32 %v6320_v59, %v6318_v32  ;;  %v7199_v32 = vpack.c.bf16 %v1878_v55, %v1874_v30  ;;  %v1873_v59 = vld [vmem:[#allocation6 + $0x100] sm:$0xff] }
 0x573   :  { %v1592_v26 = vmul.f32 %v6322_v48, %v7108_v36  ;;  %v6324_v25 = vpop.eup %6323  ;;  %v7178_v36 = vpack.c.bf16 %v1845_v38, %v1841_v43  ;;  %v1877_v48 = vld [vmem:[#allocation6 + $0x120] sm:$0xff]  ;;  %v1894_v43 = vld [vmem:[#allocation6 + $0x1a8] sm:$0xff] }
 0x574   :  { %v7209_v19 = vpack.c.bf16 %v1894_v43, %v1890_v6 }
 0x575   :  { %v7153_v17 = vadd.f32 %v1593_v62, %v1592_v26  ;;  %v7201_v62 = vpack.c.bf16 %v1877_v48, %v1873_v59  ;;  %v1886_v26 = vld [vmem:[#allocation6 + $0x168] sm:$0xff] }
 0x577   :  { %6325 = vtanh.f32 %v7153_v17 }
 0x581   :  { %v6326_v50 = vpop.eup %6325 }
 0x582   :  { %v7156_v12 = vmul.f32 %v6326_v50, %v6324_v25  ;;  %v1881_v25 = vld [vmem:[#allocation6 + $0x140] sm:$0xff]  ;;  %v7205_v50 = vpack.c.bf16 %v1886_v26, %v1882_v22 }
 0x583   :  { %v7207_v38 = vpack.c.bf16 %v1885_v53, %v1881_v25 }
 0x584   :  { %1731 = vmatmul.mubr.f32.vlgmr.msra.gmra.mrb[10].mxu0 %v7156_v12  ;;  %1802 = vmatmul.mubr.f32.vlgmr.msra.gmra.mrb[26].mxu1 %v7156_v12 }
 0x585   :  { %5413 = vmatpush1.bf16.msra.mxu1 %v7058_v34  ;;  %1969 = vmatprep.mubr.f32.mxu0 %v7936_v0 }
 0x586   :  { %5415 = vmatprep.subr.bf16.mxu1 %v7062_v56  ;;  %2040 = vmatprep.mubr.f32.mxu1 %v7936_v0 }
 0x587   :  { %5381 = vmatpush1.bf16.msra.mxu0 %v7178_v36 }
 0x588   :  { %5383 = vmatprep.subr.bf16.mxu0 %v7181_v35 }
 0x589   :  { %5417 = vmatpush1.bf16.msra.mxu1 %v7064_v5 }
 0x58a   :  { %5419 = vmatprep.subr.bf16.mxu1 %v7068_v11 }
 0x58b   :  { %5385 = vmatpush1.bf16.msra.mxu0 %v7183_v33 }
 0x58d   :  { %5421 = vmatpush1.bf16.msra.mxu1 %v7070_v44 }
 0x58e   :  { %5423 = vmatprep.subr.bf16.mxu1 %v7074_v54 }
 0x591   :  { %5425 = vmatpush1.bf16.msra.mxu1 %v7076_v47 }
 0x592   :  { %5427 = vmatprep.subr.bf16.mxu1 %v7080_v27 }
 0x595   :  { %5429 = vmatpush1.bf16.msra.mxu1 %v7082_v49 }
 0x596   :  { %5431 = vmatprep.subr.bf16.mxu1 %v7086_v45 }
 0x599   :  { %5433 = vmatpush1.bf16.msra.mxu1 %v7088_v9 }
 0x59a   :  { %5435 = vmatprep.subr.bf16.mxu1 %v7090_v8 }
 0x59d   :  { %5437 = vmatpush1.bf16.msra.mxu1 %v7094_v18 }
 0x59e   :  { %5439 = vmatprep.subr.bf16.mxu1 %v7097_v15 }
 0x5a1   :  { %5441 = vmatpush1.bf16.msra.mxu1 %v7023_v29  ;;  %v1858_v29 = vld [vmem:[#allocation6 + $0x88] sm:$0xff] }
 0x5a2   :  { %5475 = vmatprep.subr.bf16.mxu1 %v7056_v23  ;;  %v1862_v23 = vld [vmem:[#allocation6 + $0xa8] sm:$0xff] }
 0x5a3   :  { %v7187_v1 = vpack.c.bf16 %v1862_v23, %v1858_v29  ;;  %v1902_v29 = vld [vmem:[#allocation6 + $0x1e8] sm:$0xff]  ;;  %v7213_v23 = vpack.c.bf16 %v1893_v52, %v1889_v20 }
 0x5a4   :  { %v7216_v46 = vpack.c.bf16 %v1902_v29, %v1898_v31 }
 0x5a5   :  { %5387 = vmatprep.subr.bf16.mxu0 %v7187_v1 }
 0x5a6   :  { %5389 = vmatpush1.bf16.msra.mxu0 %v7189_v3 }
 0x5a7   :  { %5391 = vmatprep.subr.bf16.mxu0 %v7193_v37 }
 0x5aa   :  { %5393 = vmatpush1.bf16.msra.mxu0 %v7195_v13 }
 0x5ab   :  { %5395 = vmatprep.subr.bf16.mxu0 %v7199_v32 }
 0x5ae   :  { %5397 = vmatpush1.bf16.msra.mxu0 %v7201_v62 }
 0x5af   :  { %5399 = vmatprep.subr.bf16.mxu0 %v7205_v50 }
 0x5b2   :  { %5401 = vmatpush1.bf16.msra.mxu0 %v7207_v38 }
 0x5b3   :  { %5403 = vmatprep.subr.bf16.mxu0 %v7209_v19 }
 0x5b6   :  { %5405 = vmatpush1.bf16.msra.mxu0 %v7213_v23 }
 0x5b7   :  { %5407 = vmatprep.subr.bf16.mxu0 %v7216_v46 }
 0x5ba   :  { %5409 = vmatpush1.bf16.msra.mxu0 %v7219_v21 }
 0x5bb   :  { %5443 = vmatprep.subr.bf16.mxu0 %v5378_v42 }
 0x657   :  { %v1732_v40 = vpop.f32.mrb[10].mxu0  ;;  %v1803_v60 = vpop.f32.mrb[26].mxu1 }
 0x658   :  { %v1808_v30 = vadd.f32 %v1732_v40, %v6881_v61  ;;  %v1734_v55 = vpop.f32.mrb[11].mxu0  ;;  %v1805_v59 = vpop.f32.mrb[27].mxu1  ;;  %v6156_v6 = vadd.f32 %v1803_v60, %v6897_v57 }
 0x659   :  { %v1809_v48 = vadd.f32 %v1734_v55, %v6883_v2  ;;  %v6157_v25 = vadd.f32 %v1805_v59, %v6901_v28 }
 0x65a   :  { %v4827_v22 = vmul.f32 -1.442695, %v1808_v30 }
 0x65b   :  { %v4828_v26 = vmul.f32 -1.442695, %v1809_v48  ;;  %v4829_v53 = vmul.f32 -1.442695, %v6157_v25  ;;  %v2324_v48 = vld [vmem:[#allocation4 + $0x200] sm:$0xff]  ;;  %v2330_v25 = vld [vmem:[#allocation4 + $0x230] sm:$0xff] }
 0x65c   :  { %6327 = vpow2.f32 %v4827_v22  ;;  %v2328_v22 = vld [vmem:[#allocation4 + $0x220] sm:$0xff] }
 0x65d   :  { %6329 = vpow2.f32 %v4828_v26  ;;  %v2326_v26 = vld [vmem:[#allocation4 + $0x210] sm:$0xff] }
 0x65e   :  { %6331 = vpow2.f32 %v4829_v53  ;;  %v2333_v53 = vld [vmem:[#allocation4 + $0x248] sm:$0xff] }
 0x65f   :  { %6333 = vtanh.f32 %v6156_v6  ;;  %v2337_v6 = vld [vmem:[#allocation4 + $0x268] sm:$0xff] }
 0x666   :  { %v6328_v43 = vpop.eup %6327 }
 0x667   :  { %v6330_v20 = vpop.eup %6329  ;;  %v1815_v42 = vadd.f32 1.0, %v6328_v43  ;;  %v2335_v43 = vld [vmem:[#allocation4 + $0x258] sm:$0xff] }
 0x668   :  { %v1821_v52 = vadd.f32 1.0, %v6330_v20  ;;  %v6332_v61 = vpop.eup %6331  ;;  %v2339_v20 = vld [vmem:[#allocation4 + $0x278] sm:$0xff] }
 0x669   :  { %6335 = vrcp.f32 %v1815_v42  ;;  %v6334_v31 = vpop.eup %6333  ;;  %v1828_v16 = vadd.f32 1.0, %v6332_v61  ;;  %v5508_v61 = vpack.c.bf16 %v2328_v22, %v2324_v48 }
 0x66a   :  { %6337 = vrcp.f32 %v1821_v52 }
 0x66b   :  { %6339 = vrcp.f32 %v1828_v16  ;;  %v5510_v16 = vpack.c.bf16 %v2337_v6, %v2333_v53  ;;  %v2365_v53 = vld [vmem:[#allocation4 + $0x348] sm:$0xff] }
 0x66c   :  { %v2369_v6 = vld [vmem:[#allocation4 + $0x368] sm:$0xff] }
 0x673   :  { %v6336_v2 = vpop.eup %6335 }
 0x674   :  { %v6338_v29 = vpop.eup %6337  ;;  %v1832_v24 = vmul.f32 %v6336_v2, %v6334_v31  ;;  %v5540_v31 = vpack.c.bf16 %v2330_v25, %v2326_v26  ;;  %v2332_v2 = vld [vmem:[#allocation4 + $0x240] sm:$0xff]  ;;  %v2358_v26 = vld [vmem:[#allocation4 + $0x310] sm:$0xff] }
 0x675   :  { %v1831_v40 = vmul.f32 %v6338_v29, %v7153_v17  ;;  %v6340_v60 = vpop.eup %6339  ;;  %v2336_v29 = vld [vmem:[#allocation4 + $0x260] sm:$0xff]  ;;  %v2362_v25 = vld [vmem:[#allocation4 + $0x330] sm:$0xff] }
 0x677   :  { %v7228_v30 = vadd.f32 %v1832_v24, %v1831_v40  ;;  %v5542_v40 = vpack.c.bf16 %v2339_v20, %v2335_v43  ;;  %v2367_v43 = vld [vmem:[#allocation4 + $0x358] sm:$0xff] }
 0x678   :  { %v2371_v20 = vld [vmem:[#allocation4 + $0x378] sm:$0xff] }
 0x679   :  { %6341 = vtanh.f32 %v7228_v30 }
 0x683   :  { %v6342_v55 = vpop.eup %6341 }
 0x684   :  { %v7231_v59 = vmul.f32 %v6342_v55, %v6340_v60  ;;  %v2338_v60 = vld [vmem:[#allocation4 + $0x270] sm:$0xff]  ;;  %v2341_v55 = vld [vmem:[#allocation4 + $0x288] sm:$0xff] }
 0x686   :  { %1970 = vmatmul.mubr.f32.vlgmr.msra.gmra.mrb[12].mxu0 %v7231_v59  ;;  %2041 = vmatmul.mubr.f32.vlgmr.msra.gmra.mrb[28].mxu1 %v7231_v59 }
 0x687   :  { %5445 = vmatpush1.bf16.msra.mxu0 %v7178_v36  ;;  %5477 = vmatpush1.bf16.msra.mxu1 %v7058_v34  ;;  %v2138_v34 = vld [vmem:[#allocation6 + $0x1d0] sm:$0xff] }
 0x688   :  { %5447 = vmatprep.subr.bf16.mxu0 %v7181_v35  ;;  %5479 = vmatprep.subr.bf16.mxu1 %v7062_v56  ;;  %v2142_v56 = vld [vmem:[#allocation6 + $0x1f0] sm:$0xff] }
 0x689   :  { %2208 = vmatprep.mubr.f32.mxu0 %v7936_v0  ;;  %2279 = vmatprep.mubr.f32.mxu1 %v7936_v0 }
 0x68b   :  { %5449 = vmatpush1.bf16.msra.mxu0 %v7183_v33  ;;  %5481 = vmatpush1.bf16.msra.mxu1 %v7064_v5  ;;  %v2325_v5 = vld [vmem:[#allocation4 + $0x208] sm:$0xff] }
 0x68c   :  { %5451 = vmatprep.subr.bf16.mxu0 %v7187_v1  ;;  %5483 = vmatprep.subr.bf16.mxu1 %v7068_v11  ;;  %v5504_v11 = vpack.c.bf16 %v2142_v56, %v2138_v34  ;;  %v2345_v34 = vld [vmem:[#allocation4 + $0x2a8] sm:$0xff]  ;;  %v2343_v56 = vld [vmem:[#allocation4 + $0x298] sm:$0xff] }
 0x68f   :  { %5453 = vmatpush1.bf16.msra.mxu0 %v7189_v3  ;;  %5485 = vmatpush1.bf16.msra.mxu1 %v7070_v44  ;;  %v2329_v44 = vld [vmem:[#allocation4 + $0x228] sm:$0xff] }
 0x690   :  { %5455 = vmatprep.subr.bf16.mxu0 %v7193_v37  ;;  %5487 = vmatprep.subr.bf16.mxu1 %v7074_v54  ;;  %v2327_v54 = vld [vmem:[#allocation4 + $0x218] sm:$0xff] }
 0x693   :  { %5457 = vmatpush1.bf16.msra.mxu0 %v7195_v13  ;;  %5489 = vmatpush1.bf16.msra.mxu1 %v7076_v47  ;;  %v2331_v47 = vld [vmem:[#allocation4 + $0x238] sm:$0xff] }
 0x694   :  { %5459 = vmatprep.subr.bf16.mxu0 %v7199_v32  ;;  %5491 = vmatprep.subr.bf16.mxu1 %v7080_v27  ;;  %v5506_v27 = vpack.c.bf16 %v2329_v44, %v2325_v5  ;;  %v2347_v5 = vld [vmem:[#allocation4 + $0x2b8] sm:$0xff] }
 0x697   :  { %5461 = vmatpush1.bf16.msra.mxu0 %v7201_v62  ;;  %5493 = vmatpush1.bf16.msra.mxu1 %v7082_v49  ;;  %v5538_v49 = vpack.c.bf16 %v2331_v47, %v2327_v54  ;;  %v2340_v54 = vld [vmem:[#allocation4 + $0x280] sm:$0xff] }
 0x698   :  { %5463 = vmatprep.subr.bf16.mxu0 %v7205_v50  ;;  %5495 = vmatprep.subr.bf16.mxu1 %v7086_v45  ;;  %v2344_v47 = vld [vmem:[#allocation4 + $0x2a0] sm:$0xff] }
 0x69b   :  { %5465 = vmatpush1.bf16.msra.mxu0 %v7207_v38  ;;  %5497 = vmatpush1.bf16.msra.mxu1 %v7088_v9 }
 0x69c   :  { %5467 = vmatprep.subr.bf16.mxu0 %v7209_v19  ;;  %5499 = vmatprep.subr.bf16.mxu1 %v7090_v8 }
 0x69f   :  { %5469 = vmatpush1.bf16.msra.mxu0 %v7213_v23  ;;  %5501 = vmatpush1.bf16.msra.mxu1 %v7094_v18 }
 0x6a0   :  { %5471 = vmatprep.subr.bf16.mxu0 %v7216_v46  ;;  %5503 = vmatprep.subr.bf16.mxu1 %v7097_v15 }
 0x6a3   :  { %5473 = vmatpush1.bf16.msra.mxu0 %v7219_v21  ;;  %5505 = vmatpush1.bf16.msra.mxu1 %v5504_v11  ;;  %v5512_v11 = vpack.c.bf16 %v2336_v29, %v2332_v2  ;;  %v5526_v2 = vpack.c.bf16 %v2369_v6, %v2365_v53  ;;  %v5558_v29 = vpack.c.bf16 %v2371_v20, %v2367_v43  ;;  %v2684_v43 = vld [vmem:[#allocation6 + $0x250] sm:$0xff] }
 0x6a4   :  { %5507 = vmatprep.subr.bf16.mxu0 %v5506_v27  ;;  %5539 = vmatprep.subr.bf16.mxu1 %v5538_v49  ;;  %v5514_v27 = vpack.c.bf16 %v2345_v34, %v2341_v55  ;;  %v5546_v49 = vpack.c.bf16 %v2347_v5, %v2343_v56  ;;  %v2375_v55 = vld [vmem:[#allocation4 + $0x398] sm:$0xff]  ;;  %v2688_v20 = vld [vmem:[#allocation6 + $0x270] sm:$0xff] }
 0x6a5   :  { %v2379_v34 = vld [vmem:[#allocation4 + $0x3b8] sm:$0xff] }
 0x759   :  { %v1971_v45 = vpop.f32.mrb[12].mxu0  ;;  %v2042_v9 = vpop.f32.mrb[28].mxu1 }
 0x75a   :  { %v2047_v8 = vadd.f32 %v1971_v45, %v6885_v4  ;;  %v1973_v18 = vpop.f32.mrb[13].mxu0  ;;  %v2044_v15 = vpop.f32.mrb[29].mxu1  ;;  %v6158_v3 = vadd.f32 %v2042_v9, %v6897_v57  ;;  %v2342_v45 = vld [vmem:[#allocation4 + $0x290] sm:$0xff] }
 0x75b   :  { %v2048_v17 = vadd.f32 %v1973_v18, %v6887_v7  ;;  %v6159_v33 = vadd.f32 %v2044_v15, %v6901_v28  ;;  %v2346_v9 = vld [vmem:[#allocation4 + $0x2b0] sm:$0xff]  ;;  %v2353_v18 = vld [vmem:[#allocation4 + $0x2e8] sm:$0xff]  ;;  %v2351_v15 = vld [vmem:[#allocation4 + $0x2d8] sm:$0xff] }
 0x75c   :  { %v4830_v36 = vmul.f32 -1.442695, %v2047_v8  ;;  %v2349_v8 = vld [vmem:[#allocation4 + $0x2c8] sm:$0xff] }
 0x75d   :  { %v4831_v35 = vmul.f32 -1.442695, %v2048_v17  ;;  %v4832_v1 = vmul.f32 -1.442695, %v6159_v33  ;;  %v2355_v17 = vld [vmem:[#allocation4 + $0x2f8] sm:$0xff]  ;;  %v2348_v33 = vld [vmem:[#allocation4 + $0x2c0] sm:$0xff] }
 0x75e   :  { %6343 = vpow2.f32 %v4830_v36  ;;  %v5516_v36 = vpack.c.bf16 %v2344_v47, %v2340_v54  ;;  %v5562_v47 = vpack.c.bf16 %v2379_v34, %v2375_v55  ;;  %v2692_v55 = vld [vmem:[#allocation6 + $0x290] sm:$0xff] }
 0x75f   :  { %6345 = vpow2.f32 %v4831_v35  ;;  %v5548_v35 = vpack.c.bf16 %v2346_v9, %v2342_v45  ;;  %v2381_v45 = vld [vmem:[#allocation4 + $0x3c8] sm:$0xff]  ;;  %v2696_v34 = vld [vmem:[#allocation6 + $0x2b0] sm:$0xff] }
 0x760   :  { %6347 = vpow2.f32 %v4832_v1  ;;  %v2352_v1 = vld [vmem:[#allocation4 + $0x2e0] sm:$0xff]  ;;  %v2385_v9 = vld [vmem:[#allocation4 + $0x3e8] sm:$0xff] }
 0x761   :  { %6349 = vtanh.f32 %v6158_v3  ;;  %v5518_v3 = vpack.c.bf16 %v2353_v18, %v2349_v8  ;;  %v2383_v8 = vld [vmem:[#allocation4 + $0x3d8] sm:$0xff] }
 0x762   :  { %v2387_v18 = vld [vmem:[#allocation4 + $0x3f8] sm:$0xff] }
 0x768   :  { %v6344_v37 = vpop.eup %6343 }
 0x769   :  { %v6346_v13 = vpop.eup %6345  ;;  %v2054_v32 = vadd.f32 1.0, %v6344_v37  ;;  %v5550_v37 = vpack.c.bf16 %v2355_v17, %v2351_v15 }
 0x76a   :  { %v2060_v62 = vadd.f32 1.0, %v6346_v13  ;;  %v6348_v4 = vpop.eup %6347  ;;  %v2350_v13 = vld [vmem:[#allocation4 + $0x2d0] sm:$0xff] }
 0x76b   :  { %6351 = vrcp.f32 %v2054_v32  ;;  %v6350_v50 = vpop.eup %6349  ;;  %v2067_v23 = vadd.f32 1.0, %v6348_v4  ;;  %v2354_v32 = vld [vmem:[#allocation4 + $0x2f0] sm:$0xff]  ;;  %v2361_v4 = vld [vmem:[#allocation4 + $0x328] sm:$0xff] }
 0x76c   :  { %6353 = vrcp.f32 %v2060_v62  ;;  %v2357_v62 = vld [vmem:[#allocation4 + $0x308] sm:$0xff] }
 0x76d   :  { %6355 = vrcp.f32 %v2067_v23  ;;  %v2356_v23 = vld [vmem:[#allocation4 + $0x300] sm:$0xff]  ;;  %v5522_v48 = vpack.c.bf16 %v2361_v4, %v2357_v62 }
 0x76e   :  { %v2674_v62 = vld [vmem:[#allocation6 + $0x200] sm:$0xff] }
 0x775   :  { %v6352_v7 = vpop.eup %6351 }
 0x776   :  { %v6354_v38 = vpop.eup %6353  ;;  %v2071_v19 = vmul.f32 %v6352_v7, %v6350_v50  ;;  %v2359_v50 = vld [vmem:[#allocation4 + $0x318] sm:$0xff] }
 0x777   :  { %v2070_v46 = vmul.f32 %v6354_v38, %v7228_v30  ;;  %v6356_v42 = vpop.eup %6355  ;;  %v2334_v30 = vld [vmem:[#allocation4 + $0x250] sm:$0xff]  ;;  %v2363_v7 = vld [vmem:[#allocation4 + $0x338] sm:$0xff]  ;;  %v5520_v38 = vpack.c.bf16 %v2352_v1, %v2348_v33  ;;  %v5566_v33 = vpack.c.bf16 %v2387_v18, %v2383_v8  ;;  %v2384_v1 = vld [vmem:[#allocation4 + $0x3e0] sm:$0xff] }
 0x778   :  { %v5544_v44 = vpack.c.bf16 %v2338_v60, %v2334_v30  ;;  %v5554_v22 = vpack.c.bf16 %v2363_v7, %v2359_v50  ;;  %v2373_v30 = vld [vmem:[#allocation4 + $0x388] sm:$0xff]  ;;  %v2676_v7 = vld [vmem:[#allocation6 + $0x210] sm:$0xff] }
 0x779   :  { %v7271_v21 = vadd.f32 %v2071_v19, %v2070_v46  ;;  %v5552_v19 = vpack.c.bf16 %v2354_v32, %v2350_v13  ;;  %v2360_v46 = vld [vmem:[#allocation4 + $0x320] sm:$0xff]  ;;  %v2377_v60 = vld [vmem:[#allocation4 + $0x3a8] sm:$0xff]  ;;  %v2700_v8 = vld [vmem:[#allocation6 + $0x2d0] sm:$0xff] }
 0x77a   :  { %v5530_v54 = vpack.c.bf16 %v2377_v60, %v2373_v30  ;;  %v2704_v18 = vld [vmem:[#allocation6 + $0x2f0] sm:$0xff] }
 0x77b   :  { %6357 = vtanh.f32 %v7271_v21 }
 0x785   :  { %v6358_v52 = vpop.eup %6357 }
 0x786   :  { %v7274_v24 = vmul.f32 %v6358_v52, %v6356_v42  ;;  %v5524_v42 = vpack.c.bf16 %v2360_v46, %v2356_v23  ;;  %v5556_v52 = vpack.c.bf16 %v2362_v25, %v2358_v26  ;;  %v2687_v23 = vld [vmem:[#allocation6 + $0x268] sm:$0xff]  ;;  %v2685_v46 = vld [vmem:[#allocation6 + $0x258] sm:$0xff]  ;;  %v2682_v26 = vld [vmem:[#allocation6 + $0x240] sm:$0xff] }
 0x787   :  { %v2686_v25 = vld [vmem:[#allocation6 + $0x260] sm:$0xff] }
 0x788   :  { %2209 = vmatmul.mubr.f32.vlgmr.msra.gmra.mrb[14].mxu0 %v7274_v24  ;;  %2280 = vmatmul.mubr.f32.vlgmr.msra.gmra.mrb[30].mxu1 %v7274_v24  ;;  %v7324_v6 = vpack.c.bf16 %v2686_v25, %v2682_v26  ;;  %v2720_v26 = vld [vmem:[#allocation6 + $0x370] sm:$0xff] }
 0x789   :  { %5509 = vmatpush1.bf16.msra.mxu0 %v5508_v61  ;;  %5541 = vmatpush1.bf16.msra.mxu1 %v5540_v31  ;;  %v2364_v61 = vld [vmem:[#allocation4 + $0x340] sm:$0xff] }
 0x78a   :  { %5511 = vmatprep.subr.bf16.mxu0 %v5510_v16  ;;  %5543 = vmatprep.subr.bf16.mxu1 %v5542_v40  ;;  %v2368_v31 = vld [vmem:[#allocation4 + $0x360] sm:$0xff]  ;;  %v2366_v16 = vld [vmem:[#allocation4 + $0x350] sm:$0xff] }
 0x78b   :  { %2475 = vmatprep.mubr.f32.mxu0 %v7936_v0  ;;  %2588 = vmatprep.mubr.f32.mxu1 %v7936_v0  ;;  %v2370_v40 = vld [vmem:[#allocation4 + $0x370] sm:$0xff]  ;;  %v5528_v56 = vpack.c.bf16 %v2368_v31, %v2364_v61  ;;  %v2695_v61 = vld [vmem:[#allocation6 + $0x2a8] sm:$0xff]  ;;  %v2693_v31 = vld [vmem:[#allocation6 + $0x298] sm:$0xff] }
 0x78c   :  { %v5560_v5 = vpack.c.bf16 %v2370_v40, %v2366_v16  ;;  %v2690_v16 = vld [vmem:[#allocation6 + $0x280] sm:$0xff] }
 0x78d   :  { %5513 = vmatpush1.bf16.msra.mxu0 %v5512_v11  ;;  %5545 = vmatpush1.bf16.msra.mxu1 %v5544_v44  ;;  %v2372_v11 = vld [vmem:[#allocation4 + $0x380] sm:$0xff] }
 0x78e   :  { %5515 = vmatprep.subr.bf16.mxu0 %v5514_v27  ;;  %5547 = vmatprep.subr.bf16.mxu1 %v5546_v49  ;;  %v2376_v44 = vld [vmem:[#allocation4 + $0x3a0] sm:$0xff]  ;;  %v2374_v27 = vld [vmem:[#allocation4 + $0x390] sm:$0xff] }
 0x78f   :  { %v2378_v49 = vld [vmem:[#allocation4 + $0x3b0] sm:$0xff]  ;;  %v5532_v15 = vpack.c.bf16 %v2376_v44, %v2372_v11  ;;  %v2694_v40 = vld [vmem:[#allocation6 + $0x2a0] sm:$0xff]  ;;  %v2703_v11 = vld [vmem:[#allocation6 + $0x2e8] sm:$0xff] }
 0x790   :  { %v5564_v17 = vpack.c.bf16 %v2378_v49, %v2374_v27  ;;  %v7336_v60 = vpack.c.bf16 %v2694_v40, %v2690_v16  ;;  %v2701_v44 = vld [vmem:[#allocation6 + $0x2d8] sm:$0xff]  ;;  %v2698_v27 = vld [vmem:[#allocation6 + $0x2c0] sm:$0xff] }
 0x791   :  { %5517 = vmatpush1.bf16.msra.mxu0 %v5516_v36  ;;  %5549 = vmatpush1.bf16.msra.mxu1 %v5548_v35  ;;  %v2380_v36 = vld [vmem:[#allocation4 + $0x3c0] sm:$0xff]  ;;  %v5534_v35 = vpack.c.bf16 %v2385_v9, %v2381_v45 }
 0x792   :  { %5519 = vmatprep.subr.bf16.mxu0 %v5518_v3  ;;  %5551 = vmatprep.subr.bf16.mxu1 %v5550_v37  ;;  %v2382_v3 = vld [vmem:[#allocation4 + $0x3d0] sm:$0xff]  ;;  %v5536_v13 = vpack.c.bf16 %v2384_v1, %v2380_v36  ;;  %v2702_v49 = vld [vmem:[#allocation6 + $0x2e0] sm:$0xff]  ;;  %v2711_v36 = vld [vmem:[#allocation6 + $0x328] sm:$0xff] }
 0x793   :  { %v2386_v37 = vld [vmem:[#allocation4 + $0x3f0] sm:$0xff]  ;;  %v7348_v9 = vpack.c.bf16 %v2702_v49, %v2698_v27  ;;  %v2722_v16 = vld [vmem:[#allocation6 + $0x380] sm:$0xff]  ;;  %v2735_v27 = vld [vmem:[#allocation6 + $0x3e8] sm:$0xff] }
 0x794   :  { %v5568_v32 = vpack.c.bf16 %v2386_v37, %v2382_v3  ;;  %v2706_v37 = vld [vmem:[#allocation6 + $0x300] sm:$0xff]  ;;  %v2733_v49 = vld [vmem:[#allocation6 + $0x3d8] sm:$0xff] }
 0x795   :  { %5521 = vmatpush1.bf16.msra.mxu0 %v5520_v38  ;;  %5553 = vmatpush1.bf16.msra.mxu1 %v5552_v19  ;;  %v2680_v38 = vld [vmem:[#allocation6 + $0x230] sm:$0xff]  ;;  %v2683_v19 = vld [vmem:[#allocation6 + $0x248] sm:$0xff]  ;;  %v2726_v40 = vld [vmem:[#allocation6 + $0x3a0] sm:$0xff] }
 0x796   :  { %5523 = vmatprep.subr.bf16.mxu0 %v5522_v48  ;;  %5555 = vmatprep.subr.bf16.mxu1 %v5554_v22  ;;  %v7320_v48 = vpack.c.bf16 %v2687_v23, %v2683_v19  ;;  %v2689_v22 = vld [vmem:[#allocation6 + $0x278] sm:$0xff]  ;;  %v2714_v19 = vld [vmem:[#allocation6 + $0x340] sm:$0xff] }
 0x797   :  { %v7322_v53 = vpack.c.bf16 %v2689_v22, %v2685_v46  ;;  %v2718_v46 = vld [vmem:[#allocation6 + $0x360] sm:$0xff]  ;;  %v2716_v22 = vld [vmem:[#allocation6 + $0x350] sm:$0xff] }
 0x798   :  { %v7371_v25 = vpack.c.bf16 %v2718_v46, %v2714_v19 }
 0x799   :  { %5525 = vmatpush1.bf16.msra.mxu0 %v5524_v42  ;;  %5557 = vmatpush1.bf16.msra.mxu1 %v5556_v52  ;;  %v7327_v42 = vpack.c.bf16 %v2688_v20, %v2684_v43  ;;  %v2691_v52 = vld [vmem:[#allocation6 + $0x288] sm:$0xff] }
 0x79a   :  { %5527 = vmatprep.subr.bf16.mxu0 %v5526_v2  ;;  %5559 = vmatprep.subr.bf16.mxu1 %v5558_v29  ;;  %v7332_v2 = vpack.c.bf16 %v2695_v61, %v2691_v52  ;;  %v2697_v29 = vld [vmem:[#allocation6 + $0x2b8] sm:$0xff]  ;;  %v2723_v43 = vld [vmem:[#allocation6 + $0x388] sm:$0xff]  ;;  %v7375_v61 = vpack.c.bf16 %v2720_v26, %v2716_v22 }
 0x79b   :  { %v7334_v30 = vpack.c.bf16 %v2697_v29, %v2693_v31  ;;  %v2727_v20 = vld [vmem:[#allocation6 + $0x3a8] sm:$0xff]  ;;  %v2725_v52 = vld [vmem:[#allocation6 + $0x398] sm:$0xff] }
 0x79c   :  { %v7377_v31 = vpack.c.bf16 %v2727_v20, %v2723_v43  ;;  %v2729_v29 = vld [vmem:[#allocation6 + $0x3b8] sm:$0xff] }
 0x79d   :  { %5529 = vmatpush1.bf16.msra.mxu0 %v5528_v56  ;;  %5561 = vmatpush1.bf16.msra.mxu1 %v5560_v5  ;;  %v7339_v56 = vpack.c.bf16 %v2696_v34, %v2692_v55  ;;  %v2699_v5 = vld [vmem:[#allocation6 + $0x2c8] sm:$0xff]  ;;  %v7380_v55 = vpack.c.bf16 %v2729_v29, %v2725_v52  ;;  %v2724_v34 = vld [vmem:[#allocation6 + $0x390] sm:$0xff] }
 0x79e   :  { %5531 = vmatprep.subr.bf16.mxu0 %v5530_v54  ;;  %5563 = vmatprep.subr.bf16.mxu1 %v5562_v47  ;;  %v7344_v54 = vpack.c.bf16 %v2703_v11, %v2699_v5  ;;  %v2705_v47 = vld [vmem:[#allocation6 + $0x2f8] sm:$0xff]  ;;  %v2728_v5 = vld [vmem:[#allocation6 + $0x3b0] sm:$0xff]  ;;  %v7383_v11 = vpack.c.bf16 %v2726_v40, %v2722_v16 }
 0x79f   :  { %v7346_v45 = vpack.c.bf16 %v2705_v47, %v2701_v44  ;;  %v7387_v44 = vpack.c.bf16 %v2728_v5, %v2724_v34  ;;  %v2731_v47 = vld [vmem:[#allocation6 + $0x3c8] sm:$0xff] }
 0x7a1   :  { %5533 = vmatpush1.bf16.msra.mxu0 %v5532_v15  ;;  %5565 = vmatpush1.bf16.msra.mxu1 %v5564_v17  ;;  %v2707_v15 = vld [vmem:[#allocation6 + $0x308] sm:$0xff]  ;;  %v7351_v17 = vpack.c.bf16 %v2704_v18, %v2700_v8  ;;  %v7392_v8 = vpack.c.bf16 %v2735_v27, %v2731_v47  ;;  %v2737_v18 = vld [vmem:[#allocation6 + $0x3f8] sm:$0xff] }
 0x7a2   :  { %5535 = vmatprep.subr.bf16.mxu0 %v5534_v35  ;;  %5567 = vmatprep.subr.bf16.mxu1 %v5566_v33  ;;  %v2709_v35 = vld [vmem:[#allocation6 + $0x318] sm:$0xff]  ;;  %v7355_v1 = vpack.c.bf16 %v2711_v36, %v2707_v15  ;;  %v2730_v15 = vld [vmem:[#allocation6 + $0x3c0] sm:$0xff] }
 0x7a3   :  { %v2713_v33 = vld [vmem:[#allocation6 + $0x338] sm:$0xff]  ;;  %v2734_v36 = vld [vmem:[#allocation6 + $0x3e0] sm:$0xff] }
 0x7a4   :  { %v7357_v3 = vpack.c.bf16 %v2713_v33, %v2709_v35  ;;  %v7394_v35 = vpack.c.bf16 %v2737_v18, %v2733_v49  ;;  %v7396_v33 = vpack.c.bf16 %v2734_v36, %v2730_v15  ;;  %v7937_v36 = vsub.s32 0, %v6854_v39 }
 0x7a5   :  { %5537 = vmatpush1.bf16.msra.mxu0 %v5536_v13  ;;  %5569 = vmatpush1.bf16.msra.mxu1 %v5568_v32  ;;  %v2710_v13 = vld [vmem:[#allocation6 + $0x320] sm:$0xff]  ;;  %v2708_v32 = vld [vmem:[#allocation6 + $0x310] sm:$0xff] }
 0x7a8   :  { %2476 = vmatmul.mubr.f32.vlgmr.msra.gmra.mrb[16].mxu0 %v6908_v63  ;;  %2589 = vmatmul.mubr.f32.vlgmr.msra.gmra.mrb[32].mxu1 %v6908_v63  ;;  %v2675_v63 = vld [vmem:[#allocation6 + $0x208] sm:$0xff] }
 0x7a9   :  { %2481 = vmatprep.mubr.f32.mxu0 %v7936_v0  ;;  %2594 = vmatprep.mubr.f32.mxu1 %v7936_v0 }
 0x7ac   :  { %2482 = vmatmul.mubr.f32.gmra.mrb[18].mxu0 %v6987_v58  ;;  %2595 = vmatmul.mubr.f32.gmra.mrb[34].mxu1 %v6987_v58  ;;  %v2679_v58 = vld [vmem:[#allocation6 + $0x228] sm:$0xff] }
 0x7ad   :  { %2487 = vmatprep.mubr.f32.mxu0 %v7936_v0  ;;  %2600 = vmatprep.mubr.f32.mxu1 %v7936_v0 }
 0x7b0   :  { %2488 = vmatmul.mubr.f32.gmra.mrb[20].mxu0 %v7034_v51  ;;  %2601 = vmatmul.mubr.f32.gmra.mrb[36].mxu1 %v7034_v51  ;;  %v2677_v51 = vld [vmem:[#allocation6 + $0x218] sm:$0xff] }
 0x7b1   :  { %2493 = vmatprep.mubr.f32.mxu0 %v7936_v0  ;;  %2606 = vmatprep.mubr.f32.mxu1 %v7936_v0 }
 0x7b4   :  { %2494 = vmatmul.mubr.f32.gmra.mrb[22].mxu0 %v7111_v41  ;;  %2607 = vmatmul.mubr.f32.gmra.mrb[38].mxu1 %v7111_v41  ;;  %v7308_v41 = vpack.c.bf16 %v2679_v58, %v2675_v63  ;;  %v7360_v63 = vpack.c.bf16 %v2710_v13, %v2706_v37  ;;  %v2712_v58 = vld [vmem:[#allocation6 + $0x330] sm:$0xff] }
 0x7b5   :  { %2499 = vmatprep.mubr.f32.mxu0 %v7936_v0  ;;  %2612 = vmatprep.mubr.f32.mxu1 %v7936_v0  ;;  %v2732_v37 = vld [vmem:[#allocation6 + $0x3d0] sm:$0xff] }
 0x7b6   :  { %5571 = vmatprep.subr.bf16.mxu0 %v7308_v41  ;;  %v2736_v13 = vld [vmem:[#allocation6 + $0x3f0] sm:$0xff] }
 0x7b8   :  { %2500 = vmatmul.mubr.f32.gmra.mrb[24].mxu0 %v7156_v12  ;;  %2613 = vmatmul.mubr.f32.gmra.mrb[40].mxu1 %v7156_v12  ;;  %v2681_v12 = vld [vmem:[#allocation6 + $0x238] sm:$0xff] }
 0x7b9   :  { %2505 = vmatprep.mubr.f32.mxu0 %v7936_v0  ;;  %2618 = vmatprep.mubr.f32.mxu1 %v7936_v0  ;;  %v7310_v4 = vpack.c.bf16 %v2681_v12, %v2677_v51  ;;  %v2715_v51 = vld [vmem:[#allocation6 + $0x348] sm:$0xff] }
 0x7ba   :  { %v2719_v12 = vld [vmem:[#allocation6 + $0x368] sm:$0xff] }
 0x7bb   :  { %5603 = vmatprep.subr.bf16.mxu1 %v7310_v4 }
 0x7bc   :  { %2506 = vmatmul.mubr.f32.gmra.mrb[26].mxu0 %v7231_v59  ;;  %2619 = vmatmul.mubr.f32.gmra.mrb[42].mxu1 %v7231_v59  ;;  %v2678_v59 = vld [vmem:[#allocation6 + $0x220] sm:$0xff] }
 0x7bd   :  { %2511 = vmatprep.mubr.f32.mxu0 %v7936_v0  ;;  %2624 = vmatprep.mubr.f32.mxu1 %v7936_v0  ;;  %v7312_v50 = vpack.c.bf16 %v2678_v59, %v2674_v62  ;;  %v7364_v62 = vpack.c.bf16 %v2712_v58, %v2708_v32  ;;  %v7366_v59 = vpack.c.bf16 %v2719_v12, %v2715_v51 }
 0x7be   :  { %v7399_v32 = vpack.c.bf16 %v2736_v13, %v2732_v37  ;;  %v7938_v13 = vsub.s32 1, %v6854_v39 }
 0x7bf   :  { %5573 = vmatpush1.bf16.msra.mxu0 %v7312_v50 }
 0x7c0   :  { %2512 = vmatmul.mubr.f32.gmra.mrb[28].mxu0 %v7274_v24  ;;  %2625 = vmatmul.mubr.f32.gmra.mrb[44].mxu1 %v7274_v24  ;;  %v7315_v24 = vpack.c.bf16 %v2680_v38, %v2676_v7  ;;  %v2717_v7 = vld [vmem:[#allocation6 + $0x358] sm:$0xff] }
 0x7c1   :  { %2517 = vmatprep.mubr.f32.mxu0 %v7936_v0  ;;  %2630 = vmatprep.mubr.f32.mxu1 %v7936_v0  ;;  %v2721_v38 = vld [vmem:[#allocation6 + $0x378] sm:$0xff] }
 0x7c2   :  { %5605 = vmatpush1.bf16.msra.mxu1 %v7315_v24  ;;  %5575 = vmatprep.subr.bf16.mxu0 %v7320_v48  ;;  %v7368_v23 = vpack.c.bf16 %v2721_v38, %v2717_v7 }
 0x7c3   :  { %5607 = vmatprep.subr.bf16.mxu1 %v7322_v53  ;;  %5577 = vmatpush1.bf16.msra.mxu0 %v7324_v6 }
 0x7c4   :  { %5579 = vmatprep.subr.bf16.mxu0 %v7332_v2 }
 0x7c6   :  { %5609 = vmatpush1.bf16.msra.mxu1 %v7327_v42 }
 0x7c7   :  { %5611 = vmatprep.subr.bf16.mxu1 %v7334_v30  ;;  %5581 = vmatpush1.bf16.msra.mxu0 %v7336_v60 }
 0x7c8   :  { %5583 = vmatprep.subr.bf16.mxu0 %v7344_v54 }
 0x7ca   :  { %5613 = vmatpush1.bf16.msra.mxu1 %v7339_v56 }
 0x7cb   :  { %5615 = vmatprep.subr.bf16.mxu1 %v7346_v45  ;;  %5585 = vmatpush1.bf16.msra.mxu0 %v7348_v9 }
 0x7cc   :  { %5587 = vmatprep.subr.bf16.mxu0 %v7355_v1 }
 0x7ce   :  { %5617 = vmatpush1.bf16.msra.mxu1 %v7351_v17 }
 0x7cf   :  { %5619 = vmatprep.subr.bf16.mxu1 %v7357_v3  ;;  %5589 = vmatpush1.bf16.msra.mxu0 %v7360_v63 }
 0x7d0   :  { %5591 = vmatprep.subr.bf16.mxu0 %v7366_v59 }
 0x7d2   :  { %5621 = vmatpush1.bf16.msra.mxu1 %v7364_v62 }
 0x7d3   :  { %5623 = vmatprep.subr.bf16.mxu1 %v7368_v23  ;;  %5593 = vmatpush1.bf16.msra.mxu0 %v7371_v25 }
 0x7d4   :  { %5595 = vmatprep.subr.bf16.mxu0 %v7377_v31 }
 0x7d6   :  { %5625 = vmatpush1.bf16.msra.mxu1 %v7375_v61 }
 0x7d7   :  { %5627 = vmatprep.subr.bf16.mxu1 %v7380_v55  ;;  %5597 = vmatpush1.bf16.msra.mxu0 %v7383_v11 }
 0x7d8   :  { %5599 = vmatprep.subr.bf16.mxu0 %v7392_v8 }
 0x7da   :  { %5629 = vmatpush1.bf16.msra.mxu1 %v7387_v44 }
 0x7db   :  { %5631 = vmatprep.subr.bf16.mxu1 %v7394_v35  ;;  %5601 = vmatpush1.bf16.msra.mxu0 %v7396_v33 }
 0x7dc   :  { %5635 = vmatprep.subr.bf16.mxu0 %v7308_v41 }
 0x7de   :  { %5633 = vmatpush1.bf16.msra.mxu1 %v7399_v32 }
 0x7df   :  { %5667 = vmatprep.subr.bf16.mxu1 %v7310_v4 }
 0x85b   :  { %v2210_v58 = vpop.f32.mrb[14].mxu0  ;;  %v2281_v51 = vpop.f32.mrb[30].mxu1 }
 0x85c   :  { %v2286_v12 = vadd.f32 %v2210_v58, %v6889_v10  ;;  %v2212_v7 = vpop.f32.mrb[15].mxu0  ;;  %v2283_v38 = vpop.f32.mrb[31].mxu1  ;;  %v6160_v20 = vadd.f32 %v2281_v51, %v6897_v57 }
 0x85d   :  { %v2287_v19 = vadd.f32 %v2212_v7, %v6891_v14  ;;  %v6161_v26 = vadd.f32 %v2283_v38, %v6901_v28 }
 0x85e   :  { %v4833_v46 = vmul.f32 -1.442695, %v2286_v12 }
 0x85f   :  { %v4834_v22 = vmul.f32 -1.442695, %v2287_v19  ;;  %v4835_v43 = vmul.f32 -1.442695, %v6161_v26 }
 0x860   :  { %6359 = vpow2.f32 %v4833_v46 }
 0x861   :  { %6361 = vpow2.f32 %v4834_v22 }
 0x862   :  { %6363 = vpow2.f32 %v4835_v43  ;;  %v7939_v43 = vsub.s32 3, %v6854_v39 }
 0x863   :  { %6365 = vtanh.f32 %v6160_v20 }
 0x86a   :  { %v6360_v52 = vpop.eup %6359 }
 0x86b   :  { %v6362_v29 = vpop.eup %6361  ;;  %v2293_v16 = vadd.f32 1.0, %v6360_v52 }
 0x86c   :  { %v2299_v40 = vadd.f32 1.0, %v6362_v29  ;;  %v6364_v10 = vpop.eup %6363  ;;  %v7940_v29 = vsub.s32 2, %v6854_v39 }
 0x86d   :  { %6367 = vrcp.f32 %v2293_v16  ;;  %v6366_v34 = vpop.eup %6365  ;;  %v2306_v27 = vadd.f32 1.0, %v6364_v10 }
 0x86e   :  { %6369 = vrcp.f32 %v2299_v40 }
 0x86f   :  { %6371 = vrcp.f32 %v2306_v27 }
 0x877   :  { %v6368_v14 = vpop.eup %6367 }
 0x878   :  { %v6370_v5 = vpop.eup %6369  ;;  %v2310_v47 = vmul.f32 %v6368_v14, %v6366_v34 }
 0x879   :  { %v2309_v49 = vmul.f32 %v6370_v5, %v7271_v21  ;;  %v6372_v57 = vpop.eup %6371  ;;  %v4836_v21 = vld [vmem:[%s7926_s3 + $0x4] sm:$0xf] }
 0x87a   :  { %v7454_v37 = vrot.slane %v4836_v21, %v7937_v36  ;;  %v7458_v58 = vrot.slane %v4836_v21, %v7938_v13  ;;  %v7464_v20 = vrot.slane %v4836_v21, %v7939_v43  ;;  %v7469_v16 = vrot.slane %v4836_v21, %v7940_v29 }
 0x87b   :  { %v2311_v28 = vadd.f32 %v2310_v47, %v2309_v49 }
 0x87d   :  { %6373 = vtanh.f32 %v2311_v28 }
 0x887   :  { %v6374_v18 = vpop.eup %6373 }
 0x888   :  { %v2313_v15 = vmul.f32 %v6374_v18, %v6372_v57 }
 0x88a   :  { %2518 = vmatmul.mubr.f32.gmra.mrb[30].mxu0 %v2313_v15  ;;  %2631 = vmatmul.mubr.f32.gmra.mrb[46].mxu1 %v2313_v15 }
 0x88b   :  { %2802 = vmatprep.mubr.f32.mxu0 %v7936_v0  ;;  %2873 = vmatprep.mubr.f32.mxu1 %v7936_v0 }
 0x88e   :  { %2803 = vmatmul.mubr.f32.vlgmr.msra.gmra.mrb[16].mxu0 %v7936_v0  ;;  %2874 = vmatmul.mubr.f32.vlgmr.msra.gmra.mrb[32].mxu1 %v7936_v0 }
 0x88f   :  { %5637 = vmatpush1.bf16.msra.mxu0 %v7312_v50  ;;  %5669 = vmatpush1.bf16.msra.mxu1 %v7315_v24 }
 0x890   :  { %5639 = vmatprep.subr.bf16.mxu0 %v7320_v48  ;;  %5671 = vmatprep.subr.bf16.mxu1 %v7322_v53 }
 0x891   :  { %3041 = vmatprep.mubr.f32.mxu0 %v7936_v0  ;;  %3112 = vmatprep.mubr.f32.mxu1 %v7936_v0 }
 0x893   :  { %5641 = vmatpush1.bf16.msra.mxu0 %v7324_v6  ;;  %5673 = vmatpush1.bf16.msra.mxu1 %v7327_v42 }
 0x894   :  { %5643 = vmatprep.subr.bf16.mxu0 %v7332_v2  ;;  %5675 = vmatprep.subr.bf16.mxu1 %v7334_v30 }
 0x897   :  { %5645 = vmatpush1.bf16.msra.mxu0 %v7336_v60  ;;  %5677 = vmatpush1.bf16.msra.mxu1 %v7339_v56 }
 0x898   :  { %5647 = vmatprep.subr.bf16.mxu0 %v7344_v54  ;;  %5679 = vmatprep.subr.bf16.mxu1 %v7346_v45 }
 0x89b   :  { %5649 = vmatpush1.bf16.msra.mxu0 %v7348_v9  ;;  %5681 = vmatpush1.bf16.msra.mxu1 %v7351_v17 }
 0x89c   :  { %5651 = vmatprep.subr.bf16.mxu0 %v7355_v1  ;;  %5683 = vmatprep.subr.bf16.mxu1 %v7357_v3 }
 0x89f   :  { %5653 = vmatpush1.bf16.msra.mxu0 %v7360_v63  ;;  %5685 = vmatpush1.bf16.msra.mxu1 %v7364_v62 }
 0x8a0   :  { %5655 = vmatprep.subr.bf16.mxu0 %v7366_v59  ;;  %5687 = vmatprep.subr.bf16.mxu1 %v7368_v23 }
 0x8a3   :  { %5657 = vmatpush1.bf16.msra.mxu0 %v7371_v25  ;;  %5689 = vmatpush1.bf16.msra.mxu1 %v7375_v61 }
 0x8a4   :  { %5659 = vmatprep.subr.bf16.mxu0 %v7377_v31  ;;  %5691 = vmatprep.subr.bf16.mxu1 %v7380_v55 }
 0x8a7   :  { %5661 = vmatpush1.bf16.msra.mxu0 %v7383_v11  ;;  %5693 = vmatpush1.bf16.msra.mxu1 %v7387_v44 }
 0x8a8   :  { %5663 = vmatprep.subr.bf16.mxu0 %v7392_v8  ;;  %5695 = vmatprep.subr.bf16.mxu1 %v7394_v35 }
 0x8ab   :  { %5665 = vmatpush1.bf16.msra.mxu0 %v7396_v33  ;;  %5697 = vmatpush1.bf16.msra.mxu1 %v7399_v32 }
 0x8ac   :  { %5699 = vmatprep.subr.bf16.mxu0 %v7308_v41  ;;  %5731 = vmatprep.subr.bf16.mxu1 %v7310_v4 }
 0x961   :  { %v2804_v51 = vpop.f32.mrb[16].mxu0  ;;  %v2875_v12 = vpop.f32.mrb[32].mxu1 }
 0x962   :  { %v6162_v7 = vadd.f32 %v2804_v51, %v7454_v37  ;;  %v2806_v38 = vpop.f32.mrb[17].mxu0  ;;  %v2877_v19 = vpop.f32.mrb[33].mxu1  ;;  %v6178_v10 = vadd.f32 %v2875_v12, %v7469_v16 }
 0x963   :  { %v6163_v46 = vadd.f32 %v2806_v38, %v7458_v58  ;;  %v6179_v52 = vadd.f32 %v2877_v19, %v7464_v20 }
 0x964   :  { %v4837_v22 = vmul.f32 -1.442695, %v6162_v7 }
 0x965   :  { %v4838_v26 = vmul.f32 -1.442695, %v6163_v46  ;;  %v4839_v40 = vmul.f32 -1.442695, %v6179_v52 }
 0x966   :  { %6375 = vpow2.f32 %v4837_v22 }
 0x967   :  { %6377 = vpow2.f32 %v4838_v26 }
 0x968   :  { %6379 = vpow2.f32 %v4839_v40 }
 0x969   :  { %6381 = vtanh.f32 %v6178_v10 }
 0x970   :  { %v6376_v34 = vpop.eup %6375 }
 0x971   :  { %v6378_v14 = vpop.eup %6377  ;;  %v2887_v5 = vadd.f32 1.0, %v6376_v34 }
 0x972   :  { %v2893_v47 = vadd.f32 1.0, %v6378_v14  ;;  %v6380_v27 = vpop.eup %6379 }
 0x973   :  { %6383 = vrcp.f32 %v2887_v5  ;;  %v6382_v49 = vpop.eup %6381  ;;  %v2900_v15 = vadd.f32 1.0, %v6380_v27 }
 0x974   :  { %6385 = vrcp.f32 %v2893_v47 }
 0x975   :  { %6387 = vrcp.f32 %v2900_v15 }
 0x97d   :  { %v6384_v28 = vpop.eup %6383 }
 0x97e   :  { %v6386_v57 = vpop.eup %6385  ;;  %v2904_v18 = vmul.f32 %v6384_v28, %v6382_v49 }
 0x97f   :  { %v2903_v39 = vmul.f32 0.0, %v6386_v57  ;;  %v6388_v36 = vpop.eup %6387 }
 0x981   :  { %v7472_v21 = vadd.f32 %v2904_v18, %v2903_v39 }
 0x983   :  { %6389 = vtanh.f32 %v7472_v21 }
 0x98d   :  { %v6390_v13 = vpop.eup %6389 }
 0x98e   :  { %v7475_v51 = vmul.f32 %v6390_v13, %v6388_v36  ;;  %v3630_v13 = vld [vmem:[#allocation6 + $0x200] sm:$0xff] }
 0x990   :  { %3042 = vmatmul.mubr.f32.vlgmr.msra.gmra.mrb[18].mxu0 %v7475_v51  ;;  %3113 = vmatmul.mubr.f32.vlgmr.msra.gmra.mrb[34].mxu1 %v7475_v51 }
 0x991   :  { %5701 = vmatpush1.bf16.msra.mxu0 %v7312_v50  ;;  %5733 = vmatpush1.bf16.msra.mxu1 %v7315_v24 }
 0x992   :  { %5703 = vmatprep.subr.bf16.mxu0 %v7320_v48  ;;  %5735 = vmatprep.subr.bf16.mxu1 %v7322_v53 }
 0x993   :  { %3280 = vmatprep.mubr.f32.mxu0 %v7936_v0  ;;  %3351 = vmatprep.mubr.f32.mxu1 %v7936_v0 }
 0x995   :  { %5705 = vmatpush1.bf16.msra.mxu0 %v7324_v6  ;;  %5737 = vmatpush1.bf16.msra.mxu1 %v7327_v42 }
 0x996   :  { %5707 = vmatprep.subr.bf16.mxu0 %v7332_v2  ;;  %5739 = vmatprep.subr.bf16.mxu1 %v7334_v30 }
 0x999   :  { %5709 = vmatpush1.bf16.msra.mxu0 %v7336_v60  ;;  %5741 = vmatpush1.bf16.msra.mxu1 %v7339_v56 }
 0x99a   :  { %5711 = vmatprep.subr.bf16.mxu0 %v7344_v54  ;;  %5743 = vmatprep.subr.bf16.mxu1 %v7346_v45 }
 0x99d   :  { %5713 = vmatpush1.bf16.msra.mxu0 %v7348_v9  ;;  %5745 = vmatpush1.bf16.msra.mxu1 %v7351_v17 }
 0x99e   :  { %5715 = vmatprep.subr.bf16.mxu0 %v7355_v1  ;;  %5747 = vmatprep.subr.bf16.mxu1 %v7357_v3 }
 0x9a1   :  { %5717 = vmatpush1.bf16.msra.mxu0 %v7360_v63  ;;  %5749 = vmatpush1.bf16.msra.mxu1 %v7364_v62 }
 0x9a2   :  { %5719 = vmatprep.subr.bf16.mxu0 %v7366_v59  ;;  %5751 = vmatprep.subr.bf16.mxu1 %v7368_v23 }
 0x9a5   :  { %5721 = vmatpush1.bf16.msra.mxu0 %v7371_v25  ;;  %5753 = vmatpush1.bf16.msra.mxu1 %v7375_v61 }
 0x9a6   :  { %5723 = vmatprep.subr.bf16.mxu0 %v7377_v31  ;;  %5755 = vmatprep.subr.bf16.mxu1 %v7380_v55 }
 0x9a9   :  { %5725 = vmatpush1.bf16.msra.mxu0 %v7383_v11  ;;  %5757 = vmatpush1.bf16.msra.mxu1 %v7387_v44 }
 0x9aa   :  { %5727 = vmatprep.subr.bf16.mxu0 %v7392_v8  ;;  %5759 = vmatprep.subr.bf16.mxu1 %v7394_v35 }
 0x9ad   :  { %5729 = vmatpush1.bf16.msra.mxu0 %v7396_v33  ;;  %5761 = vmatpush1.bf16.msra.mxu1 %v7399_v32 }
 0x9ae   :  { %5763 = vmatprep.subr.bf16.mxu0 %v7308_v41  ;;  %5795 = vmatprep.subr.bf16.mxu1 %v7310_v4 }
 0xa63   :  { %v3043_v12 = vpop.f32.mrb[18].mxu0  ;;  %v3114_v7 = vpop.f32.mrb[34].mxu1 }
 0xa64   :  { %v6164_v38 = vadd.f32 %v3043_v12, %v7454_v37  ;;  %v3045_v19 = vpop.f32.mrb[19].mxu0  ;;  %v3116_v46 = vpop.f32.mrb[35].mxu1  ;;  %v6180_v40 = vadd.f32 %v3114_v7, %v7469_v16  ;;  %v3634_v12 = vld [vmem:[#allocation6 + $0x220] sm:$0xff] }
 0xa65   :  { %v6165_v22 = vadd.f32 %v3045_v19, %v7458_v58  ;;  %v6181_v52 = vadd.f32 %v3116_v46, %v7464_v20  ;;  %v3632_v19 = vld [vmem:[#allocation6 + $0x210] sm:$0xff] }
 0xa66   :  { %v4840_v26 = vmul.f32 -1.442695, %v6164_v38  ;;  %v7575_v38 = vpack.c.bf16 %v3634_v12, %v3630_v13  ;;  %v3636_v46 = vld [vmem:[#allocation6 + $0x230] sm:$0xff]  ;;  %v3671_v12 = vld [vmem:[#allocation6 + $0x348] sm:$0xff] }
 0xa67   :  { %v4841_v43 = vmul.f32 -1.442695, %v6165_v22  ;;  %v4842_v29 = vmul.f32 -1.442695, %v6181_v52  ;;  %v7578_v22 = vpack.c.bf16 %v3636_v46, %v3632_v19  ;;  %v3641_v52 = vld [vmem:[#allocation6 + $0x258] sm:$0xff]  ;;  %v3675_v19 = vld [vmem:[#allocation6 + $0x368] sm:$0xff] }
 0xa68   :  { %6391 = vpow2.f32 %v4840_v26  ;;  %v3639_v26 = vld [vmem:[#allocation6 + $0x248] sm:$0xff]  ;;  %v3673_v46 = vld [vmem:[#allocation6 + $0x358] sm:$0xff] }
 0xa69   :  { %6393 = vpow2.f32 %v4841_v43  ;;  %v3643_v43 = vld [vmem:[#allocation6 + $0x268] sm:$0xff] }
 0xa6a   :  { %6395 = vpow2.f32 %v4842_v29  ;;  %v7583_v29 = vpack.c.bf16 %v3643_v43, %v3639_v26  ;;  %v7630_v26 = vpack.c.bf16 %v3675_v19, %v3671_v12  ;;  %v3677_v43 = vld [vmem:[#allocation6 + $0x378] sm:$0xff] }
 0xa6b   :  { %6397 = vtanh.f32 %v6180_v40  ;;  %v3645_v40 = vld [vmem:[#allocation6 + $0x278] sm:$0xff] }
 0xa72   :  { %v6392_v41 = vpop.eup %6391 }
 0xa73   :  { %v6394_v10 = vpop.eup %6393  ;;  %v3126_v4 = vadd.f32 1.0, %v6392_v41  ;;  %v3638_v41 = vld [vmem:[#allocation6 + $0x240] sm:$0xff] }
 0xa74   :  { %v3132_v34 = vadd.f32 1.0, %v6394_v10  ;;  %v6396_v14 = vpop.eup %6395  ;;  %v3642_v10 = vld [vmem:[#allocation6 + $0x260] sm:$0xff] }
 0xa75   :  { %6399 = vrcp.f32 %v3126_v4  ;;  %v6398_v5 = vpop.eup %6397  ;;  %v3139_v28 = vadd.f32 1.0, %v6396_v14  ;;  %v7585_v4 = vpack.c.bf16 %v3645_v40, %v3641_v52  ;;  %v3640_v14 = vld [vmem:[#allocation6 + $0x250] sm:$0xff]  ;;  %v3670_v52 = vld [vmem:[#allocation6 + $0x340] sm:$0xff] }
 0xa76   :  { %6401 = vrcp.f32 %v3132_v34  ;;  %v7587_v34 = vpack.c.bf16 %v3642_v10, %v3638_v41  ;;  %v3674_v40 = vld [vmem:[#allocation6 + $0x360] sm:$0xff]  ;;  %v7633_v41 = vpack.c.bf16 %v3677_v43, %v3673_v46 }
 0xa77   :  { %6403 = vrcp.f32 %v3139_v28  ;;  %v3649_v28 = vld [vmem:[#allocation6 + $0x298] sm:$0xff]  ;;  %v7635_v10 = vpack.c.bf16 %v3674_v40, %v3670_v52 }
 0xa7f   :  { %v6400_v47 = vpop.eup %6399 }
 0xa80   :  { %v6402_v27 = vpop.eup %6401  ;;  %v3143_v49 = vmul.f32 %v6400_v47, %v6398_v5  ;;  %v3644_v5 = vld [vmem:[#allocation6 + $0x270] sm:$0xff] }
 0xa81   :  { %v3142_v57 = vmul.f32 %v6402_v27, %v7472_v21  ;;  %v6404_v15 = vpop.eup %6403  ;;  %v3637_v21 = vld [vmem:[#allocation6 + $0x238] sm:$0xff]  ;;  %v7590_v47 = vpack.c.bf16 %v3644_v5, %v3640_v14  ;;  %v3647_v27 = vld [vmem:[#allocation6 + $0x288] sm:$0xff]  ;;  %v3672_v14 = vld [vmem:[#allocation6 + $0x350] sm:$0xff] }
 0xa82   :  { %v3676_v5 = vld [vmem:[#allocation6 + $0x370] sm:$0xff] }
 0xa83   :  { %v7518_v18 = vadd.f32 %v3143_v49, %v3142_v57  ;;  %v3651_v49 = vld [vmem:[#allocation6 + $0x2a8] sm:$0xff] }
 0xa84   :  { %v7595_v57 = vpack.c.bf16 %v3651_v49, %v3647_v27  ;;  %v3679_v27 = vld [vmem:[#allocation6 + $0x388] sm:$0xff]  ;;  %v7638_v49 = vpack.c.bf16 %v3676_v5, %v3672_v14 }
 0xa85   :  { %6405 = vtanh.f32 %v7518_v18 }
 0xa8f   :  { %v6406_v39 = vpop.eup %6405 }
 0xa90   :  { %v7521_v36 = vmul.f32 %v6406_v39, %v6404_v15  ;;  %v3646_v15 = vld [vmem:[#allocation6 + $0x280] sm:$0xff] }
 0xa91   :  { %v3650_v39 = vld [vmem:[#allocation6 + $0x2a0] sm:$0xff] }
 0xa92   :  { %3281 = vmatmul.mubr.f32.vlgmr.msra.gmra.mrb[20].mxu0 %v7521_v36  ;;  %3352 = vmatmul.mubr.f32.vlgmr.msra.gmra.mrb[36].mxu1 %v7521_v36 }
 0xa93   :  { %5765 = vmatpush1.bf16.msra.mxu0 %v7312_v50  ;;  %5797 = vmatpush1.bf16.msra.mxu1 %v7315_v24 }
 0xa94   :  { %5767 = vmatprep.subr.bf16.mxu0 %v7320_v48  ;;  %5799 = vmatprep.subr.bf16.mxu1 %v7322_v53 }
 0xa95   :  { %3519 = vmatprep.mubr.f32.mxu0 %v7936_v0  ;;  %3590 = vmatprep.mubr.f32.mxu1 %v7936_v0 }
 0xa97   :  { %5769 = vmatpush1.bf16.msra.mxu0 %v7324_v6  ;;  %5801 = vmatpush1.bf16.msra.mxu1 %v7327_v42 }
 0xa98   :  { %5771 = vmatprep.subr.bf16.mxu0 %v7332_v2  ;;  %5803 = vmatprep.subr.bf16.mxu1 %v7334_v30 }
 0xa9b   :  { %5773 = vmatpush1.bf16.msra.mxu0 %v7336_v60  ;;  %5805 = vmatpush1.bf16.msra.mxu1 %v7339_v56 }
 0xa9c   :  { %5775 = vmatprep.subr.bf16.mxu0 %v7344_v54  ;;  %5807 = vmatprep.subr.bf16.mxu1 %v7346_v45 }
 0xa9f   :  { %5777 = vmatpush1.bf16.msra.mxu0 %v7348_v9  ;;  %5809 = vmatpush1.bf16.msra.mxu1 %v7351_v17 }
 0xaa0   :  { %5779 = vmatprep.subr.bf16.mxu0 %v7355_v1  ;;  %5811 = vmatprep.subr.bf16.mxu1 %v7357_v3 }
 0xaa3   :  { %5781 = vmatpush1.bf16.msra.mxu0 %v7360_v63  ;;  %5813 = vmatpush1.bf16.msra.mxu1 %v7364_v62 }
 0xaa4   :  { %5783 = vmatprep.subr.bf16.mxu0 %v7366_v59  ;;  %5815 = vmatprep.subr.bf16.mxu1 %v7368_v23 }
 0xaa7   :  { %5785 = vmatpush1.bf16.msra.mxu0 %v7371_v25  ;;  %5817 = vmatpush1.bf16.msra.mxu1 %v7375_v61 }
 0xaa8   :  { %5787 = vmatprep.subr.bf16.mxu0 %v7377_v31  ;;  %5819 = vmatprep.subr.bf16.mxu1 %v7380_v55 }
 0xaab   :  { %5789 = vmatpush1.bf16.msra.mxu0 %v7383_v11  ;;  %5821 = vmatpush1.bf16.msra.mxu1 %v7387_v44 }
 0xaac   :  { %5791 = vmatprep.subr.bf16.mxu0 %v7392_v8  ;;  %5823 = vmatprep.subr.bf16.mxu1 %v7394_v35  ;;  %v3631_v8 = vld [vmem:[#allocation6 + $0x208] sm:$0xff] }
 0xaad   :  { %v3635_v35 = vld [vmem:[#allocation6 + $0x228] sm:$0xff] }
 0xaaf   :  { %5793 = vmatpush1.bf16.msra.mxu0 %v7396_v33  ;;  %5825 = vmatpush1.bf16.msra.mxu1 %v7399_v32  ;;  %v3633_v33 = vld [vmem:[#allocation6 + $0x218] sm:$0xff]  ;;  %v7571_v32 = vpack.c.bf16 %v3635_v35, %v3631_v8 }
 0xab0   :  { %v7573_v7 = vpack.c.bf16 %v3637_v21, %v3633_v33  ;;  %v3664_v33 = vld [vmem:[#allocation6 + $0x310] sm:$0xff] }
 0xab1   :  { %5827 = vmatprep.subr.bf16.mxu0 %v7571_v32  ;;  %v3668_v21 = vld [vmem:[#allocation6 + $0x330] sm:$0xff] }
 0xab2   :  { %5859 = vmatprep.subr.bf16.mxu1 %v7573_v7  ;;  %v7626_v13 = vpack.c.bf16 %v3668_v21, %v3664_v33  ;;  %v3692_v33 = vld [vmem:[#allocation6 + $0x3f0] sm:$0xff] }
 0xb65   :  { %v3282_v50 = vpop.f32.mrb[20].mxu0  ;;  %v3353_v24 = vpop.f32.mrb[36].mxu1 }
 0xb66   :  { %v6166_v48 = vadd.f32 %v3282_v50, %v7454_v37  ;;  %v3284_v53 = vpop.f32.mrb[21].mxu0  ;;  %v3355_v6 = vpop.f32.mrb[37].mxu1  ;;  %v6182_v54 = vadd.f32 %v3353_v24, %v7469_v16  ;;  %v7599_v24 = vpack.c.bf16 %v3650_v39, %v3646_v15  ;;  %v3685_v15 = vld [vmem:[#allocation6 + $0x3b8] sm:$0xff] }
 0xb67   :  { %v6167_v42 = vadd.f32 %v3284_v53, %v7458_v58  ;;  %v6183_v60 = vadd.f32 %v3355_v6, %v7464_v20  ;;  %v3652_v53 = vld [vmem:[#allocation6 + $0x2b0] sm:$0xff] }
 0xb68   :  { %v4843_v2 = vmul.f32 -1.442695, %v6166_v48  ;;  %v3648_v48 = vld [vmem:[#allocation6 + $0x290] sm:$0xff] }
 0xb69   :  { %v4844_v30 = vmul.f32 -1.442695, %v6167_v42  ;;  %v4845_v56 = vmul.f32 -1.442695, %v6183_v60  ;;  %v7602_v6 = vpack.c.bf16 %v3652_v53, %v3648_v48  ;;  %v3655_v42 = vld [vmem:[#allocation6 + $0x2c8] sm:$0xff]  ;;  %v3678_v53 = vld [vmem:[#allocation6 + $0x380] sm:$0xff] }
 0xb6a   :  { %6407 = vpow2.f32 %v4843_v2  ;;  %v3659_v2 = vld [vmem:[#allocation6 + $0x2e8] sm:$0xff] }
 0xb6b   :  { %6409 = vpow2.f32 %v4844_v30  ;;  %v3657_v30 = vld [vmem:[#allocation6 + $0x2d8] sm:$0xff]  ;;  %v7607_v60 = vpack.c.bf16 %v3659_v2, %v3655_v42  ;;  %v3682_v42 = vld [vmem:[#allocation6 + $0x3a0] sm:$0xff]  ;;  %v3680_v2 = vld [vmem:[#allocation6 + $0x390] sm:$0xff] }
 0xb6c   :  { %6411 = vpow2.f32 %v4845_v56  ;;  %v3661_v56 = vld [vmem:[#allocation6 + $0x2f8] sm:$0xff] }
 0xb6d   :  { %6413 = vtanh.f32 %v6182_v54  ;;  %v3654_v54 = vld [vmem:[#allocation6 + $0x2c0] sm:$0xff] }
 0xb74   :  { %v6408_v45 = vpop.eup %6407 }
 0xb75   :  { %v6410_v9 = vpop.eup %6409  ;;  %v3365_v17 = vadd.f32 1.0, %v6408_v45  ;;  %v3658_v45 = vld [vmem:[#allocation6 + $0x2e0] sm:$0xff] }
 0xb76   :  { %v3371_v1 = vadd.f32 1.0, %v6410_v9  ;;  %v6412_v3 = vpop.eup %6411  ;;  %v7609_v9 = vpack.c.bf16 %v3661_v56, %v3657_v30  ;;  %v7646_v30 = vpack.c.bf16 %v3682_v42, %v3678_v53  ;;  %v3684_v56 = vld [vmem:[#allocation6 + $0x3b0] sm:$0xff] }
 0xb77   :  { %6415 = vrcp.f32 %v3365_v17  ;;  %v6414_v63 = vpop.eup %6413  ;;  %v3378_v25 = vadd.f32 1.0, %v6412_v3  ;;  %v7611_v17 = vpack.c.bf16 %v3658_v45, %v3654_v54  ;;  %v3660_v3 = vld [vmem:[#allocation6 + $0x2f0] sm:$0xff]  ;;  %v3687_v54 = vld [vmem:[#allocation6 + $0x3c8] sm:$0xff] }
 0xb78   :  { %6417 = vrcp.f32 %v3371_v1  ;;  %v3656_v1 = vld [vmem:[#allocation6 + $0x2d0] sm:$0xff]  ;;  %v3691_v45 = vld [vmem:[#allocation6 + $0x3e8] sm:$0xff] }
 0xb79   :  { %6419 = vrcp.f32 %v3378_v25 }
 0xb81   :  { %v6416_v62 = vpop.eup %6415 }
 0xb82   :  { %v6418_v59 = vpop.eup %6417  ;;  %v3382_v23 = vmul.f32 %v6416_v62, %v6414_v63  ;;  %v7614_v63 = vpack.c.bf16 %v3660_v3, %v3656_v1  ;;  %v3663_v62 = vld [vmem:[#allocation6 + $0x308] sm:$0xff]  ;;  %v7650_v1 = vpack.c.bf16 %v3684_v56, %v3680_v2  ;;  %v7652_v3 = vpack.c.bf16 %v3691_v45, %v3687_v54 }
 0xb83   :  { %v3381_v61 = vmul.f32 %v6418_v59, %v7518_v18  ;;  %v6420_v55 = vpop.eup %6419  ;;  %v3653_v18 = vld [vmem:[#allocation6 + $0x2b8] sm:$0xff]  ;;  %v3667_v59 = vld [vmem:[#allocation6 + $0x328] sm:$0xff] }
 0xb84   :  { %v7597_v50 = vpack.c.bf16 %v3653_v18, %v3649_v28  ;;  %v7619_v25 = vpack.c.bf16 %v3667_v59, %v3663_v62  ;;  %v3683_v28 = vld [vmem:[#allocation6 + $0x3a8] sm:$0xff]  ;;  %v3681_v18 = vld [vmem:[#allocation6 + $0x398] sm:$0xff] }
 0xb85   :  { %v7562_v31 = vadd.f32 %v3382_v23, %v3381_v61  ;;  %v3665_v23 = vld [vmem:[#allocation6 + $0x318] sm:$0xff]  ;;  %v7641_v39 = vpack.c.bf16 %v3683_v28, %v3679_v27  ;;  %v7643_v48 = vpack.c.bf16 %v3685_v15, %v3681_v18 }
 0xb86   :  { %v3669_v61 = vld [vmem:[#allocation6 + $0x338] sm:$0xff] }
 0xb87   :  { %6421 = vtanh.f32 %v7562_v31  ;;  %v7621_v8 = vpack.c.bf16 %v3669_v61, %v3665_v23  ;;  %v3689_v62 = vld [vmem:[#allocation6 + $0x3d8] sm:$0xff]  ;;  %v3686_v23 = vld [vmem:[#allocation6 + $0x3c0] sm:$0xff] }
 0xb88   :  { %v3693_v59 = vld [vmem:[#allocation6 + $0x3f8] sm:$0xff] }
 0xb89   :  { %v7655_v61 = vpack.c.bf16 %v3693_v59, %v3689_v62 }
 0xb91   :  { %v6422_v11 = vpop.eup %6421 }
 0xb92   :  { %v7565_v44 = vmul.f32 %v6422_v11, %v6420_v55  ;;  %v3662_v55 = vld [vmem:[#allocation6 + $0x300] sm:$0xff] }
 0xb93   :  { %v3666_v11 = vld [vmem:[#allocation6 + $0x320] sm:$0xff] }
 0xb94   :  { %3520 = vmatmul.mubr.f32.vlgmr.msra.gmra.mrb[22].mxu0 %v7565_v44  ;;  %3591 = vmatmul.mubr.f32.vlgmr.msra.gmra.mrb[38].mxu1 %v7565_v44  ;;  %v7623_v35 = vpack.c.bf16 %v3666_v11, %v3662_v55  ;;  %v3690_v55 = vld [vmem:[#allocation6 + $0x3e0] sm:$0xff]  ;;  %v3688_v11 = vld [vmem:[#allocation6 + $0x3d0] sm:$0xff] }
 0xb95   :  { %3758 = vmatprep.mubr.f32.mxu0 %v7936_v0  ;;  %3829 = vmatprep.mubr.f32.mxu1 %v7936_v0  ;;  %v7658_v21 = vpack.c.bf16 %v3690_v55, %v3686_v23  ;;  %v7662_v12 = vpack.c.bf16 %v3692_v33, %v3688_v11 }
 0xb96   :  { %5829 = vmatpush1.bf16.msra.mxu0 %v7575_v38  ;;  %5861 = vmatpush1.bf16.msra.mxu1 %v7578_v22 }
 0xb97   :  { %5831 = vmatprep.subr.bf16.mxu0 %v7583_v29  ;;  %5863 = vmatprep.subr.bf16.mxu1 %v7585_v4 }
 0xb9a   :  { %5833 = vmatpush1.bf16.msra.mxu0 %v7587_v34  ;;  %5865 = vmatpush1.bf16.msra.mxu1 %v7590_v47 }
 0xb9b   :  { %5835 = vmatprep.subr.bf16.mxu0 %v7595_v57  ;;  %5867 = vmatprep.subr.bf16.mxu1 %v7597_v50 }
 0xb9e   :  { %5837 = vmatpush1.bf16.msra.mxu0 %v7599_v24  ;;  %5869 = vmatpush1.bf16.msra.mxu1 %v7602_v6 }
 0xb9f   :  { %5839 = vmatprep.subr.bf16.mxu0 %v7607_v60  ;;  %5871 = vmatprep.subr.bf16.mxu1 %v7609_v9 }
 0xba2   :  { %5841 = vmatpush1.bf16.msra.mxu0 %v7611_v17  ;;  %5873 = vmatpush1.bf16.msra.mxu1 %v7614_v63 }
 0xba3   :  { %5843 = vmatprep.subr.bf16.mxu0 %v7619_v25  ;;  %5875 = vmatprep.subr.bf16.mxu1 %v7621_v8 }
 0xba6   :  { %5845 = vmatpush1.bf16.msra.mxu0 %v7623_v35  ;;  %5877 = vmatpush1.bf16.msra.mxu1 %v7626_v13 }
 0xba7   :  { %5847 = vmatprep.subr.bf16.mxu0 %v7630_v26  ;;  %5879 = vmatprep.subr.bf16.mxu1 %v7633_v41 }
 0xbaa   :  { %5849 = vmatpush1.bf16.msra.mxu0 %v7635_v10  ;;  %5881 = vmatpush1.bf16.msra.mxu1 %v7638_v49 }
 0xbab   :  { %5851 = vmatprep.subr.bf16.mxu0 %v7641_v39  ;;  %5883 = vmatprep.subr.bf16.mxu1 %v7643_v48 }
 0xbae   :  { %5853 = vmatpush1.bf16.msra.mxu0 %v7646_v30  ;;  %5885 = vmatpush1.bf16.msra.mxu1 %v7650_v1 }
 0xbaf   :  { %5855 = vmatprep.subr.bf16.mxu0 %v7652_v3  ;;  %5887 = vmatprep.subr.bf16.mxu1 %v7655_v61 }
 0xbb2   :  { %5857 = vmatpush1.bf16.msra.mxu0 %v7658_v21  ;;  %5889 = vmatpush1.bf16.msra.mxu1 %v7662_v12 }
 0xbb3   :  { %5891 = vmatprep.subr.bf16.mxu0 %v7571_v32  ;;  %5923 = vmatprep.subr.bf16.mxu1 %v7573_v7 }
 0xc67   :  { %v3521_v19 = vpop.f32.mrb[22].mxu0  ;;  %v3592_v46 = vpop.f32.mrb[38].mxu1 }
 0xc68   :  { %v6168_v43 = vadd.f32 %v3521_v19, %v7454_v37  ;;  %v3523_v52 = vpop.f32.mrb[23].mxu0  ;;  %v3594_v40 = vpop.f32.mrb[39].mxu1  ;;  %v6184_v15 = vadd.f32 %v3592_v46, %v7469_v16 }
 0xc69   :  { %v6169_v14 = vadd.f32 %v3523_v52, %v7458_v58  ;;  %v6185_v28 = vadd.f32 %v3594_v40, %v7464_v20 }
 0xc6a   :  { %v4846_v5 = vmul.f32 -1.442695, %v6168_v43 }
 0xc6b   :  { %v4847_v27 = vmul.f32 -1.442695, %v6169_v14  ;;  %v4848_v18 = vmul.f32 -1.442695, %v6185_v28 }
 0xc6c   :  { %6423 = vpow2.f32 %v4846_v5 }
 0xc6d   :  { %6425 = vpow2.f32 %v4847_v27 }
 0xc6e   :  { %6427 = vpow2.f32 %v4848_v18 }
 0xc6f   :  { %6429 = vtanh.f32 %v6184_v15 }
 0xc76   :  { %v6424_v53 = vpop.eup %6423 }
 0xc77   :  { %v6426_v42 = vpop.eup %6425  ;;  %v3604_v2 = vadd.f32 1.0, %v6424_v53 }
 0xc78   :  { %v3610_v56 = vadd.f32 1.0, %v6426_v42  ;;  %v6428_v54 = vpop.eup %6427 }
 0xc79   :  { %6431 = vrcp.f32 %v3604_v2  ;;  %v6430_v45 = vpop.eup %6429  ;;  %v3617_v55 = vadd.f32 1.0, %v6428_v54 }
 0xc7a   :  { %6433 = vrcp.f32 %v3610_v56 }
 0xc7b   :  { %6435 = vrcp.f32 %v3617_v55 }
 0xc83   :  { %v6432_v62 = vpop.eup %6431 }
 0xc84   :  { %v6434_v59 = vpop.eup %6433  ;;  %v3621_v23 = vmul.f32 %v6432_v62, %v6430_v45 }
 0xc85   :  { %v3620_v11 = vmul.f32 %v6434_v59, %v7562_v31  ;;  %v6436_v19 = vpop.eup %6435 }
 0xc87   :  { %v7674_v33 = vadd.f32 %v3621_v23, %v3620_v11 }
 0xc89   :  { %6437 = vtanh.f32 %v7674_v33 }
 0xc93   :  { %v6438_v46 = vpop.eup %6437 }
 0xc94   :  { %v7677_v43 = vmul.f32 %v6438_v46, %v6436_v19 }
 0xc96   :  { %3759 = vmatmul.mubr.f32.vlgmr.msra.gmra.mrb[24].mxu0 %v7677_v43  ;;  %3830 = vmatmul.mubr.f32.vlgmr.msra.gmra.mrb[40].mxu1 %v7677_v43 }
 0xc97   :  { %5893 = vmatpush1.bf16.msra.mxu0 %v7575_v38  ;;  %5925 = vmatpush1.bf16.msra.mxu1 %v7578_v22 }
 0xc98   :  { %5895 = vmatprep.subr.bf16.mxu0 %v7583_v29  ;;  %5927 = vmatprep.subr.bf16.mxu1 %v7585_v4 }
 0xc99   :  { %3997 = vmatprep.mubr.f32.mxu0 %v7936_v0  ;;  %4068 = vmatprep.mubr.f32.mxu1 %v7936_v0 }
 0xc9b   :  { %5897 = vmatpush1.bf16.msra.mxu0 %v7587_v34  ;;  %5929 = vmatpush1.bf16.msra.mxu1 %v7590_v47 }
 0xc9c   :  { %5899 = vmatprep.subr.bf16.mxu0 %v7595_v57  ;;  %5931 = vmatprep.subr.bf16.mxu1 %v7597_v50 }
 0xc9f   :  { %5901 = vmatpush1.bf16.msra.mxu0 %v7599_v24  ;;  %5933 = vmatpush1.bf16.msra.mxu1 %v7602_v6 }
 0xca0   :  { %5903 = vmatprep.subr.bf16.mxu0 %v7607_v60  ;;  %5935 = vmatprep.subr.bf16.mxu1 %v7609_v9 }
 0xca3   :  { %5905 = vmatpush1.bf16.msra.mxu0 %v7611_v17  ;;  %5937 = vmatpush1.bf16.msra.mxu1 %v7614_v63 }
 0xca4   :  { %5907 = vmatprep.subr.bf16.mxu0 %v7619_v25  ;;  %5939 = vmatprep.subr.bf16.mxu1 %v7621_v8 }
 0xca7   :  { %5909 = vmatpush1.bf16.msra.mxu0 %v7623_v35  ;;  %5941 = vmatpush1.bf16.msra.mxu1 %v7626_v13 }
 0xca8   :  { %5911 = vmatprep.subr.bf16.mxu0 %v7630_v26  ;;  %5943 = vmatprep.subr.bf16.mxu1 %v7633_v41 }
 0xcab   :  { %5913 = vmatpush1.bf16.msra.mxu0 %v7635_v10  ;;  %5945 = vmatpush1.bf16.msra.mxu1 %v7638_v49 }
 0xcac   :  { %5915 = vmatprep.subr.bf16.mxu0 %v7641_v39  ;;  %5947 = vmatprep.subr.bf16.mxu1 %v7643_v48 }
 0xcaf   :  { %5917 = vmatpush1.bf16.msra.mxu0 %v7646_v30  ;;  %5949 = vmatpush1.bf16.msra.mxu1 %v7650_v1 }
 0xcb0   :  { %5919 = vmatprep.subr.bf16.mxu0 %v7652_v3  ;;  %5951 = vmatprep.subr.bf16.mxu1 %v7655_v61 }
 0xcb3   :  { %5921 = vmatpush1.bf16.msra.mxu0 %v7658_v21  ;;  %5953 = vmatpush1.bf16.msra.mxu1 %v7662_v12 }
 0xcb4   :  { %5955 = vmatprep.subr.bf16.mxu0 %v7571_v32  ;;  %5987 = vmatprep.subr.bf16.mxu1 %v7573_v7 }
 0xd69   :  { %v3760_v31 = vpop.f32.mrb[24].mxu0  ;;  %v3831_v52 = vpop.f32.mrb[40].mxu1 }
 0xd6a   :  { %v6170_v40 = vadd.f32 %v3760_v31, %v7454_v37  ;;  %v3762_v14 = vpop.f32.mrb[25].mxu0  ;;  %v3833_v5 = vpop.f32.mrb[41].mxu1  ;;  %v6186_v42 = vadd.f32 %v3831_v52, %v7469_v16 }
 0xd6b   :  { %v6171_v27 = vadd.f32 %v3762_v14, %v7458_v58  ;;  %v6187_v15 = vadd.f32 %v3833_v5, %v7464_v20 }
 0xd6c   :  { %v4849_v28 = vmul.f32 -1.442695, %v6170_v40 }
 0xd6d   :  { %v4850_v18 = vmul.f32 -1.442695, %v6171_v27  ;;  %v4851_v53 = vmul.f32 -1.442695, %v6187_v15 }
 0xd6e   :  { %6439 = vpow2.f32 %v4849_v28 }
 0xd6f   :  { %6441 = vpow2.f32 %v4850_v18 }
 0xd70   :  { %6443 = vpow2.f32 %v4851_v53 }
 0xd71   :  { %6445 = vtanh.f32 %v6186_v42 }
 0xd78   :  { %v6440_v2 = vpop.eup %6439 }
 0xd79   :  { %v6442_v56 = vpop.eup %6441  ;;  %v3843_v54 = vadd.f32 1.0, %v6440_v2 }
 0xd7a   :  { %v3849_v45 = vadd.f32 1.0, %v6442_v56  ;;  %v6444_v62 = vpop.eup %6443 }
 0xd7b   :  { %6447 = vrcp.f32 %v3843_v54  ;;  %v6446_v59 = vpop.eup %6445  ;;  %v3856_v19 = vadd.f32 1.0, %v6444_v62 }
 0xd7c   :  { %6449 = vrcp.f32 %v3849_v45 }
 0xd7d   :  { %6451 = vrcp.f32 %v3856_v19 }
 0xd85   :  { %v6448_v23 = vpop.eup %6447 }
 0xd86   :  { %v6450_v55 = vpop.eup %6449  ;;  %v3860_v11 = vmul.f32 %v6448_v23, %v6446_v59 }
 0xd87   :  { %v3859_v46 = vmul.f32 %v6450_v55, %v7674_v33  ;;  %v6452_v52 = vpop.eup %6451 }
 0xd89   :  { %v7720_v31 = vadd.f32 %v3860_v11, %v3859_v46 }
 0xd8b   :  { %6453 = vtanh.f32 %v7720_v31 }
 0xd95   :  { %v6454_v40 = vpop.eup %6453 }
 0xd96   :  { %v7723_v14 = vmul.f32 %v6454_v40, %v6452_v52 }
 0xd98   :  { %3998 = vmatmul.mubr.f32.vlgmr.msra.gmra.mrb[26].mxu0 %v7723_v14  ;;  %4069 = vmatmul.mubr.f32.vlgmr.msra.gmra.mrb[42].mxu1 %v7723_v14 }
 0xd99   :  { %5957 = vmatpush1.bf16.msra.mxu0 %v7575_v38  ;;  %5989 = vmatpush1.bf16.msra.mxu1 %v7578_v22 }
 0xd9a   :  { %5959 = vmatprep.subr.bf16.mxu0 %v7583_v29  ;;  %5991 = vmatprep.subr.bf16.mxu1 %v7585_v4 }
 0xd9b   :  { %4236 = vmatprep.mubr.f32.mxu0 %v7936_v0  ;;  %4307 = vmatprep.mubr.f32.mxu1 %v7936_v0 }
 0xd9d   :  { %5961 = vmatpush1.bf16.msra.mxu0 %v7587_v34  ;;  %5993 = vmatpush1.bf16.msra.mxu1 %v7590_v47 }
 0xd9e   :  { %5963 = vmatprep.subr.bf16.mxu0 %v7595_v57  ;;  %5995 = vmatprep.subr.bf16.mxu1 %v7597_v50 }
 0xda1   :  { %5965 = vmatpush1.bf16.msra.mxu0 %v7599_v24  ;;  %5997 = vmatpush1.bf16.msra.mxu1 %v7602_v6 }
 0xda2   :  { %5967 = vmatprep.subr.bf16.mxu0 %v7607_v60  ;;  %5999 = vmatprep.subr.bf16.mxu1 %v7609_v9 }
 0xda5   :  { %5969 = vmatpush1.bf16.msra.mxu0 %v7611_v17  ;;  %6001 = vmatpush1.bf16.msra.mxu1 %v7614_v63 }
 0xda6   :  { %5971 = vmatprep.subr.bf16.mxu0 %v7619_v25  ;;  %6003 = vmatprep.subr.bf16.mxu1 %v7621_v8 }
 0xda9   :  { %5973 = vmatpush1.bf16.msra.mxu0 %v7623_v35  ;;  %6005 = vmatpush1.bf16.msra.mxu1 %v7626_v13 }
 0xdaa   :  { %5975 = vmatprep.subr.bf16.mxu0 %v7630_v26  ;;  %6007 = vmatprep.subr.bf16.mxu1 %v7633_v41 }
 0xdad   :  { %5977 = vmatpush1.bf16.msra.mxu0 %v7635_v10  ;;  %6009 = vmatpush1.bf16.msra.mxu1 %v7638_v49 }
 0xdae   :  { %5979 = vmatprep.subr.bf16.mxu0 %v7641_v39  ;;  %6011 = vmatprep.subr.bf16.mxu1 %v7643_v48 }
 0xdb1   :  { %5981 = vmatpush1.bf16.msra.mxu0 %v7646_v30  ;;  %6013 = vmatpush1.bf16.msra.mxu1 %v7650_v1 }
 0xdb2   :  { %5983 = vmatprep.subr.bf16.mxu0 %v7652_v3  ;;  %6015 = vmatprep.subr.bf16.mxu1 %v7655_v61 }
 0xdb5   :  { %5985 = vmatpush1.bf16.msra.mxu0 %v7658_v21  ;;  %6017 = vmatpush1.bf16.msra.mxu1 %v7662_v12 }
 0xdb6   :  { %6019 = vmatprep.subr.bf16.mxu0 %v7571_v32  ;;  %6051 = vmatprep.subr.bf16.mxu1 %v7573_v7 }
 0xe6b   :  { %v3999_v33 = vpop.f32.mrb[26].mxu0  ;;  %v4070_v5 = vpop.f32.mrb[42].mxu1 }
 0xe6c   :  { %v6172_v27 = vadd.f32 %v3999_v33, %v7454_v37  ;;  %v4001_v28 = vpop.f32.mrb[27].mxu0  ;;  %v4072_v18 = vpop.f32.mrb[43].mxu1  ;;  %v6188_v54 = vadd.f32 %v4070_v5, %v7469_v16 }
 0xe6d   :  { %v6173_v15 = vadd.f32 %v4001_v28, %v7458_v58  ;;  %v6189_v2 = vadd.f32 %v4072_v18, %v7464_v20  ;;  %v4594_v28 = vld [vmem:[%s7927_s4 + $0x20] sm:$0xff]  ;;  %v4595_v18 = vld [vmem:[%s7927_s4 + $0x28] sm:$0xff] }
 0xe6e   :  { %v4852_v53 = vmul.f32 -1.442695, %v6172_v27 }
 0xe6f   :  { %v4853_v42 = vmul.f32 -1.442695, %v6173_v15  ;;  %v4854_v56 = vmul.f32 -1.442695, %v6189_v2  ;;  %v6090_v15 = vpack.c.bf16 %v4595_v18, %v4594_v28 }
 0xe70   :  { %6455 = vpow2.f32 %v4852_v53  ;;  %v4596_v53 = vld [vmem:[%s7927_s4 + $0x30] sm:$0xff] }
 0xe71   :  { %6457 = vpow2.f32 %v4853_v42  ;;  %v4597_v42 = vld [vmem:[%s7927_s4 + $0x38] sm:$0xff] }
 0xe72   :  { %6459 = vpow2.f32 %v4854_v56  ;;  %v6094_v2 = vpack.c.bf16 %v4597_v42, %v4596_v53  ;;  %v4598_v56 = vld [vmem:[%s7927_s4 + $0x40] sm:$0xff] }
 0xe73   :  { %6461 = vtanh.f32 %v6188_v54 }
 0xe7a   :  { %v6456_v32 = vpop.eup %6455 }
 0xe7b   :  { %v6458_v45 = vpop.eup %6457  ;;  %v4082_v7 = vadd.f32 1.0, %v6456_v32  ;;  %v4600_v32 = vld [vmem:[%s7927_s4 + $0x50] sm:$0xff] }
 0xe7c   :  { %v4088_v62 = vadd.f32 1.0, %v6458_v45  ;;  %v6460_v59 = vpop.eup %6459  ;;  %v4601_v45 = vld [vmem:[%s7927_s4 + $0x58] sm:$0xff] }
 0xe7d   :  { %6463 = vrcp.f32 %v4082_v7  ;;  %v6462_v23 = vpop.eup %6461  ;;  %v4095_v46 = vadd.f32 1.0, %v6460_v59  ;;  %v6102_v7 = vpack.c.bf16 %v4601_v45, %v4600_v32  ;;  %v4603_v59 = vld [vmem:[%s7927_s4 + $0x68] sm:$0xff] }
 0xe7e   :  { %6465 = vrcp.f32 %v4088_v62  ;;  %v4602_v62 = vld [vmem:[%s7927_s4 + $0x60] sm:$0xff] }
 0xe7f   :  { %6467 = vrcp.f32 %v4095_v46 }
 0xe87   :  { %v6464_v55 = vpop.eup %6463 }
 0xe88   :  { %v6466_v11 = vpop.eup %6465  ;;  %v4099_v19 = vmul.f32 %v6464_v55, %v6462_v23  ;;  %v6106_v23 = vpack.c.bf16 %v4603_v59, %v4602_v62  ;;  %v4604_v55 = vld [vmem:[%s7927_s4 + $0x70] sm:$0xff] }
 0xe89   :  { %v4098_v52 = vmul.f32 %v6466_v11, %v7720_v31  ;;  %v6468_v33 = vpop.eup %6467  ;;  %v4605_v11 = vld [vmem:[%s7927_s4 + $0x78] sm:$0xff] }
 0xe8b   :  { %v7766_v40 = vadd.f32 %v4099_v19, %v4098_v52  ;;  %v6110_v19 = vpack.c.bf16 %v4605_v11, %v4604_v55 }
 0xe8d   :  { %6469 = vtanh.f32 %v7766_v40 }
 0xe97   :  { %v6470_v5 = vpop.eup %6469 }
 0xe98   :  { %v7769_v27 = vmul.f32 %v6470_v5, %v6468_v33 }
 0xe9a   :  { %4237 = vmatmul.mubr.f32.vlgmr.msra.gmra.mrb[28].mxu0 %v7769_v27  ;;  %4308 = vmatmul.mubr.f32.vlgmr.msra.gmra.mrb[44].mxu1 %v7769_v27 }
 0xe9b   :  { %6021 = vmatpush1.bf16.msra.mxu0 %v7575_v38  ;;  %6053 = vmatpush1.bf16.msra.mxu1 %v7578_v22  ;;  %v4591_v38 = vld [vmem:[%s7927_s4 + $0x8] sm:$0xff] }
 0xe9c   :  { %6023 = vmatprep.subr.bf16.mxu0 %v7583_v29  ;;  %6055 = vmatprep.subr.bf16.mxu1 %v7585_v4 }
 0xe9d   :  { %4475 = vmatprep.mubr.f32.mxu0 %v7936_v0  ;;  %4546 = vmatprep.mubr.f32.mxu1 %v7936_v0  ;;  %v4590_v0 = vld [vmem:[%s7927_s4] sm:$0xff] }
 0xe9e   :  { %v6082_v22 = vpack.c.bf16 %v4591_v38, %v4590_v0 }
 0xe9f   :  { %6025 = vmatpush1.bf16.msra.mxu0 %v7587_v34  ;;  %6057 = vmatpush1.bf16.msra.mxu1 %v7590_v47 }
 0xea0   :  { %6027 = vmatprep.subr.bf16.mxu0 %v7595_v57  ;;  %6059 = vmatprep.subr.bf16.mxu1 %v7597_v50 }
 0xea3   :  { %6029 = vmatpush1.bf16.msra.mxu0 %v7599_v24  ;;  %6061 = vmatpush1.bf16.msra.mxu1 %v7602_v6 }
 0xea4   :  { %6031 = vmatprep.subr.bf16.mxu0 %v7607_v60  ;;  %6063 = vmatprep.subr.bf16.mxu1 %v7609_v9 }
 0xea7   :  { %6033 = vmatpush1.bf16.msra.mxu0 %v7611_v17  ;;  %6065 = vmatpush1.bf16.msra.mxu1 %v7614_v63 }
 0xea8   :  { %6035 = vmatprep.subr.bf16.mxu0 %v7619_v25  ;;  %6067 = vmatprep.subr.bf16.mxu1 %v7621_v8 }
 0xeab   :  { %6037 = vmatpush1.bf16.msra.mxu0 %v7623_v35  ;;  %6069 = vmatpush1.bf16.msra.mxu1 %v7626_v13 }
 0xeac   :  { %6039 = vmatprep.subr.bf16.mxu0 %v7630_v26  ;;  %6071 = vmatprep.subr.bf16.mxu1 %v7633_v41 }
 0xeaf   :  { %6041 = vmatpush1.bf16.msra.mxu0 %v7635_v10  ;;  %6073 = vmatpush1.bf16.msra.mxu1 %v7638_v49 }
 0xeb0   :  { %6043 = vmatprep.subr.bf16.mxu0 %v7641_v39  ;;  %6075 = vmatprep.subr.bf16.mxu1 %v7643_v48 }
 0xeb3   :  { %6045 = vmatpush1.bf16.msra.mxu0 %v7646_v30  ;;  %6077 = vmatpush1.bf16.msra.mxu1 %v7650_v1  ;;  %v4592_v1 = vld [vmem:[%s7927_s4 + $0x10] sm:$0xff] }
 0xeb4   :  { %6047 = vmatprep.subr.bf16.mxu0 %v7652_v3  ;;  %6079 = vmatprep.subr.bf16.mxu1 %v7655_v61  ;;  %v4593_v3 = vld [vmem:[%s7927_s4 + $0x18] sm:$0xff] }
 0xeb5   :  { %v6086_v31 = vpack.c.bf16 %v4593_v3, %v4592_v1 }
 0xeb7   :  { %6049 = vmatpush1.bf16.msra.mxu0 %v7658_v21  ;;  %6081 = vmatpush1.bf16.msra.mxu1 %v7662_v12 }
 0xeb8   :  { %6083 = vmatprep.subr.bf16.mxu0 %v6082_v22 }
 0xf6d   :  { %v4238_v29 = vpop.f32.mrb[28].mxu0  ;;  %v4309_v4 = vpop.f32.mrb[44].mxu1 }
 0xf6e   :  { %v6174_v34 = vadd.f32 %v4238_v29, %v7454_v37  ;;  %v4240_v47 = vpop.f32.mrb[29].mxu0  ;;  %v4311_v57 = vpop.f32.mrb[45].mxu1  ;;  %v6190_v17 = vadd.f32 %v4309_v4, %v7469_v16 }
 0xf6f   :  { %v6175_v50 = vadd.f32 %v4240_v47, %v7458_v58  ;;  %v6191_v60 = vadd.f32 %v4311_v57, %v7464_v20 }
 0xf70   :  { %v4855_v24 = vmul.f32 -1.442695, %v6174_v34 }
 0xf71   :  { %v4856_v6 = vmul.f32 -1.442695, %v6175_v50  ;;  %v4857_v9 = vmul.f32 -1.442695, %v6191_v60 }
 0xf72   :  { %6471 = vpow2.f32 %v4855_v24 }
 0xf73   :  { %6473 = vpow2.f32 %v4856_v6 }
 0xf74   :  { %6475 = vpow2.f32 %v4857_v9 }
 0xf75   :  { %6477 = vtanh.f32 %v6190_v17 }
 0xf7c   :  { %v6472_v63 = vpop.eup %6471 }
 0xf7d   :  { %v6474_v25 = vpop.eup %6473  ;;  %v4321_v8 = vadd.f32 1.0, %v6472_v63 }
 0xf7e   :  { %v4327_v35 = vadd.f32 1.0, %v6474_v25  ;;  %v6476_v13 = vpop.eup %6475 }
 0xf7f   :  { %6479 = vrcp.f32 %v4321_v8  ;;  %v6478_v26 = vpop.eup %6477  ;;  %v4334_v39 = vadd.f32 1.0, %v6476_v13 }
 0xf80   :  { %6481 = vrcp.f32 %v4327_v35 }
 0xf81   :  { %6483 = vrcp.f32 %v4334_v39 }
 0xf89   :  { %v6480_v41 = vpop.eup %6479 }
 0xf8a   :  { %v6482_v10 = vpop.eup %6481  ;;  %v4338_v49 = vmul.f32 %v6480_v41, %v6478_v26 }
 0xf8b   :  { %v4337_v48 = vmul.f32 %v6482_v10, %v7766_v40  ;;  %v6484_v61 = vpop.eup %6483 }
 0xf8d   :  { %v7816_v30 = vadd.f32 %v4338_v49, %v4337_v48 }
 0xf8f   :  { %6485 = vtanh.f32 %v7816_v30 }
 0xf99   :  { %v6486_v21 = vpop.eup %6485 }
 0xf9a   :  { %v4341_v12 = vmul.f32 %v6486_v21, %v6484_v61 }
 0xf9c   :  { %4476 = vmatmul.mubr.f32.vlgmr.msra.gmra.mrb[30].mxu0 %v4341_v12  ;;  %4547 = vmatmul.mubr.f32.vlgmr.msra.gmra.mrb[46].mxu1 %v4341_v12 }
 0xf9d   :  { %6085 = vmatpush3.bf16.msra.mxu0 %v6082_v22  ;;  %4918 = vmatprep.mubr.f32.mxu0 %v7475_v51  ;;  %v4599_v51 = vld [vmem:[%s7927_s4 + $0x48] sm:$0xff] }
 0xf9e   :  { %6087 = vmatprep.subr.bf16.mxu0 %v6086_v31  ;;  %v6098_v54 = vpack.c.bf16 %v4599_v51, %v4598_v56 }
 0xfa1   :  { %6089 = vmatpush3.bf16.msra.mxu0 %v6086_v31 }
 0xfa2   :  { %6091 = vmatprep.subr.bf16.mxu0 %v6090_v15 }
 0xfa5   :  { %6093 = vmatpush3.bf16.msra.mxu0 %v6090_v15 }
 0xfa6   :  { %6095 = vmatprep.subr.bf16.mxu0 %v6094_v2 }
 0xfa9   :  { %6097 = vmatpush3.bf16.msra.mxu0 %v6094_v2 }
 0xfaa   :  { %6099 = vmatprep.subr.bf16.mxu0 %v6098_v54 }
 0xfad   :  { %6101 = vmatpush3.bf16.msra.mxu0 %v6098_v54 }
 0xfae   :  { %6103 = vmatprep.subr.bf16.mxu0 %v6102_v7 }
 0xfb1   :  { %6105 = vmatpush3.bf16.msra.mxu0 %v6102_v7 }
 0xfb2   :  { %6107 = vmatprep.subr.bf16.mxu0 %v6106_v23 }
 0xfb5   :  { %6109 = vmatpush3.bf16.msra.mxu0 %v6106_v23 }
 0xfb6   :  { %6111 = vmatprep.subr.bf16.mxu0 %v6110_v19 }
 0xfb9   :  { %6113 = vmatpush3.bf16.msra.mxu0 %v6110_v19 }
 0xfbc   :  { %4919 = vmatmul.mubr.f32.vlgmr.msra.gmra.mrb[32].mxu0 %v7521_v36 }
 0xfbd   :  { %4921 = vmatprep.mubr.f32.mxu0 %v7565_v44 }
 0xfc0   :  { %4922 = vmatmul.mubr.f32.gmra.mrb[34].mxu0 %v7677_v43 }
 0xfc1   :  { %4924 = vmatprep.mubr.f32.mxu0 %v7723_v14 }
 0xfc4   :  { %4925 = vmatmul.mubr.f32.gmra.mrb[36].mxu0 %v7769_v27 }
 0xfc5   :  { %4927 = vmatprep.mubr.f32.mxu0 %v4341_v12 }
0x106f   :  { %v4477_v46 = vpop.f32.mrb[30].mxu0  ;;  %v4548_v52 = vpop.f32.mrb[46].mxu1 }
0x1070   :  { %v6176_v40 = vadd.f32 %v4477_v46, %v7454_v37  ;;  %v4479_v33 = vpop.f32.mrb[31].mxu0  ;;  %v4550_v5 = vpop.f32.mrb[47].mxu1  ;;  %v6192_v43 = vadd.f32 %v4548_v52, %v7469_v16 }
0x1071   :  { %v6177_v0 = vadd.f32 %v4479_v33, %v7458_v58  ;;  %v6193_v36 = vadd.f32 %v4550_v5, %v7464_v20  ;;  %v4861_v20 = vld [vmem:[%s7928_s5] ss:$0 sm:$0xff] }
0x1072   :  { %v4858_v38 = vmul.f32 -1.442695, %v6176_v40 }
0x1073   :  { %v4859_v22 = vmul.f32 -1.442695, %v6177_v0  ;;  %v4860_v44 = vmul.f32 -1.442695, %v6193_v36 }
0x1074   :  { %6487 = vpow2.f32 %v4858_v38 }
0x1075   :  { %6489 = vpow2.f32 %v4859_v22 }
0x1076   :  { %6491 = vpow2.f32 %v4860_v44 }
0x1077   :  { %6493 = vtanh.f32 %v6192_v43 }
0x107e   :  { %v6488_v14 = vpop.eup %6487 }
0x107f   :  { %v6490_v27 = vpop.eup %6489  ;;  %v4560_v29 = vadd.f32 1.0, %v6488_v14 }
0x1080   :  { %v4566_v4 = vadd.f32 1.0, %v6490_v27  ;;  %v6492_v37 = vpop.eup %6491 }
0x1081   :  { %6495 = vrcp.f32 %v4560_v29  ;;  %v6494_v34 = vpop.eup %6493  ;;  %v4573_v50 = vadd.f32 1.0, %v6492_v37 }
0x1082   :  { %6497 = vrcp.f32 %v4566_v4 }
0x1083   :  { %6499 = vrcp.f32 %v4573_v50 }
0x108b   :  { %v6496_v58 = vpop.eup %6495 }
0x108c   :  { %v6498_v47 = vpop.eup %6497  ;;  %v4577_v57 = vmul.f32 %v6496_v58, %v6494_v34 }
0x108d   :  { %v4576_v24 = vmul.f32 %v6498_v47, %v7816_v30  ;;  %v6500_v10 = vpop.eup %6499 }
0x108f   :  { %v4920_v16 = vpop.f32.mrb[32].mxu0  ;;  %v4578_v6 = vadd.f32 %v4577_v57, %v4576_v24 }
0x1090   :  { %v4685_v60 = vadd.f32 %v4920_v16, %v4861_v20  ;;  %v4679_v9 = vpop.f32.mrb[33].mxu0 }
0x1091   :  { %6501 = vtanh.f32 %v4578_v6  ;;  %v4680_v63 = vadd.f32 %v4861_v20, %v4679_v9 }
0x1092   :  { %4720 = vmax.xlane.f32.xlu0 %v4685_v60 }
0x1093   :  { %v4923_v17 = vpop.f32.mrb[34].mxu0 }
0x1094   :  { %v4695_v25 = vadd.f32 %v4923_v17, %v4861_v20  ;;  %v4689_v8 = vpop.f32.mrb[35].mxu0 }
0x1095   :  { %v4690_v13 = vadd.f32 %v4861_v20, %v4689_v8 }
0x1096   :  { %4724 = vmax.xlane.f32.xlu1 %v4695_v25  ;;  %4718 = vmax.xlane.f32.xlu0 %v4680_v63 }
0x1097   :  { %v4926_v35 = vpop.f32.mrb[36].mxu0 }
0x1098   :  { %v4699_v26 = vpop.f32.mrb[37].mxu0  ;;  %v4705_v39 = vadd.f32 %v4926_v35, %v4861_v20 }
0x1099   :  { %v4700_v41 = vadd.f32 %v4861_v20, %v4699_v26 }
0x109a   :  { %4722 = vmax.xlane.f32.xlu1 %v4690_v13 }
0x109b   :  { %v6502_v49 = vpop.eup %6501  ;;  %4726 = vmax.xlane.f32.xlu0 %v4700_v41 }
0x109c   :  { %v4580_v48 = vmul.f32 %v6502_v49, %v6500_v10 }
0x109e   :  { %4728 = vmax.xlane.f32.xlu1 %v4705_v39  ;;  %4928 = vmatmul.mubr.f32.gmra.mrb[38].mxu0 %v4580_v48 }
0x111f   :  { %v4721_v30 = vpop.xlane.xlu0 %4720 }
0x1120   :  { %v7875_v21 = vsub.f32 %v4685_v60, %v4721_v30 }
0x1122   :  { %v4744_v31 = vmul.f32 1.442695, %v7875_v21 }
0x1123   :  { %v4725_v1 = vpop.xlane.xlu1 %4724  ;;  %v4719_v3 = vpop.xlane.xlu0 %4718 }
0x1124   :  { %v7877_v12 = vsub.f32 %v4680_v63, %v4719_v3  ;;  %v7880_v28 = vsub.f32 %v4695_v25, %v4725_v1  ;;  %6503 = vpow2.f32 %v4744_v31 }
0x1126   :  { %v4742_v18 = vmul.f32 1.442695, %v7877_v12  ;;  %v4748_v2 = vmul.f32 1.442695, %v7880_v28 }
0x1127   :  { %v4723_v61 = vpop.xlane.xlu1 %4722 }
0x1128   :  { %v7883_v15 = vsub.f32 %v4690_v13, %v4723_v61  ;;  %v4727_v42 = vpop.xlane.xlu0 %4726  ;;  %6505 = vpow2.f32 %v4742_v18 }
0x1129   :  { %v7889_v54 = vsub.f32 %v4700_v41, %v4727_v42  ;;  %6507 = vpow2.f32 %v4748_v2 }
0x112a   :  { %v4746_v51 = vmul.f32 1.442695, %v7883_v15 }
0x112b   :  { %v4729_v53 = vpop.xlane.xlu1 %4728  ;;  %v4750_v7 = vmul.f32 1.442695, %v7889_v54 }
0x112c   :  { %v7886_v56 = vsub.f32 %v4705_v39, %v4729_v53  ;;  %6509 = vpow2.f32 %v4746_v51 }
0x112e   :  { %v4752_v32 = vmul.f32 1.442695, %v7886_v56  ;;  %v6504_v55 = vpop.eup %6503 }
0x1130   :  { %6511 = vpow2.f32 %v4752_v32 }
0x1131   :  { %6513 = vpow2.f32 %v4750_v7 }
0x1132   :  { %v6506_v11 = vpop.eup %6505 }
0x1133   :  { %v6508_v19 = vpop.eup %6507 }
0x1136   :  { %v6510_v46 = vpop.eup %6509 }
0x113a   :  { %v6512_v52 = vpop.eup %6511 }
0x113b   :  { %v6514_v40 = vpop.eup %6513 }
0x1171   :  { %v4929_v45 = vpop.f32.mrb[38].mxu0 }
0x1172   :  { %v4715_v62 = vadd.f32 %v4929_v45, %v4861_v20  ;;  %v4709_v59 = vpop.f32.mrb[39].mxu0 }
0x1173   :  { %v4710_v23 = vadd.f32 %v4861_v20, %v4709_v59 }
0x1174   :  { %4732 = vmax.xlane.f32.xlu1 %v4715_v62 }
0x1175   :  { %4730 = vmax.xlane.f32.xlu0 %v4710_v23 }
0x1178   :  { %4760 = vadd.xlane.f32.xlu1 %v6504_v55 }
0x1179   :  { %4758 = vadd.xlane.f32.xlu0 %v6506_v11 }
0x117c   :  { %4764 = vadd.xlane.f32.xlu1 %v6508_v19 }
0x117d   :  { %4762 = vadd.xlane.f32.xlu0 %v6510_v46 }
0x1180   :  { %4768 = vadd.xlane.f32.xlu1 %v6512_v52 }
0x1181   :  { %4766 = vadd.xlane.f32.xlu0 %v6514_v40 }
0x1201   :  { %v4733_v33 = vpop.xlane.xlu1 %4732 }
0x1202   :  { %v4741_v5 = vsub.f32 %v4715_v62, %v4733_v33  ;;  %v4731_v0 = vpop.xlane.xlu0 %4730 }
0x1203   :  { %v4740_v38 = vsub.f32 %v4710_v23, %v4731_v0 }
0x1204   :  { %v4756_v22 = vmul.f32 1.442695, %v4741_v5 }
0x1205   :  { %v4754_v36 = vmul.f32 1.442695, %v4740_v38  ;;  %v4761_v44 = vpop.xlane.xlu1 %4760 }
0x1206   :  { %6515 = vpow2.f32 %v4756_v22  ;;  %v4759_v43 = vpop.xlane.xlu0 %4758 }
0x1207   :  { %6517 = vpow2.f32 %v4754_v36 }
0x1208   :  { %6519 = vlog2.f32 %v4761_v44 }
0x1209   :  { %6521 = vlog2.f32 %v4759_v43  ;;  %v4765_v14 = vpop.xlane.xlu1 %4764 }
0x120a   :  { %6523 = vlog2.f32 %v4765_v14  ;;  %v4763_v27 = vpop.xlane.xlu0 %4762 }
0x120b   :  { %6525 = vlog2.f32 %v4763_v27 }
0x120d   :  { %v4769_v29 = vpop.xlane.xlu1 %4768 }
0x120e   :  { %6527 = vlog2.f32 %v4769_v29  ;;  %v4767_v4 = vpop.xlane.xlu0 %4766 }
0x120f   :  { %6529 = vlog2.f32 %v4767_v4 }
0x1210   :  { %v6516_v37 = vpop.eup %6515 }
0x1211   :  { %v6518_v34 = vpop.eup %6517  ;;  %4772 = vadd.xlane.f32.xlu1 %v6516_v37 }
0x1212   :  { %v6520_v58 = vpop.eup %6519  ;;  %4770 = vadd.xlane.f32.xlu0 %v6518_v34 }
0x1213   :  { %v6522_v47 = vpop.eup %6521  ;;  %v4777_v57 = vmul.f32 0.6931472, %v6520_v58 }
0x1214   :  { %v6524_v50 = vpop.eup %6523  ;;  %v4775_v24 = vmul.f32 0.6931472, %v6522_v47 }
0x1215   :  { %v6526_v20 = vpop.eup %6525  ;;  %v4791_v16 = vsub.f32 %v7875_v21, %v4777_v57  ;;  %v4781_v6 = vmul.f32 0.6931472, %v6524_v50 }
0x1216   :  { %v4790_v60 = vsub.f32 %v7877_v12, %v4775_v24  ;;  %v4779_v9 = vmul.f32 0.6931472, %v6526_v20 }
0x1217   :  { %4799 = vst [vmem:[%s7929_s6 + $0x8] sm:$0xff] %v4791_v16  ;;  %v4793_v17 = vsub.f32 %v7880_v28, %v4781_v6 }
0x1218   :  { %v6528_v63 = vpop.eup %6527  ;;  %4798 = vst [vmem:[%s7929_s6] sm:$0xff] %v4790_v60  ;;  %v4792_v25 = vsub.f32 %v7883_v15, %v4779_v9 }
0x1219   :  { %v6530_v8 = vpop.eup %6529  ;;  %4801 = vst [vmem:[%s7929_s6 + $0x18] sm:$0xff] %v4793_v17  ;;  %v4785_v35 = vmul.f32 0.6931472, %v6528_v63 }
0x121a   :  { %4800 = vst [vmem:[%s7929_s6 + $0x10] sm:$0xff] %v4792_v25  ;;  %v4783_v13 = vmul.f32 0.6931472, %v6530_v8 }
0x121b   :  { %v4795_v26 = vsub.f32 %v7886_v56, %v4785_v35 }
0x121c   :  { %v4794_v41 = vsub.f32 %v7889_v54, %v4783_v13 }
0x121d   :  { %4803 = vst [vmem:[%s7929_s6 + $0x28] sm:$0xff] %v4795_v26 }
0x121e   :  { %4802 = vst [vmem:[%s7929_s6 + $0x20] sm:$0xff] %v4794_v41 }
0x129e   :  { %v4773_v10 = vpop.xlane.xlu1 %4772 }
0x129f   :  { %6531 = vlog2.f32 %v4773_v10  ;;  %v4771_v49 = vpop.xlane.xlu0 %4770 }
0x12a0   :  { %6533 = vlog2.f32 %v4771_v49 }
0x12a9   :  { %v6532_v39 = vpop.eup %6531 }
0x12aa   :  { %v6534_v48 = vpop.eup %6533  ;;  %v4789_v30 = vmul.f32 0.6931472, %v6532_v39 }
0x12ab   :  { %v4787_v1 = vmul.f32 0.6931472, %v6534_v48 }
0x12ac   :  { %v4797_v3 = vsub.f32 %v4741_v5, %v4789_v30 }
0x12ad   :  { %v4796_v61 = vsub.f32 %v4740_v38, %v4787_v1 }
0x12ae   :  { %4805 = vst [vmem:[%s7929_s6 + $0x38] sm:$0xff] %v4797_v3 }
0x12af   :  { %4804 = vst [vmem:[%s7929_s6 + $0x30] sm:$0xff] %v4796_v61 }
0x12b0   :  { %4810 = vsyncpa [#allocation5], 1 }
0x12b1   :  { %4811 = vsyncpa [#allocation7], 1 }

</bundles_post_ra>
